<compile_context>
chip_gen: v7x
topology: tpu7x:2x2x1
jax: 0.10.0
libtpu: 0.0.40
codegen_flags: <defaults>
</compile_context>

<pallas_src>
import functools
import math

import jax
import jax.numpy as jnp
from jax import lax
from jax.experimental import pallas as pl
from jax.experimental.pallas import tpu as pltpu

# --------------------------- model configuration ----------------------------
VOCAB = 1000          # nn.Embedding(10000, d_model) -> shrunk vocab, same semantics
D_MODEL = 32          # d_model
NHEAD = 4             # nhead (must divide d_model)
HEAD_DIM = D_MODEL // NHEAD
NUM_LAYERS = 2        # num_layers
DIM_FF = 64           # TransformerEncoderLayer dim_feedforward (scaled down)
NUM_CLASSES = 5
CLS_PAD = 128         # classifier output padded to a full 128-lane store
LN_EPS = 1e-5         # PyTorch LayerNorm default eps
MAX_BATCH_BLOCK = 8   # batch elements per grid step (parallel axis for v7x 2-TC)


# ------------------------------- fused kernel --------------------------------
def fused_forward_kernel(
    ids_ref, table_ref, ln_g_ref, ln_b_ref,
    w_in_ref, b_in_ref, w_out_ref, b_out_ref, ln1_g_ref, ln1_b_ref,
    w_ff1_ref, b_ff1_ref, w_ff2_ref, b_ff2_ref, ln2_g_ref, ln2_b_ref,
    w_cls_ref, b_cls_ref, out_ref, *, batch_block, seq_len,
):
    rows = batch_block * seq_len
    scale = 1.0 / float(HEAD_DIM) ** 0.5

    def layer_norm(x, gamma, beta):
        mean = jnp.mean(x, axis=-1, keepdims=True)
        var = jnp.mean((x - mean) ** 2, axis=-1, keepdims=True)
        return (x - mean) * lax.rsqrt(var + LN_EPS) * gamma + beta

    # ---- embedding via one-hot MXU matmul, then self.layer_norm ------------
    ids = ids_ref[...]                                              # (rows, 1) i32
    onehot = (ids == lax.broadcasted_iota(jnp.int32, (rows, VOCAB), 1)
              ).astype(jnp.float32)                                 # (rows, VOCAB)
    x = jnp.dot(onehot, table_ref[...], preferred_element_type=jnp.float32)
    x = layer_norm(x, ln_g_ref[...], ln_b_ref[...])                 # (rows, D)

    # ---- encoder layers (post-norm, ReLU FFN, dropout = identity) ----------
    for l in range(NUM_LAYERS):
        # multi-head self attention
        qkv = jnp.dot(x, w_in_ref[l], preferred_element_type=jnp.float32) + b_in_ref[l]
        q = qkv[:, 0:D_MODEL].reshape(batch_block, seq_len, D_MODEL)
        k = qkv[:, D_MODEL:2 * D_MODEL].reshape(batch_block, seq_len, D_MODEL)
        v = qkv[:, 2 * D_MODEL:3 * D_MODEL].reshape(batch_block, seq_len, D_MODEL)

        head_outs = []
        for h in range(NHEAD):                      # static, fully unrolled
            lo, hi = h * HEAD_DIM, (h + 1) * HEAD_DIM
            qh, kh, vh = q[:, :, lo:hi], k[:, :, lo:hi], v[:, :, lo:hi]
            s = jnp.einsum("bqd,bkd->bqk", qh, kh,
                           preferred_element_type=jnp.float32) * scale
            m = jnp.max(s, axis=-1, keepdims=True)
            p = jnp.exp(s - m)
            p = p * pl.reciprocal(jnp.sum(p, axis=-1, keepdims=True), approx=True)
            head_outs.append(
                jnp.einsum("bqk,bkd->bqd", p, vh,
                           preferred_element_type=jnp.float32))
        attn = jnp.concatenate(head_outs, axis=-1).reshape(rows, D_MODEL)
        attn = (jnp.dot(attn, w_out_ref[l], preferred_element_type=jnp.float32)
                + b_out_ref[l])
        x = layer_norm(x + attn, ln1_g_ref[l], ln1_b_ref[l])

        # feed forward
        ff = jnp.dot(x, w_ff1_ref[l], preferred_element_type=jnp.float32) + b_ff1_ref[l]
        ff = jnp.maximum(ff, 0.0)
        ff = jnp.dot(ff, w_ff2_ref[l], preferred_element_type=jnp.float32) + b_ff2_ref[l]
        x = layer_norm(x + ff, ln2_g_ref[l], ln2_b_ref[l])

    # ---- classifier on sequence position 0 of every batch element ----------
    # (rows are batch-major (b, s); PyTorch's x.permute(1,0,2)[0] == s = 0.)
    x_first = jnp.concatenate(
        [x[b * seq_len:b * seq_len + 1, :] for b in range(batch_block)], axis=0)
    out_ref[...] = (jnp.dot(x_first, w_cls_ref[...],
                            preferred_element_type=jnp.float32) + b_cls_ref[...])


# ------------------------------ kernel wrapper --------------------------------
def skincare_transformer_forward(tokens, prep):
    """tokens: (B, S) int32 -> logits (B, NUM_CLASSES) float32."""
    B, S = tokens.shape
    bb = math.gcd(B, MAX_BATCH_BLOCK)        # batch elements per grid step
    grid = (B // bb,)
    ids = tokens.reshape(B * S, 1).astype(jnp.int32)

    weights = [
        prep["table"], prep["ln_g"], prep["ln_b"],
        prep["w_in"], prep["b_in"], prep["w_out"], prep["b_out"],
        prep["ln1_g"], prep["ln1_b"],
        prep["w_ff1"], prep["b_ff1"], prep["w_ff2"], prep["b_ff2"],
        prep["ln2_g"], prep["ln2_b"],
        prep["w_cls"], prep["b_cls"],
    ]

    in_specs = [pl.BlockSpec((bb * S, 1), lambda g: (g, 0))]
    # Full-array VMEM blocks with constant index maps: weights stay resident
    # across grid steps (no re-DMA).
    in_specs += [pl.BlockSpec(w.shape, lambda g, n=w.ndim: (0,) * n) for w in weights]
    out_spec = pl.BlockSpec((bb, CLS_PAD), lambda g: (g, 0))

    kernel = functools.partial(fused_forward_kernel, batch_block=bb, seq_len=S)
    padded_logits = pl.pallas_call(
        kernel,
        grid=grid,
        in_specs=in_specs,
        out_specs=out_spec,
        out_shape=jax.ShapeDtypeStruct((B, CLS_PAD), jnp.float32),
        compiler_params=pltpu.CompilerParams(
            dimension_semantics=("parallel",)),
    )(ids, *weights)
    return padded_logits[:, :NUM_CLASSES]


# ------------------------------ parameter init --------------------------------
def init_params(key):
    keys = jax.random.split(key, 2 + NUM_LAYERS)
    params = {
        "embedding": jax.random.normal(keys[0], (VOCAB, D_MODEL), jnp.float32) * 0.02,
        "ln_g": jnp.ones((D_MODEL,), jnp.float32),
        "ln_b": jnp.zeros((D_MODEL,), jnp.float32),
        "w_cls": jax.random.normal(keys[1], (D_MODEL, NUM_CLASSES), jnp.float32) * 0.02,
        "b_cls": jnp.zeros((NUM_CLASSES,), jnp.float32),
        "layers": [],
    }
    for l in range(NUM_LAYERS):
        k = jax.random.split(keys[2 + l], 4)
        params["layers"].append({
            # weights stored pre-transposed: y = x @ W + b
            "w_in":  jax.random.normal(k[0], (D_MODEL, 3 * D_MODEL), jnp.float32) * 0.02,
            "b_in":  jnp.zeros((3 * D_MODEL,), jnp.float32),
            "w_out": jax.random.normal(k[1], (D_MODEL, D_MODEL), jnp.float32) * 0.02,
            "b_out": jnp.zeros((D_MODEL,), jnp.float32),
            "ln1_g": jnp.ones((D_MODEL,), jnp.float32),
            "ln1_b": jnp.zeros((D_MODEL,), jnp.float32),
            "w_ff1": jax.random.normal(k[2], (D_MODEL, DIM_FF), jnp.float32) * 0.02,
            "b_ff1": jnp.zeros((DIM_FF,), jnp.float32),
            "w_ff2": jax.random.normal(k[3], (DIM_FF, D_MODEL), jnp.float32) * 0.02,
            "b_ff2": jnp.zeros((D_MODEL,), jnp.float32),
            "ln2_g": jnp.ones((D_MODEL,), jnp.float32),
            "ln2_b": jnp.zeros((D_MODEL,), jnp.float32),
        })
    return params


def prepare_params(params):
    """One-time repack into kernel-ready layout (stacked layers, 2-D biases,
    lane-padded classifier).  Done once, outside the jitted forward."""
    d = D_MODEL

    def stack(name):
        return jnp.stack([lp[name] for lp in params["layers"]], axis=0)

    return {
        "table": params["embedding"],                                   # (V, D)
        "ln_g": params["ln_g"].reshape(1, d),
        "ln_b": params["ln_b"].reshape(1, d),
        "w_in":  stack("w_in"),                                         # (L, D, 3D)
        "b_in":  stack("b_in").reshape(NUM_LAYERS, 1, 3 * d),
        "w_out": stack("w_out"),                                        # (L, D, D)
        "b_out": stack("b_out").reshape(NUM_LAYERS, 1, d),
        "ln1_g": stack("ln1_g").reshape(NUM_LAYERS, 1, d),
        "ln1_b": stack("ln1_b").reshape(NUM_LAYERS, 1, d),
        "w_ff1": stack("w_ff1"),                                        # (L, D, FF)
        "b_ff1": stack("b_ff1").reshape(NUM_LAYERS, 1, DIM_FF),
        "w_ff2": stack("w_ff2"),                                        # (L, FF, D)
        "b_ff2": stack("b_ff2").reshape(NUM_LAYERS, 1, d),
        "ln2_g": stack("ln2_g").reshape(NUM_LAYERS, 1, d),
        "ln2_b": stack("ln2_b").reshape(NUM_LAYERS, 1, d),
        # classifier zero-padded to 128 lanes for a dense vst; sliced outside
        "w_cls": jnp.pad(params["w_cls"], ((0, 0), (0, CLS_PAD - NUM_CLASSES))),
        "b_cls": jnp.pad(params["b_cls"], (0, CLS_PAD - NUM_CLASSES)).reshape(1, CLS_PAD),
    }


# ----------------------------------- main ------------------------------------
if __name__ == "__main__":
    key = jax.random.PRNGKey(0)
    pkey, tkey = jax.random.split(key)
    params = init_params(pkey)
    prep = prepare_params(params)

    B, S = 2, 8
    tokens = jax.random.randint(tkey, (B, S), 0, VOCAB, dtype=jnp.int32)

    fwd = jax.jit(skincare_transformer_forward)
    logits = jax.block_until_ready(fwd(tokens, prep))

    assert logits.shape == (B, NUM_CLASSES), logits.shape
    assert bool(jnp.all(jnp.isfinite(logits)))
    print("KERNEL_OK")
</pallas_src>

<mosaic_0001>
module attributes {stable_mosaic.version = 11 : i64} {
  func.func @fused_forward_kernel(%arg0: i32, %arg1: memref<16x1xi32, #tpu.memory_space<vmem>>, %arg2: memref<1000x32xf32, #tpu.memory_space<vmem>>, %arg3: memref<1x32xf32, #tpu.memory_space<vmem>>, %arg4: memref<1x32xf32, #tpu.memory_space<vmem>>, %arg5: memref<2x32x96xf32, #tpu.memory_space<vmem>>, %arg6: memref<2x1x96xf32, #tpu.memory_space<vmem>>, %arg7: memref<2x32x32xf32, #tpu.memory_space<vmem>>, %arg8: memref<2x1x32xf32, #tpu.memory_space<vmem>>, %arg9: memref<2x1x32xf32, #tpu.memory_space<vmem>>, %arg10: memref<2x1x32xf32, #tpu.memory_space<vmem>>, %arg11: memref<2x32x64xf32, #tpu.memory_space<vmem>>, %arg12: memref<2x1x64xf32, #tpu.memory_space<vmem>>, %arg13: memref<2x64x32xf32, #tpu.memory_space<vmem>>, %arg14: memref<2x1x32xf32, #tpu.memory_space<vmem>>, %arg15: memref<2x1x32xf32, #tpu.memory_space<vmem>>, %arg16: memref<2x1x32xf32, #tpu.memory_space<vmem>>, %arg17: memref<32x128xf32, #tpu.memory_space<vmem>>, %arg18: memref<1x128xf32, #tpu.memory_space<vmem>>, %arg19: memref<2x128xf32, #tpu.memory_space<vmem>>) attributes {dimension_semantics = [#tpu.dimension_semantics<parallel>], iteration_bounds = array<i64: 1>, scalar_prefetch = 0 : i64, scratch_operands = 0 : i64, tpu.core_type = #tpu.core_type<tc>, window_params = [{transform_indices = @transform_0, window_bounds = array<i64: 16, 1>}, {pipeline_mode = #tpu.pipeline_mode<synchronous>, transform_indices = @transform_1, window_bounds = array<i64: 1000, 32>}, {pipeline_mode = #tpu.pipeline_mode<synchronous>, transform_indices = @transform_2, window_bounds = array<i64: 1, 32>}, {pipeline_mode = #tpu.pipeline_mode<synchronous>, transform_indices = @transform_3, window_bounds = array<i64: 1, 32>}, {pipeline_mode = #tpu.pipeline_mode<synchronous>, transform_indices = @transform_4, window_bounds = array<i64: 2, 32, 96>}, {pipeline_mode = #tpu.pipeline_mode<synchronous>, transform_indices = @transform_5, window_bounds = array<i64: 2, 1, 96>}, {pipeline_mode = #tpu.pipeline_mode<synchronous>, transform_indices = @transform_6, window_bounds = array<i64: 2, 32, 32>}, {pipeline_mode = #tpu.pipeline_mode<synchronous>, transform_indices = @transform_7, window_bounds = array<i64: 2, 1, 32>}, {pipeline_mode = #tpu.pipeline_mode<synchronous>, transform_indices = @transform_8, window_bounds = array<i64: 2, 1, 32>}, {pipeline_mode = #tpu.pipeline_mode<synchronous>, transform_indices = @transform_9, window_bounds = array<i64: 2, 1, 32>}, {pipeline_mode = #tpu.pipeline_mode<synchronous>, transform_indices = @transform_10, window_bounds = array<i64: 2, 32, 64>}, {pipeline_mode = #tpu.pipeline_mode<synchronous>, transform_indices = @transform_11, window_bounds = array<i64: 2, 1, 64>}, {pipeline_mode = #tpu.pipeline_mode<synchronous>, transform_indices = @transform_12, window_bounds = array<i64: 2, 64, 32>}, {pipeline_mode = #tpu.pipeline_mode<synchronous>, transform_indices = @transform_13, window_bounds = array<i64: 2, 1, 32>}, {pipeline_mode = #tpu.pipeline_mode<synchronous>, transform_indices = @transform_14, window_bounds = array<i64: 2, 1, 32>}, {pipeline_mode = #tpu.pipeline_mode<synchronous>, transform_indices = @transform_15, window_bounds = array<i64: 2, 1, 32>}, {pipeline_mode = #tpu.pipeline_mode<synchronous>, transform_indices = @transform_16, window_bounds = array<i64: 32, 128>}, {pipeline_mode = #tpu.pipeline_mode<synchronous>, transform_indices = @transform_17, window_bounds = array<i64: 1, 128>}, {transform_indices = @transform_18, window_bounds = array<i64: 2, 128>}]} {
    %c0 = arith.constant 0 : index
    %c0_0 = arith.constant 0 : index
    %0 = vector.load %arg1[%c0, %c0_0] : memref<16x1xi32, #tpu.memory_space<vmem>>, vector<16x1xi32>
    %1 = tpu.iota {dimensions = array<i32: 1>} : vector<16x1000xi32>
    %2 = vector.broadcast %0 : vector<16x1xi32> to vector<16x1000xi32>
    %3 = arith.cmpi eq, %2, %1 : vector<16x1000xi32>
    %4 = arith.extui %3 : vector<16x1000xi1> to vector<16x1000xi32>
    %5 = arith.sitofp %4 : vector<16x1000xi32> to vector<16x1000xf32>
    %c0_1 = arith.constant 0 : index
    %c0_2 = arith.constant 0 : index
    %6 = vector.load %arg2[%c0_1, %c0_2] : memref<1000x32xf32, #tpu.memory_space<vmem>>, vector<1000x32xf32>
    %cst = arith.constant dense<0.000000e+00> : vector<16x32xf32>
    %7 = tpu.matmul %5, %6, %cst {dimension_numbers = #tpu.dot_dimension_numbers<[1], [0], [0], [1], [0, 0, 1, 1], [], []>} : vector<16x1000xf32>, vector<1000x32xf32>, vector<16x32xf32> -> vector<16x32xf32>
    %c0_3 = arith.constant 0 : index
    %c0_4 = arith.constant 0 : index
    %8 = vector.load %arg3[%c0_3, %c0_4] : memref<1x32xf32, #tpu.memory_space<vmem>>, vector<1x32xf32>
    %c0_5 = arith.constant 0 : index
    %c0_6 = arith.constant 0 : index
    %9 = vector.load %arg4[%c0_5, %c0_6] : memref<1x32xf32, #tpu.memory_space<vmem>>, vector<1x32xf32>
    %cst_7 = arith.constant dense<0.000000e+00> : vector<16xf32>
    %10 = vector.multi_reduction <add>, %7, %cst_7 [1] : vector<16x32xf32> to vector<16xf32>
    %11 = vector.shape_cast %10 : vector<16xf32> to vector<16x1xf32>
    %cst_8 = arith.constant 3.200000e+01 : f32
    %12 = vector.broadcast %cst_8 : f32 to vector<16x1xf32>
    %13 = arith.divf %11, %12 : vector<16x1xf32>
    %14 = vector.broadcast %13 : vector<16x1xf32> to vector<16x32xf32>
    %15 = arith.subf %7, %14 : vector<16x32xf32>
    %16 = arith.mulf %15, %15 : vector<16x32xf32>
    %cst_9 = arith.constant dense<0.000000e+00> : vector<16xf32>
    %17 = vector.multi_reduction <add>, %16, %cst_9 [1] : vector<16x32xf32> to vector<16xf32>
    %18 = vector.shape_cast %17 : vector<16xf32> to vector<16x1xf32>
    %cst_10 = arith.constant 3.200000e+01 : f32
    %19 = vector.broadcast %cst_10 : f32 to vector<16x1xf32>
    %20 = arith.divf %18, %19 : vector<16x1xf32>
    %21 = vector.broadcast %13 : vector<16x1xf32> to vector<16x32xf32>
    %22 = arith.subf %7, %21 : vector<16x32xf32>
    %cst_11 = arith.constant 9.99999974E-6 : f32
    %23 = vector.broadcast %cst_11 : f32 to vector<16x1xf32>
    %24 = arith.addf %20, %23 : vector<16x1xf32>
    %25 = math.rsqrt %24 : vector<16x1xf32>
    %26 = vector.broadcast %25 : vector<16x1xf32> to vector<16x32xf32>
    %27 = arith.mulf %22, %26 : vector<16x32xf32>
    %28 = vector.broadcast %8 : vector<1x32xf32> to vector<16x32xf32>
    %29 = arith.mulf %27, %28 : vector<16x32xf32>
    %30 = vector.broadcast %9 : vector<1x32xf32> to vector<16x32xf32>
    %31 = arith.addf %29, %30 : vector<16x32xf32>
    %c0_12 = arith.constant 0 : index
    %c0_13 = arith.constant 0 : index
    %c0_14 = arith.constant 0 : index
    %32 = vector.load %arg5[%c0_12, %c0_13, %c0_14] : memref<2x32x96xf32, #tpu.memory_space<vmem>>, vector<1x32x96xf32>
    %33 = vector.shape_cast %32 : vector<1x32x96xf32> to vector<32x96xf32>
    %cst_15 = arith.constant dense<0.000000e+00> : vector<16x96xf32>
    %34 = tpu.matmul %31, %33, %cst_15 {dimension_numbers = #tpu.dot_dimension_numbers<[1], [0], [0], [1], [0, 0, 1, 1], [], []>} : vector<16x32xf32>, vector<32x96xf32>, vector<16x96xf32> -> vector<16x96xf32>
    %c0_16 = arith.constant 0 : index
    %c0_17 = arith.constant 0 : index
    %c0_18 = arith.constant 0 : index
    %35 = vector.load %arg6[%c0_16, %c0_17, %c0_18] : memref<2x1x96xf32, #tpu.memory_space<vmem>>, vector<1x1x96xf32>
    %36 = vector.shape_cast %35 : vector<1x1x96xf32> to vector<1x96xf32>
    %37 = vector.broadcast %36 : vector<1x96xf32> to vector<16x96xf32>
    %38 = arith.addf %34, %37 : vector<16x96xf32>
    %39 = vector.extract_strided_slice %38 {offsets = [0, 0], sizes = [16, 32], strides = [1, 1]} : vector<16x96xf32> to vector<16x32xf32>
    %40 = vector.shape_cast %39 : vector<16x32xf32> to vector<2x8x32xf32>
    %41 = vector.extract_strided_slice %38 {offsets = [0, 32], sizes = [16, 32], strides = [1, 1]} : vector<16x96xf32> to vector<16x32xf32>
    %42 = vector.shape_cast %41 : vector<16x32xf32> to vector<2x8x32xf32>
    %43 = vector.extract_strided_slice %38 {offsets = [0, 64], sizes = [16, 32], strides = [1, 1]} : vector<16x96xf32> to vector<16x32xf32>
    %44 = vector.shape_cast %43 : vector<16x32xf32> to vector<2x8x32xf32>
    %45 = vector.extract_strided_slice %40 {offsets = [0, 0, 0], sizes = [2, 8, 8], strides = [1, 1, 1]} : vector<2x8x32xf32> to vector<2x8x8xf32>
    %46 = vector.extract_strided_slice %42 {offsets = [0, 0, 0], sizes = [2, 8, 8], strides = [1, 1, 1]} : vector<2x8x32xf32> to vector<2x8x8xf32>
    %47 = vector.extract_strided_slice %44 {offsets = [0, 0, 0], sizes = [2, 8, 8], strides = [1, 1, 1]} : vector<2x8x32xf32> to vector<2x8x8xf32>
    "tpu.trace_start"() <{level = 10 : i32, message = "bqd,bkd->bqk"}> : () -> ()
    %cst_19 = arith.constant dense<0.000000e+00> : vector<2x8x8xf32>
    %48 = tpu.matmul %45, %46, %cst_19 {dimension_numbers = #tpu.dot_dimension_numbers<[2], [2], [1], [1], [0, 0, 0, 1, 1, 1], [0], [0]>} : vector<2x8x8xf32>, vector<2x8x8xf32>, vector<2x8x8xf32> -> vector<2x8x8xf32>
    "tpu.trace_stop"() : () -> ()
    %cst_20 = arith.constant 0.353553385 : f32
    %49 = vector.broadcast %cst_20 : f32 to vector<2x8x8xf32>
    %50 = arith.mulf %48, %49 : vector<2x8x8xf32>
    %cst_21 = arith.constant dense<0xFF800000> : vector<2x8xf32>
    %51 = vector.multi_reduction <maximumf>, %50, %cst_21 [2] : vector<2x8x8xf32> to vector<2x8xf32>
    %52 = vector.shape_cast %51 : vector<2x8xf32> to vector<2x8x1xf32>
    %53 = vector.broadcast %52 : vector<2x8x1xf32> to vector<2x8x8xf32>
    %54 = arith.subf %50, %53 : vector<2x8x8xf32>
    %55 = math.exp %54 : vector<2x8x8xf32>
    %cst_22 = arith.constant dense<0.000000e+00> : vector<2x8xf32>
    %56 = vector.multi_reduction <add>, %55, %cst_22 [2] : vector<2x8x8xf32> to vector<2x8xf32>
    %57 = vector.shape_cast %56 : vector<2x8xf32> to vector<2x8x1xf32>
    %58 = tpu.reciprocal %57 {approx = true} : vector<2x8x1xf32> -> vector<2x8x1xf32>
    %59 = vector.broadcast %58 : vector<2x8x1xf32> to vector<2x8x8xf32>
    %60 = arith.mulf %55, %59 : vector<2x8x8xf32>
    "tpu.trace_start"() <{level = 10 : i32, message = "bqk,bkd->bqd"}> : () -> ()
    %cst_23 = arith.constant dense<0.000000e+00> : vector<2x8x8xf32>
    %61 = tpu.matmul %60, %47, %cst_23 {dimension_numbers = #tpu.dot_dimension_numbers<[2], [1], [1], [2], [0, 0, 0, 1, 1, 2], [0], [0]>} : vector<2x8x8xf32>, vector<2x8x8xf32>, vector<2x8x8xf32> -> vector<2x8x8xf32>
    "tpu.trace_stop"() : () -> ()
    %62 = vector.extract_strided_slice %40 {offsets = [0, 0, 8], sizes = [2, 8, 8], strides = [1, 1, 1]} : vector<2x8x32xf32> to vector<2x8x8xf32>
    %63 = vector.extract_strided_slice %42 {offsets = [0, 0, 8], sizes = [2, 8, 8], strides = [1, 1, 1]} : vector<2x8x32xf32> to vector<2x8x8xf32>
    %64 = vector.extract_strided_slice %44 {offsets = [0, 0, 8], sizes = [2, 8, 8], strides = [1, 1, 1]} : vector<2x8x32xf32> to vector<2x8x8xf32>
    "tpu.trace_start"() <{level = 10 : i32, message = "bqd,bkd->bqk"}> : () -> ()
    %cst_24 = arith.constant dense<0.000000e+00> : vector<2x8x8xf32>
    %65 = tpu.matmul %62, %63, %cst_24 {dimension_numbers = #tpu.dot_dimension_numbers<[2], [2], [1], [1], [0, 0, 0, 1, 1, 1], [0], [0]>} : vector<2x8x8xf32>, vector<2x8x8xf32>, vector<2x8x8xf32> -> vector<2x8x8xf32>
    "tpu.trace_stop"() : () -> ()
    %cst_25 = arith.constant 0.353553385 : f32
    %66 = vector.broadcast %cst_25 : f32 to vector<2x8x8xf32>
    %67 = arith.mulf %65, %66 : vector<2x8x8xf32>
    %cst_26 = arith.constant dense<0xFF800000> : vector<2x8xf32>
    %68 = vector.multi_reduction <maximumf>, %67, %cst_26 [2] : vector<2x8x8xf32> to vector<2x8xf32>
    %69 = vector.shape_cast %68 : vector<2x8xf32> to vector<2x8x1xf32>
    %70 = vector.broadcast %69 : vector<2x8x1xf32> to vector<2x8x8xf32>
    %71 = arith.subf %67, %70 : vector<2x8x8xf32>
    %72 = math.exp %71 : vector<2x8x8xf32>
    %cst_27 = arith.constant dense<0.000000e+00> : vector<2x8xf32>
    %73 = vector.multi_reduction <add>, %72, %cst_27 [2] : vector<2x8x8xf32> to vector<2x8xf32>
    %74 = vector.shape_cast %73 : vector<2x8xf32> to vector<2x8x1xf32>
    %75 = tpu.reciprocal %74 {approx = true} : vector<2x8x1xf32> -> vector<2x8x1xf32>
    %76 = vector.broadcast %75 : vector<2x8x1xf32> to vector<2x8x8xf32>
    %77 = arith.mulf %72, %76 : vector<2x8x8xf32>
    "tpu.trace_start"() <{level = 10 : i32, message = "bqk,bkd->bqd"}> : () -> ()
    %cst_28 = arith.constant dense<0.000000e+00> : vector<2x8x8xf32>
    %78 = tpu.matmul %77, %64, %cst_28 {dimension_numbers = #tpu.dot_dimension_numbers<[2], [1], [1], [2], [0, 0, 0, 1, 1, 2], [0], [0]>} : vector<2x8x8xf32>, vector<2x8x8xf32>, vector<2x8x8xf32> -> vector<2x8x8xf32>
    "tpu.trace_stop"() : () -> ()
    %79 = vector.extract_strided_slice %40 {offsets = [0, 0, 16], sizes = [2, 8, 8], strides = [1, 1, 1]} : vector<2x8x32xf32> to vector<2x8x8xf32>
    %80 = vector.extract_strided_slice %42 {offsets = [0, 0, 16], sizes = [2, 8, 8], strides = [1, 1, 1]} : vector<2x8x32xf32> to vector<2x8x8xf32>
    %81 = vector.extract_strided_slice %44 {offsets = [0, 0, 16], sizes = [2, 8, 8], strides = [1, 1, 1]} : vector<2x8x32xf32> to vector<2x8x8xf32>
    "tpu.trace_start"() <{level = 10 : i32, message = "bqd,bkd->bqk"}> : () -> ()
    %cst_29 = arith.constant dense<0.000000e+00> : vector<2x8x8xf32>
    %82 = tpu.matmul %79, %80, %cst_29 {dimension_numbers = #tpu.dot_dimension_numbers<[2], [2], [1], [1], [0, 0, 0, 1, 1, 1], [0], [0]>} : vector<2x8x8xf32>, vector<2x8x8xf32>, vector<2x8x8xf32> -> vector<2x8x8xf32>
    "tpu.trace_stop"() : () -> ()
    %cst_30 = arith.constant 0.353553385 : f32
    %83 = vector.broadcast %cst_30 : f32 to vector<2x8x8xf32>
    %84 = arith.mulf %82, %83 : vector<2x8x8xf32>
    %cst_31 = arith.constant dense<0xFF800000> : vector<2x8xf32>
    %85 = vector.multi_reduction <maximumf>, %84, %cst_31 [2] : vector<2x8x8xf32> to vector<2x8xf32>
    %86 = vector.shape_cast %85 : vector<2x8xf32> to vector<2x8x1xf32>
    %87 = vector.broadcast %86 : vector<2x8x1xf32> to vector<2x8x8xf32>
    %88 = arith.subf %84, %87 : vector<2x8x8xf32>
    %89 = math.exp %88 : vector<2x8x8xf32>
    %cst_32 = arith.constant dense<0.000000e+00> : vector<2x8xf32>
    %90 = vector.multi_reduction <add>, %89, %cst_32 [2] : vector<2x8x8xf32> to vector<2x8xf32>
    %91 = vector.shape_cast %90 : vector<2x8xf32> to vector<2x8x1xf32>
    %92 = tpu.reciprocal %91 {approx = true} : vector<2x8x1xf32> -> vector<2x8x1xf32>
    %93 = vector.broadcast %92 : vector<2x8x1xf32> to vector<2x8x8xf32>
    %94 = arith.mulf %89, %93 : vector<2x8x8xf32>
    "tpu.trace_start"() <{level = 10 : i32, message = "bqk,bkd->bqd"}> : () -> ()
    %cst_33 = arith.constant dense<0.000000e+00> : vector<2x8x8xf32>
    %95 = tpu.matmul %94, %81, %cst_33 {dimension_numbers = #tpu.dot_dimension_numbers<[2], [1], [1], [2], [0, 0, 0, 1, 1, 2], [0], [0]>} : vector<2x8x8xf32>, vector<2x8x8xf32>, vector<2x8x8xf32> -> vector<2x8x8xf32>
    "tpu.trace_stop"() : () -> ()
    %96 = vector.extract_strided_slice %40 {offsets = [0, 0, 24], sizes = [2, 8, 8], strides = [1, 1, 1]} : vector<2x8x32xf32> to vector<2x8x8xf32>
    %97 = vector.extract_strided_slice %42 {offsets = [0, 0, 24], sizes = [2, 8, 8], strides = [1, 1, 1]} : vector<2x8x32xf32> to vector<2x8x8xf32>
    %98 = vector.extract_strided_slice %44 {offsets = [0, 0, 24], sizes = [2, 8, 8], strides = [1, 1, 1]} : vector<2x8x32xf32> to vector<2x8x8xf32>
    "tpu.trace_start"() <{level = 10 : i32, message = "bqd,bkd->bqk"}> : () -> ()
    %cst_34 = arith.constant dense<0.000000e+00> : vector<2x8x8xf32>
    %99 = tpu.matmul %96, %97, %cst_34 {dimension_numbers = #tpu.dot_dimension_numbers<[2], [2], [1], [1], [0, 0, 0, 1, 1, 1], [0], [0]>} : vector<2x8x8xf32>, vector<2x8x8xf32>, vector<2x8x8xf32> -> vector<2x8x8xf32>
    "tpu.trace_stop"() : () -> ()
    %cst_35 = arith.constant 0.353553385 : f32
    %100 = vector.broadcast %cst_35 : f32 to vector<2x8x8xf32>
    %101 = arith.mulf %99, %100 : vector<2x8x8xf32>
    %cst_36 = arith.constant dense<0xFF800000> : vector<2x8xf32>
    %102 = vector.multi_reduction <maximumf>, %101, %cst_36 [2] : vector<2x8x8xf32> to vector<2x8xf32>
    %103 = vector.shape_cast %102 : vector<2x8xf32> to vector<2x8x1xf32>
    %104 = vector.broadcast %103 : vector<2x8x1xf32> to vector<2x8x8xf32>
    %105 = arith.subf %101, %104 : vector<2x8x8xf32>
    %106 = math.exp %105 : vector<2x8x8xf32>
    %cst_37 = arith.constant dense<0.000000e+00> : vector<2x8xf32>
    %107 = vector.multi_reduction <add>, %106, %cst_37 [2] : vector<2x8x8xf32> to vector<2x8xf32>
    %108 = vector.shape_cast %107 : vector<2x8xf32> to vector<2x8x1xf32>
    %109 = tpu.reciprocal %108 {approx = true} : vector<2x8x1xf32> -> vector<2x8x1xf32>
    %110 = vector.broadcast %109 : vector<2x8x1xf32> to vector<2x8x8xf32>
    %111 = arith.mulf %106, %110 : vector<2x8x8xf32>
    "tpu.trace_start"() <{level = 10 : i32, message = "bqk,bkd->bqd"}> : () -> ()
    %cst_38 = arith.constant dense<0.000000e+00> : vector<2x8x8xf32>
    %112 = tpu.matmul %111, %98, %cst_38 {dimension_numbers = #tpu.dot_dimension_numbers<[2], [1], [1], [2], [0, 0, 0, 1, 1, 2], [0], [0]>} : vector<2x8x8xf32>, vector<2x8x8xf32>, vector<2x8x8xf32> -> vector<2x8x8xf32>
    "tpu.trace_stop"() : () -> ()
    %113 = tpu.concatenate %61, %78, %95, %112 in 2 : vector<2x8x8xf32>, vector<2x8x8xf32>, vector<2x8x8xf32>, vector<2x8x8xf32> -> vector<2x8x32xf32>
    %114 = vector.shape_cast %113 : vector<2x8x32xf32> to vector<16x32xf32>
    %c0_39 = arith.constant 0 : index
    %c0_40 = arith.constant 0 : index
    %c0_41 = arith.constant 0 : index
    %115 = vector.load %arg7[%c0_39, %c0_40, %c0_41] : memref<2x32x32xf32, #tpu.memory_space<vmem>>, vector<1x32x32xf32>
    %116 = vector.shape_cast %115 : vector<1x32x32xf32> to vector<32x32xf32>
    %cst_42 = arith.constant dense<0.000000e+00> : vector<16x32xf32>
    %117 = tpu.matmul %114, %116, %cst_42 {dimension_numbers = #tpu.dot_dimension_numbers<[1], [0], [0], [1], [0, 0, 1, 1], [], []>} : vector<16x32xf32>, vector<32x32xf32>, vector<16x32xf32> -> vector<16x32xf32>
    %c0_43 = arith.constant 0 : index
    %c0_44 = arith.constant 0 : index
    %c0_45 = arith.constant 0 : index
    %118 = vector.load %arg8[%c0_43, %c0_44, %c0_45] : memref<2x1x32xf32, #tpu.memory_space<vmem>>, vector<1x1x32xf32>
    %119 = vector.shape_cast %118 : vector<1x1x32xf32> to vector<1x32xf32>
    %120 = vector.broadcast %119 : vector<1x32xf32> to vector<16x32xf32>
    %121 = arith.addf %117, %120 : vector<16x32xf32>
    %122 = arith.addf %31, %121 : vector<16x32xf32>
    %c0_46 = arith.constant 0 : index
    %c0_47 = arith.constant 0 : index
    %c0_48 = arith.constant 0 : index
    %123 = vector.load %arg9[%c0_46, %c0_47, %c0_48] : memref<2x1x32xf32, #tpu.memory_space<vmem>>, vector<1x1x32xf32>
    %124 = vector.shape_cast %123 : vector<1x1x32xf32> to vector<1x32xf32>
    %c0_49 = arith.constant 0 : index
    %c0_50 = arith.constant 0 : index
    %c0_51 = arith.constant 0 : index
    %125 = vector.load %arg10[%c0_49, %c0_50, %c0_51] : memref<2x1x32xf32, #tpu.memory_space<vmem>>, vector<1x1x32xf32>
    %126 = vector.shape_cast %125 : vector<1x1x32xf32> to vector<1x32xf32>
    %cst_52 = arith.constant dense<0.000000e+00> : vector<16xf32>
    %127 = vector.multi_reduction <add>, %122, %cst_52 [1] : vector<16x32xf32> to vector<16xf32>
    %128 = vector.shape_cast %127 : vector<16xf32> to vector<16x1xf32>
    %cst_53 = arith.constant 3.200000e+01 : f32
    %129 = vector.broadcast %cst_53 : f32 to vector<16x1xf32>
    %130 = arith.divf %128, %129 : vector<16x1xf32>
    %131 = vector.broadcast %130 : vector<16x1xf32> to vector<16x32xf32>
    %132 = arith.subf %122, %131 : vector<16x32xf32>
    %133 = arith.mulf %132, %132 : vector<16x32xf32>
    %cst_54 = arith.constant dense<0.000000e+00> : vector<16xf32>
    %134 = vector.multi_reduction <add>, %133, %cst_54 [1] : vector<16x32xf32> to vector<16xf32>
    %135 = vector.shape_cast %134 : vector<16xf32> to vector<16x1xf32>
    %cst_55 = arith.constant 3.200000e+01 : f32
    %136 = vector.broadcast %cst_55 : f32 to vector<16x1xf32>
    %137 = arith.divf %135, %136 : vector<16x1xf32>
    %138 = vector.broadcast %130 : vector<16x1xf32> to vector<16x32xf32>
    %139 = arith.subf %122, %138 : vector<16x32xf32>
    %cst_56 = arith.constant 9.99999974E-6 : f32
    %140 = vector.broadcast %cst_56 : f32 to vector<16x1xf32>
    %141 = arith.addf %137, %140 : vector<16x1xf32>
    %142 = math.rsqrt %141 : vector<16x1xf32>
    %143 = vector.broadcast %142 : vector<16x1xf32> to vector<16x32xf32>
    %144 = arith.mulf %139, %143 : vector<16x32xf32>
    %145 = vector.broadcast %124 : vector<1x32xf32> to vector<16x32xf32>
    %146 = arith.mulf %144, %145 : vector<16x32xf32>
    %147 = vector.broadcast %126 : vector<1x32xf32> to vector<16x32xf32>
    %148 = arith.addf %146, %147 : vector<16x32xf32>
    %c0_57 = arith.constant 0 : index
    %c0_58 = arith.constant 0 : index
    %c0_59 = arith.constant 0 : index
    %149 = vector.load %arg11[%c0_57, %c0_58, %c0_59] : memref<2x32x64xf32, #tpu.memory_space<vmem>>, vector<1x32x64xf32>
    %150 = vector.shape_cast %149 : vector<1x32x64xf32> to vector<32x64xf32>
    %cst_60 = arith.constant dense<0.000000e+00> : vector<16x64xf32>
    %151 = tpu.matmul %148, %150, %cst_60 {dimension_numbers = #tpu.dot_dimension_numbers<[1], [0], [0], [1], [0, 0, 1, 1], [], []>} : vector<16x32xf32>, vector<32x64xf32>, vector<16x64xf32> -> vector<16x64xf32>
    %c0_61 = arith.constant 0 : index
    %c0_62 = arith.constant 0 : index
    %c0_63 = arith.constant 0 : index
    %152 = vector.load %arg12[%c0_61, %c0_62, %c0_63] : memref<2x1x64xf32, #tpu.memory_space<vmem>>, vector<1x1x64xf32>
    %153 = vector.shape_cast %152 : vector<1x1x64xf32> to vector<1x64xf32>
    %154 = vector.broadcast %153 : vector<1x64xf32> to vector<16x64xf32>
    %155 = arith.addf %151, %154 : vector<16x64xf32>
    %cst_64 = arith.constant 0.000000e+00 : f32
    %156 = vector.broadcast %cst_64 : f32 to vector<16x64xf32>
    %157 = arith.maximumf %155, %156 : vector<16x64xf32>
    %c0_65 = arith.constant 0 : index
    %c0_66 = arith.constant 0 : index
    %c0_67 = arith.constant 0 : index
    %158 = vector.load %arg13[%c0_65, %c0_66, %c0_67] : memref<2x64x32xf32, #tpu.memory_space<vmem>>, vector<1x64x32xf32>
    %159 = vector.shape_cast %158 : vector<1x64x32xf32> to vector<64x32xf32>
    %cst_68 = arith.constant dense<0.000000e+00> : vector<16x32xf32>
    %160 = tpu.matmul %157, %159, %cst_68 {dimension_numbers = #tpu.dot_dimension_numbers<[1], [0], [0], [1], [0, 0, 1, 1], [], []>} : vector<16x64xf32>, vector<64x32xf32>, vector<16x32xf32> -> vector<16x32xf32>
    %c0_69 = arith.constant 0 : index
    %c0_70 = arith.constant 0 : index
    %c0_71 = arith.constant 0 : index
    %161 = vector.load %arg14[%c0_69, %c0_70, %c0_71] : memref<2x1x32xf32, #tpu.memory_space<vmem>>, vector<1x1x32xf32>
    %162 = vector.shape_cast %161 : vector<1x1x32xf32> to vector<1x32xf32>
    %163 = vector.broadcast %162 : vector<1x32xf32> to vector<16x32xf32>
    %164 = arith.addf %160, %163 : vector<16x32xf32>
    %165 = arith.addf %148, %164 : vector<16x32xf32>
    %c0_72 = arith.constant 0 : index
    %c0_73 = arith.constant 0 : index
    %c0_74 = arith.constant 0 : index
    %166 = vector.load %arg15[%c0_72, %c0_73, %c0_74] : memref<2x1x32xf32, #tpu.memory_space<vmem>>, vector<1x1x32xf32>
    %167 = vector.shape_cast %166 : vector<1x1x32xf32> to vector<1x32xf32>
    %c0_75 = arith.constant 0 : index
    %c0_76 = arith.constant 0 : index
    %c0_77 = arith.constant 0 : index
    %168 = vector.load %arg16[%c0_75, %c0_76, %c0_77] : memref<2x1x32xf32, #tpu.memory_space<vmem>>, vector<1x1x32xf32>
    %169 = vector.shape_cast %168 : vector<1x1x32xf32> to vector<1x32xf32>
    %cst_78 = arith.constant dense<0.000000e+00> : vector<16xf32>
    %170 = vector.multi_reduction <add>, %165, %cst_78 [1] : vector<16x32xf32> to vector<16xf32>
    %171 = vector.shape_cast %170 : vector<16xf32> to vector<16x1xf32>
    %cst_79 = arith.constant 3.200000e+01 : f32
    %172 = vector.broadcast %cst_79 : f32 to vector<16x1xf32>
    %173 = arith.divf %171, %172 : vector<16x1xf32>
    %174 = vector.broadcast %173 : vector<16x1xf32> to vector<16x32xf32>
    %175 = arith.subf %165, %174 : vector<16x32xf32>
    %176 = arith.mulf %175, %175 : vector<16x32xf32>
    %cst_80 = arith.constant dense<0.000000e+00> : vector<16xf32>
    %177 = vector.multi_reduction <add>, %176, %cst_80 [1] : vector<16x32xf32> to vector<16xf32>
    %178 = vector.shape_cast %177 : vector<16xf32> to vector<16x1xf32>
    %cst_81 = arith.constant 3.200000e+01 : f32
    %179 = vector.broadcast %cst_81 : f32 to vector<16x1xf32>
    %180 = arith.divf %178, %179 : vector<16x1xf32>
    %181 = vector.broadcast %173 : vector<16x1xf32> to vector<16x32xf32>
    %182 = arith.subf %165, %181 : vector<16x32xf32>
    %cst_82 = arith.constant 9.99999974E-6 : f32
    %183 = vector.broadcast %cst_82 : f32 to vector<16x1xf32>
    %184 = arith.addf %180, %183 : vector<16x1xf32>
    %185 = math.rsqrt %184 : vector<16x1xf32>
    %186 = vector.broadcast %185 : vector<16x1xf32> to vector<16x32xf32>
    %187 = arith.mulf %182, %186 : vector<16x32xf32>
    %188 = vector.broadcast %167 : vector<1x32xf32> to vector<16x32xf32>
    %189 = arith.mulf %187, %188 : vector<16x32xf32>
    %190 = vector.broadcast %169 : vector<1x32xf32> to vector<16x32xf32>
    %191 = arith.addf %189, %190 : vector<16x32xf32>
    %c1 = arith.constant 1 : index
    %c0_83 = arith.constant 0 : index
    %c0_84 = arith.constant 0 : index
    %192 = vector.load %arg5[%c1, %c0_83, %c0_84] : memref<2x32x96xf32, #tpu.memory_space<vmem>>, vector<1x32x96xf32>
    %193 = vector.shape_cast %192 : vector<1x32x96xf32> to vector<32x96xf32>
    %cst_85 = arith.constant dense<0.000000e+00> : vector<16x96xf32>
    %194 = tpu.matmul %191, %193, %cst_85 {dimension_numbers = #tpu.dot_dimension_numbers<[1], [0], [0], [1], [0, 0, 1, 1], [], []>} : vector<16x32xf32>, vector<32x96xf32>, vector<16x96xf32> -> vector<16x96xf32>
    %c1_86 = arith.constant 1 : index
    %c0_87 = arith.constant 0 : index
    %c0_88 = arith.constant 0 : index
    %195 = vector.load %arg6[%c1_86, %c0_87, %c0_88] : memref<2x1x96xf32, #tpu.memory_space<vmem>>, vector<1x1x96xf32>
    %196 = vector.shape_cast %195 : vector<1x1x96xf32> to vector<1x96xf32>
    %197 = vector.broadcast %196 : vector<1x96xf32> to vector<16x96xf32>
    %198 = arith.addf %194, %197 : vector<16x96xf32>
    %199 = vector.extract_strided_slice %198 {offsets = [0, 0], sizes = [16, 32], strides = [1, 1]} : vector<16x96xf32> to vector<16x32xf32>
    %200 = vector.shape_cast %199 : vector<16x32xf32> to vector<2x8x32xf32>
    %201 = vector.extract_strided_slice %198 {offsets = [0, 32], sizes = [16, 32], strides = [1, 1]} : vector<16x96xf32> to vector<16x32xf32>
    %202 = vector.shape_cast %201 : vector<16x32xf32> to vector<2x8x32xf32>
    %203 = vector.extract_strided_slice %198 {offsets = [0, 64], sizes = [16, 32], strides = [1, 1]} : vector<16x96xf32> to vector<16x32xf32>
    %204 = vector.shape_cast %203 : vector<16x32xf32> to vector<2x8x32xf32>
    %205 = vector.extract_strided_slice %200 {offsets = [0, 0, 0], sizes = [2, 8, 8], strides = [1, 1, 1]} : vector<2x8x32xf32> to vector<2x8x8xf32>
    %206 = vector.extract_strided_slice %202 {offsets = [0, 0, 0], sizes = [2, 8, 8], strides = [1, 1, 1]} : vector<2x8x32xf32> to vector<2x8x8xf32>
    %207 = vector.extract_strided_slice %204 {offsets = [0, 0, 0], sizes = [2, 8, 8], strides = [1, 1, 1]} : vector<2x8x32xf32> to vector<2x8x8xf32>
    "tpu.trace_start"() <{level = 10 : i32, message = "bqd,bkd->bqk"}> : () -> ()
    %cst_89 = arith.constant dense<0.000000e+00> : vector<2x8x8xf32>
    %208 = tpu.matmul %205, %206, %cst_89 {dimension_numbers = #tpu.dot_dimension_numbers<[2], [2], [1], [1], [0, 0, 0, 1, 1, 1], [0], [0]>} : vector<2x8x8xf32>, vector<2x8x8xf32>, vector<2x8x8xf32> -> vector<2x8x8xf32>
    "tpu.trace_stop"() : () -> ()
    %cst_90 = arith.constant 0.353553385 : f32
    %209 = vector.broadcast %cst_90 : f32 to vector<2x8x8xf32>
    %210 = arith.mulf %208, %209 : vector<2x8x8xf32>
    %cst_91 = arith.constant dense<0xFF800000> : vector<2x8xf32>
    %211 = vector.multi_reduction <maximumf>, %210, %cst_91 [2] : vector<2x8x8xf32> to vector<2x8xf32>
    %212 = vector.shape_cast %211 : vector<2x8xf32> to vector<2x8x1xf32>
    %213 = vector.broadcast %212 : vector<2x8x1xf32> to vector<2x8x8xf32>
    %214 = arith.subf %210, %213 : vector<2x8x8xf32>
    %215 = math.exp %214 : vector<2x8x8xf32>
    %cst_92 = arith.constant dense<0.000000e+00> : vector<2x8xf32>
    %216 = vector.multi_reduction <add>, %215, %cst_92 [2] : vector<2x8x8xf32> to vector<2x8xf32>
    %217 = vector.shape_cast %216 : vector<2x8xf32> to vector<2x8x1xf32>
    %218 = tpu.reciprocal %217 {approx = true} : vector<2x8x1xf32> -> vector<2x8x1xf32>
    %219 = vector.broadcast %218 : vector<2x8x1xf32> to vector<2x8x8xf32>
    %220 = arith.mulf %215, %219 : vector<2x8x8xf32>
    "tpu.trace_start"() <{level = 10 : i32, message = "bqk,bkd->bqd"}> : () -> ()
    %cst_93 = arith.constant dense<0.000000e+00> : vector<2x8x8xf32>
    %221 = tpu.matmul %220, %207, %cst_93 {dimension_numbers = #tpu.dot_dimension_numbers<[2], [1], [1], [2], [0, 0, 0, 1, 1, 2], [0], [0]>} : vector<2x8x8xf32>, vector<2x8x8xf32>, vector<2x8x8xf32> -> vector<2x8x8xf32>
    "tpu.trace_stop"() : () -> ()
    %222 = vector.extract_strided_slice %200 {offsets = [0, 0, 8], sizes = [2, 8, 8], strides = [1, 1, 1]} : vector<2x8x32xf32> to vector<2x8x8xf32>
    %223 = vector.extract_strided_slice %202 {offsets = [0, 0, 8], sizes = [2, 8, 8], strides = [1, 1, 1]} : vector<2x8x32xf32> to vector<2x8x8xf32>
    %224 = vector.extract_strided_slice %204 {offsets = [0, 0, 8], sizes = [2, 8, 8], strides = [1, 1, 1]} : vector<2x8x32xf32> to vector<2x8x8xf32>
    "tpu.trace_start"() <{level = 10 : i32, message = "bqd,bkd->bqk"}> : () -> ()
    %cst_94 = arith.constant dense<0.000000e+00> : vector<2x8x8xf32>
    %225 = tpu.matmul %222, %223, %cst_94 {dimension_numbers = #tpu.dot_dimension_numbers<[2], [2], [1], [1], [0, 0, 0, 1, 1, 1], [0], [0]>} : vector<2x8x8xf32>, vector<2x8x8xf32>, vector<2x8x8xf32> -> vector<2x8x8xf32>
    "tpu.trace_stop"() : () -> ()
    %cst_95 = arith.constant 0.353553385 : f32
    %226 = vector.broadcast %cst_95 : f32 to vector<2x8x8xf32>
    %227 = arith.mulf %225, %226 : vector<2x8x8xf32>
    %cst_96 = arith.constant dense<0xFF800000> : vector<2x8xf32>
    %228 = vector.multi_reduction <maximumf>, %227, %cst_96 [2] : vector<2x8x8xf32> to vector<2x8xf32>
    %229 = vector.shape_cast %228 : vector<2x8xf32> to vector<2x8x1xf32>
    %230 = vector.broadcast %229 : vector<2x8x1xf32> to vector<2x8x8xf32>
    %231 = arith.subf %227, %230 : vector<2x8x8xf32>
    %232 = math.exp %231 : vector<2x8x8xf32>
    %cst_97 = arith.constant dense<0.000000e+00> : vector<2x8xf32>
    %233 = vector.multi_reduction <add>, %232, %cst_97 [2] : vector<2x8x8xf32> to vector<2x8xf32>
    %234 = vector.shape_cast %233 : vector<2x8xf32> to vector<2x8x1xf32>
    %235 = tpu.reciprocal %234 {approx = true} : vector<2x8x1xf32> -> vector<2x8x1xf32>
    %236 = vector.broadcast %235 : vector<2x8x1xf32> to vector<2x8x8xf32>
    %237 = arith.mulf %232, %236 : vector<2x8x8xf32>
    "tpu.trace_start"() <{level = 10 : i32, message = "bqk,bkd->bqd"}> : () -> ()
    %cst_98 = arith.constant dense<0.000000e+00> : vector<2x8x8xf32>
    %238 = tpu.matmul %237, %224, %cst_98 {dimension_numbers = #tpu.dot_dimension_numbers<[2], [1], [1], [2], [0, 0, 0, 1, 1, 2], [0], [0]>} : vector<2x8x8xf32>, vector<2x8x8xf32>, vector<2x8x8xf32> -> vector<2x8x8xf32>
    "tpu.trace_stop"() : () -> ()
    %239 = vector.extract_strided_slice %200 {offsets = [0, 0, 16], sizes = [2, 8, 8], strides = [1, 1, 1]} : vector<2x8x32xf32> to vector<2x8x8xf32>
    %240 = vector.extract_strided_slice %202 {offsets = [0, 0, 16], sizes = [2, 8, 8], strides = [1, 1, 1]} : vector<2x8x32xf32> to vector<2x8x8xf32>
    %241 = vector.extract_strided_slice %204 {offsets = [0, 0, 16], sizes = [2, 8, 8], strides = [1, 1, 1]} : vector<2x8x32xf32> to vector<2x8x8xf32>
    "tpu.trace_start"() <{level = 10 : i32, message = "bqd,bkd->bqk"}> : () -> ()
    %cst_99 = arith.constant dense<0.000000e+00> : vector<2x8x8xf32>
    %242 = tpu.matmul %239, %240, %cst_99 {dimension_numbers = #tpu.dot_dimension_numbers<[2], [2], [1], [1], [0, 0, 0, 1, 1, 1], [0], [0]>} : vector<2x8x8xf32>, vector<2x8x8xf32>, vector<2x8x8xf32> -> vector<2x8x8xf32>
    "tpu.trace_stop"() : () -> ()
    %cst_100 = arith.constant 0.353553385 : f32
    %243 = vector.broadcast %cst_100 : f32 to vector<2x8x8xf32>
    %244 = arith.mulf %242, %243 : vector<2x8x8xf32>
    %cst_101 = arith.constant dense<0xFF800000> : vector<2x8xf32>
    %245 = vector.multi_reduction <maximumf>, %244, %cst_101 [2] : vector<2x8x8xf32> to vector<2x8xf32>
    %246 = vector.shape_cast %245 : vector<2x8xf32> to vector<2x8x1xf32>
    %247 = vector.broadcast %246 : vector<2x8x1xf32> to vector<2x8x8xf32>
    %248 = arith.subf %244, %247 : vector<2x8x8xf32>
    %249 = math.exp %248 : vector<2x8x8xf32>
    %cst_102 = arith.constant dense<0.000000e+00> : vector<2x8xf32>
    %250 = vector.multi_reduction <add>, %249, %cst_102 [2] : vector<2x8x8xf32> to vector<2x8xf32>
    %251 = vector.shape_cast %250 : vector<2x8xf32> to vector<2x8x1xf32>
    %252 = tpu.reciprocal %251 {approx = true} : vector<2x8x1xf32> -> vector<2x8x1xf32>
    %253 = vector.broadcast %252 : vector<2x8x1xf32> to vector<2x8x8xf32>
    %254 = arith.mulf %249, %253 : vector<2x8x8xf32>
    "tpu.trace_start"() <{level = 10 : i32, message = "bqk,bkd->bqd"}> : () -> ()
    %cst_103 = arith.constant dense<0.000000e+00> : vector<2x8x8xf32>
    %255 = tpu.matmul %254, %241, %cst_103 {dimension_numbers = #tpu.dot_dimension_numbers<[2], [1], [1], [2], [0, 0, 0, 1, 1, 2], [0], [0]>} : vector<2x8x8xf32>, vector<2x8x8xf32>, vector<2x8x8xf32> -> vector<2x8x8xf32>
    "tpu.trace_stop"() : () -> ()
    %256 = vector.extract_strided_slice %200 {offsets = [0, 0, 24], sizes = [2, 8, 8], strides = [1, 1, 1]} : vector<2x8x32xf32> to vector<2x8x8xf32>
    %257 = vector.extract_strided_slice %202 {offsets = [0, 0, 24], sizes = [2, 8, 8], strides = [1, 1, 1]} : vector<2x8x32xf32> to vector<2x8x8xf32>
    %258 = vector.extract_strided_slice %204 {offsets = [0, 0, 24], sizes = [2, 8, 8], strides = [1, 1, 1]} : vector<2x8x32xf32> to vector<2x8x8xf32>
    "tpu.trace_start"() <{level = 10 : i32, message = "bqd,bkd->bqk"}> : () -> ()
    %cst_104 = arith.constant dense<0.000000e+00> : vector<2x8x8xf32>
    %259 = tpu.matmul %256, %257, %cst_104 {dimension_numbers = #tpu.dot_dimension_numbers<[2], [2], [1], [1], [0, 0, 0, 1, 1, 1], [0], [0]>} : vector<2x8x8xf32>, vector<2x8x8xf32>, vector<2x8x8xf32> -> vector<2x8x8xf32>
    "tpu.trace_stop"() : () -> ()
    %cst_105 = arith.constant 0.353553385 : f32
    %260 = vector.broadcast %cst_105 : f32 to vector<2x8x8xf32>
    %261 = arith.mulf %259, %260 : vector<2x8x8xf32>
    %cst_106 = arith.constant dense<0xFF800000> : vector<2x8xf32>
    %262 = vector.multi_reduction <maximumf>, %261, %cst_106 [2] : vector<2x8x8xf32> to vector<2x8xf32>
    %263 = vector.shape_cast %262 : vector<2x8xf32> to vector<2x8x1xf32>
    %264 = vector.broadcast %263 : vector<2x8x1xf32> to vector<2x8x8xf32>
    %265 = arith.subf %261, %264 : vector<2x8x8xf32>
    %266 = math.exp %265 : vector<2x8x8xf32>
    %cst_107 = arith.constant dense<0.000000e+00> : vector<2x8xf32>
    %267 = vector.multi_reduction <add>, %266, %cst_107 [2] : vector<2x8x8xf32> to vector<2x8xf32>
    %268 = vector.shape_cast %267 : vector<2x8xf32> to vector<2x8x1xf32>
    %269 = tpu.reciprocal %268 {approx = true} : vector<2x8x1xf32> -> vector<2x8x1xf32>
    %270 = vector.broadcast %269 : vector<2x8x1xf32> to vector<2x8x8xf32>
    %271 = arith.mulf %266, %270 : vector<2x8x8xf32>
    "tpu.trace_start"() <{level = 10 : i32, message = "bqk,bkd->bqd"}> : () -> ()
    %cst_108 = arith.constant dense<0.000000e+00> : vector<2x8x8xf32>
    %272 = tpu.matmul %271, %258, %cst_108 {dimension_numbers = #tpu.dot_dimension_numbers<[2], [1], [1], [2], [0, 0, 0, 1, 1, 2], [0], [0]>} : vector<2x8x8xf32>, vector<2x8x8xf32>, vector<2x8x8xf32> -> vector<2x8x8xf32>
    "tpu.trace_stop"() : () -> ()
    %273 = tpu.concatenate %221, %238, %255, %272 in 2 : vector<2x8x8xf32>, vector<2x8x8xf32>, vector<2x8x8xf32>, vector<2x8x8xf32> -> vector<2x8x32xf32>
    %274 = vector.shape_cast %273 : vector<2x8x32xf32> to vector<16x32xf32>
    %c1_109 = arith.constant 1 : index
    %c0_110 = arith.constant 0 : index
    %c0_111 = arith.constant 0 : index
    %275 = vector.load %arg7[%c1_109, %c0_110, %c0_111] : memref<2x32x32xf32, #tpu.memory_space<vmem>>, vector<1x32x32xf32>
    %276 = vector.shape_cast %275 : vector<1x32x32xf32> to vector<32x32xf32>
    %cst_112 = arith.constant dense<0.000000e+00> : vector<16x32xf32>
    %277 = tpu.matmul %274, %276, %cst_112 {dimension_numbers = #tpu.dot_dimension_numbers<[1], [0], [0], [1], [0, 0, 1, 1], [], []>} : vector<16x32xf32>, vector<32x32xf32>, vector<16x32xf32> -> vector<16x32xf32>
    %c1_113 = arith.constant 1 : index
    %c0_114 = arith.constant 0 : index
    %c0_115 = arith.constant 0 : index
    %278 = vector.load %arg8[%c1_113, %c0_114, %c0_115] : memref<2x1x32xf32, #tpu.memory_space<vmem>>, vector<1x1x32xf32>
    %279 = vector.shape_cast %278 : vector<1x1x32xf32> to vector<1x32xf32>
    %280 = vector.broadcast %279 : vector<1x32xf32> to vector<16x32xf32>
    %281 = arith.addf %277, %280 : vector<16x32xf32>
    %282 = arith.addf %191, %281 : vector<16x32xf32>
    %c1_116 = arith.constant 1 : index
    %c0_117 = arith.constant 0 : index
    %c0_118 = arith.constant 0 : index
    %283 = vector.load %arg9[%c1_116, %c0_117, %c0_118] : memref<2x1x32xf32, #tpu.memory_space<vmem>>, vector<1x1x32xf32>
    %284 = vector.shape_cast %283 : vector<1x1x32xf32> to vector<1x32xf32>
    %c1_119 = arith.constant 1 : index
    %c0_120 = arith.constant 0 : index
    %c0_121 = arith.constant 0 : index
    %285 = vector.load %arg10[%c1_119, %c0_120, %c0_121] : memref<2x1x32xf32, #tpu.memory_space<vmem>>, vector<1x1x32xf32>
    %286 = vector.shape_cast %285 : vector<1x1x32xf32> to vector<1x32xf32>
    %cst_122 = arith.constant dense<0.000000e+00> : vector<16xf32>
    %287 = vector.multi_reduction <add>, %282, %cst_122 [1] : vector<16x32xf32> to vector<16xf32>
    %288 = vector.shape_cast %287 : vector<16xf32> to vector<16x1xf32>
    %cst_123 = arith.constant 3.200000e+01 : f32
    %289 = vector.broadcast %cst_123 : f32 to vector<16x1xf32>
    %290 = arith.divf %288, %289 : vector<16x1xf32>
    %291 = vector.broadcast %290 : vector<16x1xf32> to vector<16x32xf32>
    %292 = arith.subf %282, %291 : vector<16x32xf32>
    %293 = arith.mulf %292, %292 : vector<16x32xf32>
    %cst_124 = arith.constant dense<0.000000e+00> : vector<16xf32>
    %294 = vector.multi_reduction <add>, %293, %cst_124 [1] : vector<16x32xf32> to vector<16xf32>
    %295 = vector.shape_cast %294 : vector<16xf32> to vector<16x1xf32>
    %cst_125 = arith.constant 3.200000e+01 : f32
    %296 = vector.broadcast %cst_125 : f32 to vector<16x1xf32>
    %297 = arith.divf %295, %296 : vector<16x1xf32>
    %298 = vector.broadcast %290 : vector<16x1xf32> to vector<16x32xf32>
    %299 = arith.subf %282, %298 : vector<16x32xf32>
    %cst_126 = arith.constant 9.99999974E-6 : f32
    %300 = vector.broadcast %cst_126 : f32 to vector<16x1xf32>
    %301 = arith.addf %297, %300 : vector<16x1xf32>
    %302 = math.rsqrt %301 : vector<16x1xf32>
    %303 = vector.broadcast %302 : vector<16x1xf32> to vector<16x32xf32>
    %304 = arith.mulf %299, %303 : vector<16x32xf32>
    %305 = vector.broadcast %284 : vector<1x32xf32> to vector<16x32xf32>
    %306 = arith.mulf %304, %305 : vector<16x32xf32>
    %307 = vector.broadcast %286 : vector<1x32xf32> to vector<16x32xf32>
    %308 = arith.addf %306, %307 : vector<16x32xf32>
    %c1_127 = arith.constant 1 : index
    %c0_128 = arith.constant 0 : index
    %c0_129 = arith.constant 0 : index
    %309 = vector.load %arg11[%c1_127, %c0_128, %c0_129] : memref<2x32x64xf32, #tpu.memory_space<vmem>>, vector<1x32x64xf32>
    %310 = vector.shape_cast %309 : vector<1x32x64xf32> to vector<32x64xf32>
    %cst_130 = arith.constant dense<0.000000e+00> : vector<16x64xf32>
    %311 = tpu.matmul %308, %310, %cst_130 {dimension_numbers = #tpu.dot_dimension_numbers<[1], [0], [0], [1], [0, 0, 1, 1], [], []>} : vector<16x32xf32>, vector<32x64xf32>, vector<16x64xf32> -> vector<16x64xf32>
    %c1_131 = arith.constant 1 : index
    %c0_132 = arith.constant 0 : index
    %c0_133 = arith.constant 0 : index
    %312 = vector.load %arg12[%c1_131, %c0_132, %c0_133] : memref<2x1x64xf32, #tpu.memory_space<vmem>>, vector<1x1x64xf32>
    %313 = vector.shape_cast %312 : vector<1x1x64xf32> to vector<1x64xf32>
    %314 = vector.broadcast %313 : vector<1x64xf32> to vector<16x64xf32>
    %315 = arith.addf %311, %314 : vector<16x64xf32>
    %cst_134 = arith.constant 0.000000e+00 : f32
    %316 = vector.broadcast %cst_134 : f32 to vector<16x64xf32>
    %317 = arith.maximumf %315, %316 : vector<16x64xf32>
    %c1_135 = arith.constant 1 : index
    %c0_136 = arith.constant 0 : index
    %c0_137 = arith.constant 0 : index
    %318 = vector.load %arg13[%c1_135, %c0_136, %c0_137] : memref<2x64x32xf32, #tpu.memory_space<vmem>>, vector<1x64x32xf32>
    %319 = vector.shape_cast %318 : vector<1x64x32xf32> to vector<64x32xf32>
    %cst_138 = arith.constant dense<0.000000e+00> : vector<16x32xf32>
    %320 = tpu.matmul %317, %319, %cst_138 {dimension_numbers = #tpu.dot_dimension_numbers<[1], [0], [0], [1], [0, 0, 1, 1], [], []>} : vector<16x64xf32>, vector<64x32xf32>, vector<16x32xf32> -> vector<16x32xf32>
    %c1_139 = arith.constant 1 : index
    %c0_140 = arith.constant 0 : index
    %c0_141 = arith.constant 0 : index
    %321 = vector.load %arg14[%c1_139, %c0_140, %c0_141] : memref<2x1x32xf32, #tpu.memory_space<vmem>>, vector<1x1x32xf32>
    %322 = vector.shape_cast %321 : vector<1x1x32xf32> to vector<1x32xf32>
    %323 = vector.broadcast %322 : vector<1x32xf32> to vector<16x32xf32>
    %324 = arith.addf %320, %323 : vector<16x32xf32>
    %325 = arith.addf %308, %324 : vector<16x32xf32>
    %c1_142 = arith.constant 1 : index
    %c0_143 = arith.constant 0 : index
    %c0_144 = arith.constant 0 : index
    %326 = vector.load %arg15[%c1_142, %c0_143, %c0_144] : memref<2x1x32xf32, #tpu.memory_space<vmem>>, vector<1x1x32xf32>
    %327 = vector.shape_cast %326 : vector<1x1x32xf32> to vector<1x32xf32>
    %c1_145 = arith.constant 1 : index
    %c0_146 = arith.constant 0 : index
    %c0_147 = arith.constant 0 : index
    %328 = vector.load %arg16[%c1_145, %c0_146, %c0_147] : memref<2x1x32xf32, #tpu.memory_space<vmem>>, vector<1x1x32xf32>
    %329 = vector.shape_cast %328 : vector<1x1x32xf32> to vector<1x32xf32>
    %cst_148 = arith.constant dense<0.000000e+00> : vector<16xf32>
    %330 = vector.multi_reduction <add>, %325, %cst_148 [1] : vector<16x32xf32> to vector<16xf32>
    %331 = vector.shape_cast %330 : vector<16xf32> to vector<16x1xf32>
    %cst_149 = arith.constant 3.200000e+01 : f32
    %332 = vector.broadcast %cst_149 : f32 to vector<16x1xf32>
    %333 = arith.divf %331, %332 : vector<16x1xf32>
    %334 = vector.broadcast %333 : vector<16x1xf32> to vector<16x32xf32>
    %335 = arith.subf %325, %334 : vector<16x32xf32>
    %336 = arith.mulf %335, %335 : vector<16x32xf32>
    %cst_150 = arith.constant dense<0.000000e+00> : vector<16xf32>
    %337 = vector.multi_reduction <add>, %336, %cst_150 [1] : vector<16x32xf32> to vector<16xf32>
    %338 = vector.shape_cast %337 : vector<16xf32> to vector<16x1xf32>
    %cst_151 = arith.constant 3.200000e+01 : f32
    %339 = vector.broadcast %cst_151 : f32 to vector<16x1xf32>
    %340 = arith.divf %338, %339 : vector<16x1xf32>
    %341 = vector.broadcast %333 : vector<16x1xf32> to vector<16x32xf32>
    %342 = arith.subf %325, %341 : vector<16x32xf32>
    %cst_152 = arith.constant 9.99999974E-6 : f32
    %343 = vector.broadcast %cst_152 : f32 to vector<16x1xf32>
    %344 = arith.addf %340, %343 : vector<16x1xf32>
    %345 = math.rsqrt %344 : vector<16x1xf32>
    %346 = vector.broadcast %345 : vector<16x1xf32> to vector<16x32xf32>
    %347 = arith.mulf %342, %346 : vector<16x32xf32>
    %348 = vector.broadcast %327 : vector<1x32xf32> to vector<16x32xf32>
    %349 = arith.mulf %347, %348 : vector<16x32xf32>
    %350 = vector.broadcast %329 : vector<1x32xf32> to vector<16x32xf32>
    %351 = arith.addf %349, %350 : vector<16x32xf32>
    %352 = vector.extract_strided_slice %351 {offsets = [0, 0], sizes = [1, 32], strides = [1, 1]} : vector<16x32xf32> to vector<1x32xf32>
    %353 = vector.extract_strided_slice %351 {offsets = [8, 0], sizes = [1, 32], strides = [1, 1]} : vector<16x32xf32> to vector<1x32xf32>
    %354 = tpu.concatenate %352, %353 in 0 : vector<1x32xf32>, vector<1x32xf32> -> vector<2x32xf32>
    %c0_153 = arith.constant 0 : index
    %c0_154 = arith.constant 0 : index
    %355 = vector.load %arg17[%c0_153, %c0_154] : memref<32x128xf32, #tpu.memory_space<vmem>>, vector<32x128xf32>
    %cst_155 = arith.constant dense<0.000000e+00> : vector<2x128xf32>
    %356 = tpu.matmul %354, %355, %cst_155 {dimension_numbers = #tpu.dot_dimension_numbers<[1], [0], [0], [1], [0, 0, 1, 1], [], []>} : vector<2x32xf32>, vector<32x128xf32>, vector<2x128xf32> -> vector<2x128xf32>
    %c0_156 = arith.constant 0 : index
    %c0_157 = arith.constant 0 : index
    %357 = vector.load %arg18[%c0_156, %c0_157] : memref<1x128xf32, #tpu.memory_space<vmem>>, vector<1x128xf32>
    %358 = vector.broadcast %357 : vector<1x128xf32> to vector<2x128xf32>
    %359 = arith.addf %356, %358 : vector<2x128xf32>
    %c0_158 = arith.constant 0 : index
    %c0_159 = arith.constant 0 : index
    %360 = vector.load %arg19[%c0_158, %c0_159] : memref<2x128xf32, #tpu.memory_space<vmem>>, vector<2x128xf32>
    tpu.vector_store %arg19[%c0_158, %c0_159], %359 {strides = array<i32>} : memref<2x128xf32, #tpu.memory_space<vmem>>, vector<2x128xf32>,
    return
  }
  func.func @transform_0(%arg0: i32) -> (i32, i32) {
    %c0_i32 = arith.constant 0 : i32
    %c0_i32_0 = arith.constant 0 : i32
    return %arg0, %c0_i32 : i32, i32
  }
  func.func @transform_1(%arg0: i32) -> (i32, i32) {
    %c0_i32 = arith.constant 0 : i32
    %c0_i32_0 = arith.constant 0 : i32
    %c0_i32_1 = arith.constant 0 : i32
    return %c0_i32, %c0_i32_0 : i32, i32
  }
  func.func @transform_2(%arg0: i32) -> (i32, i32) {
    %c0_i32 = arith.constant 0 : i32
    %c0_i32_0 = arith.constant 0 : i32
    %c0_i32_1 = arith.constant 0 : i32
    return %c0_i32, %c0_i32_0 : i32, i32
  }
  func.func @transform_3(%arg0: i32) -> (i32, i32) {
    %c0_i32 = arith.constant 0 : i32
    %c0_i32_0 = arith.constant 0 : i32
    %c0_i32_1 = arith.constant 0 : i32
    return %c0_i32, %c0_i32_0 : i32, i32
  }
  func.func @transform_4(%arg0: i32) -> (i32, i32, i32) {
    %c0_i32 = arith.constant 0 : i32
    %c0_i32_0 = arith.constant 0 : i32
    %c0_i32_1 = arith.constant 0 : i32
    %c0_i32_2 = arith.constant 0 : i32
    return %c0_i32, %c0_i32_0, %c0_i32_1 : i32, i32, i32
  }
  func.func @transform_5(%arg0: i32) -> (i32, i32, i32) {
    %c0_i32 = arith.constant 0 : i32
    %c0_i32_0 = arith.constant 0 : i32
    %c0_i32_1 = arith.constant 0 : i32
    %c0_i32_2 = arith.constant 0 : i32
    return %c0_i32, %c0_i32_0, %c0_i32_1 : i32, i32, i32
  }
  func.func @transform_6(%arg0: i32) -> (i32, i32, i32) {
    %c0_i32 = arith.constant 0 : i32
    %c0_i32_0 = arith.constant 0 : i32
    %c0_i32_1 = arith.constant 0 : i32
    %c0_i32_2 = arith.constant 0 : i32
    return %c0_i32, %c0_i32_0, %c0_i32_1 : i32, i32, i32
  }
  func.func @transform_7(%arg0: i32) -> (i32, i32, i32) {
    %c0_i32 = arith.constant 0 : i32
    %c0_i32_0 = arith.constant 0 : i32
    %c0_i32_1 = arith.constant 0 : i32
    %c0_i32_2 = arith.constant 0 : i32
    return %c0_i32, %c0_i32_0, %c0_i32_1 : i32, i32, i32
  }
  func.func @transform_8(%arg0: i32) -> (i32, i32, i32) {
    %c0_i32 = arith.constant 0 : i32
    %c0_i32_0 = arith.constant 0 : i32
    %c0_i32_1 = arith.constant 0 : i32
    %c0_i32_2 = arith.constant 0 : i32
    return %c0_i32, %c0_i32_0, %c0_i32_1 : i32, i32, i32
  }
  func.func @transform_9(%arg0: i32) -> (i32, i32, i32) {
    %c0_i32 = arith.constant 0 : i32
    %c0_i32_0 = arith.constant 0 : i32
    %c0_i32_1 = arith.constant 0 : i32
    %c0_i32_2 = arith.constant 0 : i32
    return %c0_i32, %c0_i32_0, %c0_i32_1 : i32, i32, i32
  }
  func.func @transform_10(%arg0: i32) -> (i32, i32, i32) {
    %c0_i32 = arith.constant 0 : i32
    %c0_i32_0 = arith.constant 0 : i32
    %c0_i32_1 = arith.constant 0 : i32
    %c0_i32_2 = arith.constant 0 : i32
    return %c0_i32, %c0_i32_0, %c0_i32_1 : i32, i32, i32
  }
  func.func @transform_11(%arg0: i32) -> (i32, i32, i32) {
    %c0_i32 = arith.constant 0 : i32
    %c0_i32_0 = arith.constant 0 : i32
    %c0_i32_1 = arith.constant 0 : i32
    %c0_i32_2 = arith.constant 0 : i32
    return %c0_i32, %c0_i32_0, %c0_i32_1 : i32, i32, i32
  }
  func.func @transform_12(%arg0: i32) -> (i32, i32, i32) {
    %c0_i32 = arith.constant 0 : i32
    %c0_i32_0 = arith.constant 0 : i32
    %c0_i32_1 = arith.constant 0 : i32
    %c0_i32_2 = arith.constant 0 : i32
    return %c0_i32, %c0_i32_0, %c0_i32_1 : i32, i32, i32
  }
  func.func @transform_13(%arg0: i32) -> (i32, i32, i32) {
    %c0_i32 = arith.constant 0 : i32
    %c0_i32_0 = arith.constant 0 : i32
    %c0_i32_1 = arith.constant 0 : i32
    %c0_i32_2 = arith.constant 0 : i32
    return %c0_i32, %c0_i32_0, %c0_i32_1 : i32, i32, i32
  }
  func.func @transform_14(%arg0: i32) -> (i32, i32, i32) {
    %c0_i32 = arith.constant 0 : i32
    %c0_i32_0 = arith.constant 0 : i32
    %c0_i32_1 = arith.constant 0 : i32
    %c0_i32_2 = arith.constant 0 : i32
    return %c0_i32, %c0_i32_0, %c0_i32_1 : i32, i32, i32
  }
  func.func @transform_15(%arg0: i32) -> (i32, i32, i32) {
    %c0_i32 = arith.constant 0 : i32
    %c0_i32_0 = arith.constant 0 : i32
    %c0_i32_1 = arith.constant 0 : i32
    %c0_i32_2 = arith.constant 0 : i32
    return %c0_i32, %c0_i32_0, %c0_i32_1 : i32, i32, i32
  }
  func.func @transform_16(%arg0: i32) -> (i32, i32) {
    %c0_i32 = arith.constant 0 : i32
    %c0_i32_0 = arith.constant 0 : i32
    %c0_i32_1 = arith.constant 0 : i32
    return %c0_i32, %c0_i32_0 : i32, i32
  }
  func.func @transform_17(%arg0: i32) -> (i32, i32) {
    %c0_i32 = arith.constant 0 : i32
    %c0_i32_0 = arith.constant 0 : i32
    %c0_i32_1 = arith.constant 0 : i32
    return %c0_i32, %c0_i32_0 : i32, i32
  }
  func.func @transform_18(%arg0: i32) -> (i32, i32) {
    %c0_i32 = arith.constant 0 : i32
    %c0_i32_0 = arith.constant 0 : i32
    return %arg0, %c0_i32 : i32, i32
  }
}

</mosaic_0001>

<bundles_post_ra>
// kernel: skincare_transformer_forward.1
= control target key start
LH: loop header
LB: loop body
LE: loop exit
PB: predicated region body
PF: predicated region fallthrough
CT: control target
= control target key end

     0   :  { %s6531_s0 = inlined_call_operand.vmem [shape: s32[16,1], index: 0, kind: input, shape index: {}]   ;;  %s6532_s1 = inlined_call_operand.vmem [shape: f32[1000,32], index: 1, kind: input, shape index: {}]   ;;  %s6533_s2 = inlined_call_operand.vmem [shape: f32[1,32], index: 2, kind: input, shape index: {}]   ;;  %s6534_s3 = inlined_call_operand.vmem [shape: f32[1,32], index: 3, kind: input, shape index: {}]   ;;  %s6535_s4 = inlined_call_operand.vmem [shape: f32[2,32,96], index: 4, kind: input, shape index: {}]   ;;  %s6536_s5 = inlined_call_operand.vmem [shape: f32[2,1,96], index: 5, kind: input, shape index: {}]   ;;  %s6537_s6 = inlined_call_operand.vmem [shape: f32[2,32,32], index: 6, kind: input, shape index: {}]   ;;  %s6538_s7 = inlined_call_operand.vmem [shape: f32[2,1,32], index: 7, kind: input, shape index: {}]   ;;  %s6539_s8 = inlined_call_operand.vmem [shape: f32[2,1,32], index: 8, kind: input, shape index: {}]   ;;  %s6540_s9 = inlined_call_operand.vmem [shape: f32[2,1,32], index: 9, kind: input, shape index: {}]   ;;  %s6541_s10 = inlined_call_operand.vmem [shape: f32[2,32,64], index: 10, kind: input, shape index: {}]   ;;  %s6542_s11 = inlined_call_operand.vmem [shape: f32[2,1,64], index: 11, kind: input, shape index: {}]   ;;  %s6543_s12 = inlined_call_operand.vmem [shape: f32[2,64,32], index: 12, kind: input, shape index: {}]   ;;  %s6544_s13 = inlined_call_operand.vmem [shape: f32[2,1,32], index: 13, kind: input, shape index: {}]   ;;  %s6545_s14 = inlined_call_operand.vmem [shape: f32[2,1,32], index: 14, kind: input, shape index: {}]   ;;  %s6546_s15 = inlined_call_operand.vmem [shape: f32[2,1,32], index: 15, kind: input, shape index: {}]   ;;  %s6547_s16 = inlined_call_operand.vmem [shape: f32[32,128], index: 16, kind: input, shape index: {}]   ;;  %s6548_s17 = inlined_call_operand.vmem [shape: f32[1,128], index: 17, kind: input, shape index: {}]   ;;  %s6549_s18 = inlined_call_operand.hbm [shape: f32[2,128], index: 18, kind: output, shape index: {}]  }
   0x1   :  { %6567 = sst [smem:[#allocation5_spill]] %s6531_s0 }
   0x2   :  { %6568 = sst [smem:[#allocation6_spill]] %s6532_s1 }
   0x3   :  { %6569 = sst [smem:[#allocation7_spill]] %s6533_s2 }
   0x4   :  { %6570 = sst [smem:[#allocation8_spill]] %s6544_s13 }
   0x5   :  { %s6571_s29 = sld [smem:[#allocation5_spill]]  ;;  %s6572_s13 = sld [smem:[#allocation6_spill]]  ;;  %v5378_v2 = vmov 0  }
   0x6   :  { %5269 = vset.pattern.permute.xlu0 %v5378_v2 }
   0xb   :  { %v60_v0 = vld [vmem:[%s6571_s29] sm:$0xff]  ;;  %v61_v3 = vld [vmem:[%s6571_s29 + $0x8] sm:$0xff]  ;;  %v143_v14 = vld [vmem:[%s6572_s13 + $0x90] sm:$0xff] }
   0xc   :  { %v141_v1 = vld [vmem:[%s6572_s13 + $0x80] sm:$0xff]  ;;  %v142_v4 = vld [vmem:[%s6572_s13 + $0x88] sm:$0xff]  ;;  %72 = vperm.xlu0 %5269, %v60_v0   ;;  %v144_v15 = vld [vmem:[%s6572_s13 + $0x98] sm:$0xff] }
   0xd   :  { %v173_v5 = vld [vmem:[%s6572_s13 + $0x180] sm:$0xff]  ;;  %v174_v6 = vld [vmem:[%s6572_s13 + $0x188] sm:$0xff]  ;;  %v5025_v7 = vpack.c.bf16 %v142_v4, %v141_v1  ;;  %v5029_v17 = vpack.c.bf16 %v144_v15, %v143_v14  ;;  %v175_v18 = vld [vmem:[%s6572_s13 + $0x190] sm:$0xff] }
   0xe   :  { %v5057_v8 = vpack.c.bf16 %v174_v6, %v173_v5  ;;  %v125_v9 = vld [vmem:[%s6572_s13] sm:$0xff]  ;;  %v126_v10 = vld [vmem:[%s6572_s13 + $0x8] sm:$0xff]  ;;  %v176_v19 = vld [vmem:[%s6572_s13 + $0x198] sm:$0xff] }
   0xf   :  { %v157_v11 = vld [vmem:[%s6572_s13 + $0x100] sm:$0xff]  ;;  %v5027_v12 = vpack.c.bf16 %v126_v10, %v125_v9  ;;  %v158_v13 = vld [vmem:[%s6572_s13 + $0x108] sm:$0xff]  ;;  %5026 = vmatprep.subr.bf16.mxu0 %v5025_v7  ;;  %v127_v20 = vld [vmem:[%s6572_s13 + $0x10] sm:$0xff]  ;;  %v5061_v21 = vpack.c.bf16 %v176_v19, %v175_v18 }
  0x10   :  { %5058 = vmatprep.subr.bf16.mxu1 %v5057_v8  ;;  %v5059_v16 = vpack.c.bf16 %v158_v13, %v157_v11  ;;  %v128_v22 = vld [vmem:[%s6572_s13 + $0x18] sm:$0xff]  ;;  %v159_v23 = vld [vmem:[%s6572_s13 + $0x110] sm:$0xff]  ;;  %75 = vperm.xlu0 %5269, %v61_v3   ;;  %v145_v27 = vld [vmem:[%s6572_s13 + $0xa0] sm:$0xff] }
  0x11   :  { %5028 = vmatpush3.bf16.msra.mxu0 %v5027_v12  ;;  %v160_v24 = vld [vmem:[%s6572_s13 + $0x118] sm:$0xff]  ;;  %v5031_v25 = vpack.c.bf16 %v128_v22, %v127_v20  ;;  %v146_v28 = vld [vmem:[%s6572_s13 + $0xa8] sm:$0xff]  ;;  %v177_v29 = vld [vmem:[%s6572_s13 + $0x1a0] sm:$0xff] }
  0x12   :  { %5060 = vmatpush3.bf16.msra.mxu1 %v5059_v16  ;;  %v5063_v26 = vpack.c.bf16 %v160_v24, %v159_v23  ;;  %5030 = vmatprep.subr.bf16.mxu0 %v5029_v17  ;;  %v5033_v30 = vpack.c.bf16 %v146_v28, %v145_v27  ;;  %v178_v31 = vld [vmem:[%s6572_s13 + $0x1a8] sm:$0xff]  ;;  %v129_v32 = vld [vmem:[%s6572_s13 + $0x20] sm:$0xff]  ;;  %v147_v37 = vld [vmem:[%s6572_s13 + $0xb0] sm:$0xff] }
  0x13   :  { %5062 = vmatprep.subr.bf16.mxu1 %v5061_v21  ;;  %v130_v33 = vld [vmem:[%s6572_s13 + $0x28] sm:$0xff]  ;;  %v5065_v34 = vpack.c.bf16 %v178_v31, %v177_v29  ;;  %v161_v35 = vld [vmem:[%s6572_s13 + $0x120] sm:$0xff]  ;;  %v148_v39 = vld [vmem:[%s6572_s13 + $0xb8] sm:$0xff] }
  0x14   :  { %v162_v36 = vld [vmem:[%s6572_s13 + $0x128] sm:$0xff]  ;;  %v5035_v38 = vpack.c.bf16 %v130_v33, %v129_v32  ;;  %v179_v40 = vld [vmem:[%s6572_s13 + $0x1b0] sm:$0xff]  ;;  %v180_v41 = vld [vmem:[%s6572_s13 + $0x1b8] sm:$0xff]  ;;  %v5037_v43 = vpack.c.bf16 %v148_v39, %v147_v37 }
  0x15   :  { %5032 = vmatpush3.bf16.msra.mxu0 %v5031_v25  ;;  %v5067_v42 = vpack.c.bf16 %v162_v36, %v161_v35  ;;  %v131_v44 = vld [vmem:[%s6572_s13 + $0x30] sm:$0xff]  ;;  %v132_v45 = vld [vmem:[%s6572_s13 + $0x38] sm:$0xff]  ;;  %v5069_v47 = vpack.c.bf16 %v180_v41, %v179_v40  ;;  %v149_v49 = vld [vmem:[%s6572_s13 + $0xc0] sm:$0xff] }
  0x16   :  { %5064 = vmatpush3.bf16.msra.mxu1 %v5063_v26  ;;  %5034 = vmatprep.subr.bf16.mxu0 %v5033_v30  ;;  %v163_v46 = vld [vmem:[%s6572_s13 + $0x130] sm:$0xff]  ;;  %v164_v48 = vld [vmem:[%s6572_s13 + $0x138] sm:$0xff]  ;;  %v150_v50 = vld [vmem:[%s6572_s13 + $0xc8] sm:$0xff]  ;;  %v5039_v53 = vpack.c.bf16 %v132_v45, %v131_v44 }
  0x17   :  { %5066 = vmatprep.subr.bf16.mxu1 %v5065_v34  ;;  %v181_v51 = vld [vmem:[%s6572_s13 + $0x1c0] sm:$0xff]  ;;  %v182_v52 = vld [vmem:[%s6572_s13 + $0x1c8] sm:$0xff]  ;;  %v5071_v54 = vpack.c.bf16 %v164_v48, %v163_v46  ;;  %v5041_v55 = vpack.c.bf16 %v150_v50, %v149_v49  ;;  %v151_v61 = vld [vmem:[%s6572_s13 + $0xd0] sm:$0xff] }
  0x18   :  { %v133_v56 = vld [vmem:[%s6572_s13 + $0x40] sm:$0xff]  ;;  %v134_v57 = vld [vmem:[%s6572_s13 + $0x48] sm:$0xff]  ;;  %v5073_v59 = vpack.c.bf16 %v182_v52, %v181_v51  ;;  %v152_v62 = vld [vmem:[%s6572_s13 + $0xd8] sm:$0xff] }
  0x19   :  { %5036 = vmatpush3.bf16.msra.mxu0 %v5035_v38  ;;  %v165_v58 = vld [vmem:[%s6572_s13 + $0x140] sm:$0xff]  ;;  %v166_v60 = vld [vmem:[%s6572_s13 + $0x148] sm:$0xff]  ;;  %v183_v63 = vld [vmem:[%s6572_s13 + $0x1d0] sm:$0xff]  ;;  %v5043_v1 = vpack.c.bf16 %v134_v57, %v133_v56  ;;  %v5045_v3 = vpack.c.bf16 %v152_v62, %v151_v61  ;;  %v5379_v38 = vmov 0.0|0.0  }
  0x1a   :  { %5068 = vmatpush3.bf16.msra.mxu1 %v5067_v42  ;;  %5038 = vmatprep.subr.bf16.mxu0 %v5037_v43  ;;  %v184_v0 = vld [vmem:[%s6572_s13 + $0x1d8] sm:$0xff]  ;;  %v5075_v2 = vpack.c.bf16 %v166_v60, %v165_v58  ;;  %v135_v4 = vld [vmem:[%s6572_s13 + $0x50] sm:$0xff]  ;;  %v153_v9 = vld [vmem:[%s6572_s13 + $0xe0] sm:$0xff] }
  0x1b   :  { %5070 = vmatprep.subr.bf16.mxu1 %v5069_v47  ;;  %v136_v5 = vld [vmem:[%s6572_s13 + $0x58] sm:$0xff]  ;;  %v167_v6 = vld [vmem:[%s6572_s13 + $0x150] sm:$0xff]  ;;  %v5077_v7 = vpack.c.bf16 %v184_v0, %v183_v63  ;;  %v154_v10 = vld [vmem:[%s6572_s13 + $0xe8] sm:$0xff] }
  0x1c   :  { %v168_v8 = vld [vmem:[%s6572_s13 + $0x158] sm:$0xff]  ;;  %v185_v11 = vld [vmem:[%s6572_s13 + $0x1e0] sm:$0xff]  ;;  %v186_v12 = vld [vmem:[%s6572_s13 + $0x1e8] sm:$0xff]  ;;  %v5047_v13 = vpack.c.bf16 %v136_v5, %v135_v4  ;;  %v5049_v15 = vpack.c.bf16 %v154_v10, %v153_v9 }
  0x1d   :  { %5040 = vmatpush3.bf16.msra.mxu0 %v5039_v53  ;;  %v5079_v14 = vpack.c.bf16 %v168_v8, %v167_v6  ;;  %v137_v16 = vld [vmem:[%s6572_s13 + $0x60] sm:$0xff]  ;;  %v138_v17 = vld [vmem:[%s6572_s13 + $0x68] sm:$0xff]  ;;  %v5081_v19 = vpack.c.bf16 %v186_v12, %v185_v11  ;;  %v155_v21 = vld [vmem:[%s6572_s13 + $0xf0] sm:$0xff] }
  0x1e   :  { %5072 = vmatpush3.bf16.msra.mxu1 %v5071_v54  ;;  %5042 = vmatprep.subr.bf16.mxu0 %v5041_v55  ;;  %v169_v18 = vld [vmem:[%s6572_s13 + $0x160] sm:$0xff]  ;;  %v170_v20 = vld [vmem:[%s6572_s13 + $0x168] sm:$0xff]  ;;  %v156_v22 = vld [vmem:[%s6572_s13 + $0xf8] sm:$0xff]  ;;  %v5051_v25 = vpack.c.bf16 %v138_v17, %v137_v16 }
  0x1f   :  { %5074 = vmatprep.subr.bf16.mxu1 %v5073_v59  ;;  %v187_v23 = vld [vmem:[%s6572_s13 + $0x1f0] sm:$0xff]  ;;  %v188_v24 = vld [vmem:[%s6572_s13 + $0x1f8] sm:$0xff]  ;;  %v5083_v26 = vpack.c.bf16 %v170_v20, %v169_v18  ;;  %v5053_v27 = vpack.c.bf16 %v156_v22, %v155_v21  ;;  %v205_v33 = vld [vmem:[%s6572_s13 + $0x280] sm:$0xff] }
  0x20   :  { %v139_v28 = vld [vmem:[%s6572_s13 + $0x70] sm:$0xff]  ;;  %v140_v29 = vld [vmem:[%s6572_s13 + $0x78] sm:$0xff]  ;;  %v5085_v31 = vpack.c.bf16 %v188_v24, %v187_v23  ;;  %v206_v34 = vld [vmem:[%s6572_s13 + $0x288] sm:$0xff] }
  0x21   :  { %5044 = vmatpush3.bf16.msra.mxu0 %v5043_v1  ;;  %v171_v30 = vld [vmem:[%s6572_s13 + $0x170] sm:$0xff]  ;;  %v172_v32 = vld [vmem:[%s6572_s13 + $0x178] sm:$0xff]  ;;  %v5055_v35 = vpack.c.bf16 %v140_v29, %v139_v28  ;;  %v5089_v37 = vpack.c.bf16 %v206_v34, %v205_v33 }
  0x22   :  { %5076 = vmatpush3.bf16.msra.mxu1 %v5075_v2  ;;  %5046 = vmatprep.subr.bf16.mxu0 %v5045_v3  ;;  %v5087_v36 = vpack.c.bf16 %v172_v32, %v171_v30 }
  0x23   :  { %5078 = vmatprep.subr.bf16.mxu1 %v5077_v7 }
  0x25   :  { %5048 = vmatpush3.bf16.msra.mxu0 %v5047_v13 }
  0x26   :  { %5080 = vmatpush3.bf16.msra.mxu1 %v5079_v14  ;;  %5050 = vmatprep.subr.bf16.mxu0 %v5049_v15 }
  0x27   :  { %5082 = vmatprep.subr.bf16.mxu1 %v5081_v19 }
  0x29   :  { %5052 = vmatpush3.bf16.msra.mxu0 %v5051_v25 }
  0x2a   :  { %5084 = vmatpush3.bf16.msra.mxu1 %v5083_v26  ;;  %5054 = vmatprep.subr.bf16.mxu0 %v5053_v27 }
  0x2b   :  { %5086 = vmatprep.subr.bf16.mxu1 %v5085_v31 }
  0x2d   :  { %5056 = vmatpush3.bf16.msra.mxu0 %v5055_v35 }
  0x2e   :  { %5088 = vmatpush3.bf16.msra.mxu1 %v5087_v36  ;;  %5090 = vmatprep.subr.bf16.mxu0 %v5089_v37 }
  0x2f   :  { %5121 = vmatprep.subr.bf16.mxu1 %v5379_v38 }
  0x30   :  { %23 = vsyncpa [#allocation3], 0  ;;  %v62_v39 = vlaneseq  ;;  %v189_v41 = vld [vmem:[%s6572_s13 + $0x200] sm:$0xff]  ;;  %v190_v42 = vld [vmem:[%s6572_s13 + $0x208] sm:$0xff]  ;;  %v5380_v59 = vmov 1.0   ;;  %vm250_vm9 = vcmask 850944  }
  0x31   :  { %v221_v43 = vld [vmem:[%s6572_s13 + $0x300] sm:$0xff]  ;;  %v222_v47 = vld [vmem:[%s6572_s13 + $0x308] sm:$0xff]  ;;  %v207_v48 = vld [vmem:[%s6572_s13 + $0x290] sm:$0xff]  ;;  %v5091_v51 = vpack.c.bf16 %v190_v42, %v189_v41  ;;  %v5381_v9 = vmov 0.0   ;;  %s6573_s22 = sld [smem:[#allocation7_spill]]  ;;  %s5383_s25 = smov 96  }
  0x32   :  { %v5698_v40 = vand.u32 127, %v62_v39  ;;  %v208_v49 = vld [vmem:[%s6572_s13 + $0x298] sm:$0xff]  ;;  %v5122_v52 = vpack.c.bf16 %v222_v47, %v221_v43  ;;  %v191_v54 = vld [vmem:[%s6572_s13 + $0x210] sm:$0xff]  ;;  %v209_v60 = vld [vmem:[%s6572_s13 + $0x2a0] sm:$0xff]  ;;  %s5384_s26 = smov 64   ;;  %s5386_s27 = smov 120  }
  0x33   :  { %v5093_v53 = vpack.c.bf16 %v208_v49, %v207_v48  ;;  %v192_v56 = vld [vmem:[%s6572_s13 + $0x218] sm:$0xff]  ;;  %v223_v57 = vld [vmem:[%s6572_s13 + $0x310] sm:$0xff]  ;;  %v210_v61 = vld [vmem:[%s6572_s13 + $0x2a8] sm:$0xff]  ;;  %s5387_s28 = smov 56   ;;  %s5388_s29 = smov 80  }
  0x34   :  { %v64_v44 = vadd.s32 128, %v5698_v40  ;;  %v66_v45 = vadd.s32 384, %v5698_v40  ;;  %v65_v46 = vadd.s32 256, %v5698_v40  ;;  %v5727_v55 = vadd.s32 896, %v5698_v40  ;;  %v224_v58 = vld [vmem:[%s6572_s13 + $0x318] sm:$0xff]  ;;  %v193_v2 = vld [vmem:[%s6572_s13 + $0x220] sm:$0xff] }
  0x35   :  { %v5095_v63 = vpack.c.bf16 %v192_v56, %v191_v54  ;;  %v5125_v0 = vpack.c.bf16 %v224_v58, %v223_v57  ;;  %v5756_v1 = vadd.s32 640, %v5698_v40  ;;  %v194_v3 = vld [vmem:[%s6572_s13 + $0x228] sm:$0xff]  ;;  %v225_v4 = vld [vmem:[%s6572_s13 + $0x320] sm:$0xff]  ;;  %v5097_v6 = vpack.c.bf16 %v210_v61, %v209_v60  ;;  %v211_v7 = vld [vmem:[%s6572_s13 + $0x2b0] sm:$0xff]  ;;  %s5389_s30 = smov 112   ;;  %s6565_s0 = smov 48  }
  0x36   :  { %v226_v5 = vld [vmem:[%s6572_s13 + $0x328] sm:$0xff]  ;;  %v212_v8 = vld [vmem:[%s6572_s13 + $0x2b8] sm:$0xff]  ;;  %v5099_v11 = vpack.c.bf16 %v194_v3, %v193_v2  ;;  %v195_v13 = vld [vmem:[%s6572_s13 + $0x230] sm:$0xff]  ;;  %s6563_s19 = smov 72   ;;  %s6559_s1 = smov 104  }
  0x37   :  { %v5128_v12 = vpack.c.bf16 %v226_v5, %v225_v4  ;;  %v5101_v14 = vpack.c.bf16 %v212_v8, %v211_v7  ;;  %v196_v15 = vld [vmem:[%s6572_s13 + $0x238] sm:$0xff]  ;;  %v227_v16 = vld [vmem:[%s6572_s13 + $0x330] sm:$0xff]  ;;  %v213_v18 = vld [vmem:[%s6572_s13 + $0x2c0] sm:$0xff]  ;;  %s6557_s20 = smov 40   ;;  %s6555_s21 = smov 8  }
  0x38   :  { %v228_v17 = vld [vmem:[%s6572_s13 + $0x338] sm:$0xff]  ;;  %v214_v19 = vld [vmem:[%s6572_s13 + $0x2c8] sm:$0xff]  ;;  %v5103_v20 = vpack.c.bf16 %v196_v15, %v195_v13  ;;  %v197_v22 = vld [vmem:[%s6572_s13 + $0x240] sm:$0xff]  ;;  %s6561_s2 = smov 24   ;;  %s6574_s23 = sld [smem:[#allocation8_spill]] }
  0x39   :  { %v5131_v21 = vpack.c.bf16 %v228_v17, %v227_v16  ;;  %v5105_v23 = vpack.c.bf16 %v214_v19, %v213_v18  ;;  %v198_v24 = vld [vmem:[%s6572_s13 + $0x248] sm:$0xff]  ;;  %v229_v25 = vld [vmem:[%s6572_s13 + $0x340] sm:$0xff]  ;;  %v215_v27 = vld [vmem:[%s6572_s13 + $0x2d0] sm:$0xff]  ;;  %v69_v18 = vadd.s32 768, %v5698_v40 }
  0x3a   :  { %v230_v26 = vld [vmem:[%s6572_s13 + $0x348] sm:$0xff]  ;;  %v216_v28 = vld [vmem:[%s6572_s13 + $0x2d8] sm:$0xff]  ;;  %v5107_v29 = vpack.c.bf16 %v198_v24, %v197_v22  ;;  %v199_v31 = vld [vmem:[%s6572_s13 + $0x250] sm:$0xff] }
  0x3b   :  { %v5134_v30 = vpack.c.bf16 %v230_v26, %v229_v25  ;;  %v5109_v32 = vpack.c.bf16 %v216_v28, %v215_v27  ;;  %v200_v33 = vld [vmem:[%s6572_s13 + $0x258] sm:$0xff]  ;;  %v231_v34 = vld [vmem:[%s6572_s13 + $0x350] sm:$0xff]  ;;  %v217_v36 = vld [vmem:[%s6572_s13 + $0x2e0] sm:$0xff] }
  0x3c   :  { %v232_v35 = vld [vmem:[%s6572_s13 + $0x358] sm:$0xff]  ;;  %v218_v37 = vld [vmem:[%s6572_s13 + $0x2e8] sm:$0xff]  ;;  %v5111_v39 = vpack.c.bf16 %v200_v33, %v199_v31  ;;  %v201_v42 = vld [vmem:[%s6572_s13 + $0x260] sm:$0xff] }
  0x3d   :  { %v5137_v41 = vpack.c.bf16 %v232_v35, %v231_v34  ;;  %v5113_v43 = vpack.c.bf16 %v218_v37, %v217_v36  ;;  %v219_v47 = vld [vmem:[%s6572_s13 + $0x2f0] sm:$0xff]  ;;  %v220_v48 = vld [vmem:[%s6572_s13 + $0x2f8] sm:$0xff]  ;;  %v237_v61 = vld [vmem:[%s6572_s13 + $0x380] sm:$0xff] }
  0x3e   :  { %v204_v54 = vld [vmem:[%s6572_s13 + $0x278] sm:$0xff]  ;;  %v235_v56 = vld [vmem:[%s6572_s13 + $0x370] sm:$0xff]  ;;  %v242_v7 = vld [vmem:[%s6572_s13 + $0x3a8] sm:$0xff] }
  0x3f   :  { %v236_v57 = vld [vmem:[%s6572_s13 + $0x378] sm:$0xff]  ;;  %v239_v3 = vld [vmem:[%s6572_s13 + $0x390] sm:$0xff]  ;;  %v246_v13 = vld [vmem:[%s6572_s13 + $0x3c8] sm:$0xff] }
  0x40   :  { %v5143_v60 = vpack.c.bf16 %v236_v57, %v235_v56  ;;  %v240_v4 = vld [vmem:[%s6572_s13 + $0x398] sm:$0xff]  ;;  %v243_v8 = vld [vmem:[%s6572_s13 + $0x3b0] sm:$0xff]  ;;  %v249_v19 = vld [vmem:[%s6572_s13 + $0x3e0] sm:$0xff] }
  0x41   :  { %v5149_v5 = vpack.c.bf16 %v240_v4, %v239_v3  ;;  %v247_v15 = vld [vmem:[%s6572_s13 + $0x3d0] sm:$0xff]  ;;  %v248_v16 = vld [vmem:[%s6572_s13 + $0x3d8] sm:$0xff] }
  0x42   :  { %v5161_v17 = vpack.c.bf16 %v248_v16, %v247_v15  ;;  %v606_v3 = vld [vmem:[%s6535_s4 + $0x18] sm:$0xff] }
  0x8b   :  { %v5721_v50 = vpop.permute.xlu0 %72 }
  0x8c   :  { %vm78_vm0 = vcmp.eq.s32.totalorder %v5721_v50, %v64_v44  ;;  %vm80_vm1 = vcmp.eq.s32.totalorder %v5721_v50, %v66_v45  ;;  %vm77_vm2 = vcmp.eq.s32.totalorder %v5721_v50, %v5698_v40  ;;  %vm79_vm3 = vcmp.eq.s32.totalorder %v5721_v50, %v65_v46 }
  0x8d   :  { %4383 = vmatprep.mubr.msk.f32.mxu0 %vm78_vm0, %v5380_v59  ;;  %4387 = vmatprep.mubr.msk.f32.mxu1 %vm80_vm1, %v5380_v59  ;;  %vm84_vm4 = vcmp.eq.s32.totalorder %v5721_v50, %v5727_v55  ;;  %vm82_vm10 = vcmp.eq.s32.totalorder %v5721_v50, %v5756_v1  ;;  %vm83_vm15 = vcmp.eq.s32.totalorder %v5721_v50, %v69_v18  ;;  %vm559_vm1 = vcmask 261120  }
  0x8e   :  { %4384 = vmatmul.mubr.msk.f32.vlgmr.msra.gmra.mrb[0].mxu0 %vm77_vm2, %v5380_v59  ;;  %4388 = vmatmul.mubr.msk.f32.vlgmr.msra.gmra.mrb[0].mxu1 %vm79_vm3, %v5380_v59  ;;  %v4374_v10 = vsel %vm84_vm4, 1.0, %v5381_v9  ;;  %vm5382_vm2 = vmmov 0   ;;  %vm698_vm3 = vcmask 64512   ;;  %vm2051_vm4 = vcmask 195584  }
  0x8f   :  { %5092 = vmatpush3.bf16.msra.mxu0 %v5091_v51  ;;  %5123 = vmatpush1.bf16.msra.mxu1 %v5122_v52  ;;  %v5753_v62 = vpop.permute.xlu0 %75  ;;  %v203_v52 = vld [vmem:[%s6572_s13 + $0x270] sm:$0xff] }
  0x90   :  { %vm86_vm5 = vcmp.eq.s32.totalorder %v5753_v62, %v64_v44  ;;  %vm88_vm6 = vcmp.eq.s32.totalorder %v5753_v62, %v66_v45  ;;  %5094 = vmatprep.subr.bf16.mxu0 %v5093_v53  ;;  %5124 = vmatprep.subr.bf16.mxu1 %v5379_v38  ;;  %vm85_vm7 = vcmp.eq.s32.totalorder %v5753_v62, %v5698_v40  ;;  %v202_v44 = vld [vmem:[%s6572_s13 + $0x268] sm:$0xff]  ;;  %v233_v45 = vld [vmem:[%s6572_s13 + $0x360] sm:$0xff] }
  0x91   :  { %4385 = vmatprep.mubr.msk.f32.mxu0 %vm86_vm5, %v5380_v59  ;;  %4389 = vmatprep.mubr.msk.f32.mxu1 %vm88_vm6, %v5380_v59  ;;  %vm87_vm8 = vcmp.eq.s32.totalorder %v5753_v62, %v65_v46  ;;  %v234_v46 = vld [vmem:[%s6572_s13 + $0x368] sm:$0xff]  ;;  %v5115_v49 = vpack.c.bf16 %v202_v44, %v201_v42  ;;  %v5117_v53 = vpack.c.bf16 %v220_v48, %v219_v47  ;;  %vm2048_vm5 = vcmask 130048  }
  0x92   :  { %4386 = vmatmul.mubr.msk.f32.gmra.mrb[2].mxu0 %vm85_vm7, %v5380_v59  ;;  %4390 = vmatmul.mubr.msk.f32.gmra.mrb[2].mxu1 %vm87_vm8, %v5380_v59  ;;  %v5140_v51 = vpack.c.bf16 %v234_v46, %v233_v45  ;;  %v5119_v58 = vpack.c.bf16 %v204_v54, %v203_v52  ;;  %vm90_vm12 = vcmp.eq.s32.totalorder %v5753_v62, %v5756_v1  ;;  %vm2301_vm6 = vcmask 523264  }
  0x93   :  { %5096 = vmatpush3.bf16.msra.mxu0 %v5095_v63  ;;  %5126 = vmatpush1.bf16.msra.mxu1 %v5125_v0  ;;  %v238_v63 = vld [vmem:[%s6572_s13 + $0x388] sm:$0xff]  ;;  %v67_v0 = vadd.s32 512, %v5698_v40  ;;  %vm92_vm14 = vcmp.eq.s32.totalorder %v5753_v62, %v5727_v55  ;;  %vm91_vm0 = vcmp.eq.s32.totalorder %v5753_v62, %v69_v18  ;;  %vm4266_vm7 = vcmask 1040384  }
  0x94   :  { %4391 = vmatprep.mubr.msk.f32.mxu0 %vm82_vm10, %v5380_v59  ;;  %4395 = vmatprep.mubr.msk.f32.mxu1 %vm250_vm9, %v4374_v10  ;;  %v5146_v2 = vpack.c.bf16 %v238_v63, %v237_v61  ;;  %v244_v10 = vld [vmem:[%s6572_s13 + $0x3b8] sm:$0xff]  ;;  %v603_v61 = vld [vmem:[%s6535_s4] sm:$0xff]  ;;  %v604_v63 = vld [vmem:[%s6535_s4 + $0x8] sm:$0xff] }
  0x95   :  { %5098 = vmatprep.subr.bf16.mxu0 %v5097_v6  ;;  %5127 = vmatprep.subr.bf16.mxu1 %v5379_v38  ;;  %vm81_vm11 = vcmp.eq.s32.totalorder %v5721_v50, %v67_v0  ;;  %v241_v6 = vld [vmem:[%s6572_s13 + $0x3a0] sm:$0xff]  ;;  %vm89_vm13 = vcmp.eq.s32.totalorder %v5753_v62, %v67_v0  ;;  %v605_v0 = vld [vmem:[%s6535_s4 + $0x10] sm:$0xff] }
  0x96   :  { %v5152_v1 = vpack.c.bf16 %v242_v7, %v241_v6  ;;  %v5167_v4 = vpack.c.bf16 %v606_v3, %v605_v0 }
  0x97   :  { %5100 = vmatpush3.bf16.msra.mxu0 %v5099_v11  ;;  %5129 = vmatpush1.bf16.msra.mxu1 %v5128_v12  ;;  %v5155_v11 = vpack.c.bf16 %v244_v10, %v243_v8  ;;  %v245_v12 = vld [vmem:[%s6572_s13 + $0x3c0] sm:$0xff]  ;;  %s5385_s13 = smov 88  }
  0x98   :  { %5102 = vmatprep.subr.bf16.mxu0 %v5101_v14  ;;  %5130 = vmatprep.subr.bf16.mxu1 %v5379_v38  ;;  %v5158_v14 = vpack.c.bf16 %v246_v13, %v245_v12  ;;  %v4399_v12 = vld [vmem:[%s6573_s22] ss:$0 sm:$0xff]  ;;  %s6553_s22 = smov 16  }
  0x9b   :  { %5104 = vmatpush3.bf16.msra.mxu0 %v5103_v20  ;;  %5132 = vmatpush1.bf16.msra.mxu1 %v5131_v21  ;;  %v4382_v20 = vsel %vm92_vm14, 1.0, %v5381_v9 }
  0x9c   :  { %5106 = vmatprep.subr.bf16.mxu0 %v5105_v23  ;;  %5133 = vmatprep.subr.bf16.mxu1 %v5379_v38 }
  0x9f   :  { %5108 = vmatpush3.bf16.msra.mxu0 %v5107_v29  ;;  %5135 = vmatpush1.bf16.msra.mxu1 %v5134_v30 }
  0xa0   :  { %5110 = vmatprep.subr.bf16.mxu0 %v5109_v32  ;;  %5136 = vmatprep.subr.bf16.mxu1 %v5379_v38 }
  0xa3   :  { %5112 = vmatpush3.bf16.msra.mxu0 %v5111_v39  ;;  %5138 = vmatpush1.bf16.msra.mxu1 %v5137_v41 }
  0xa4   :  { %5114 = vmatprep.subr.bf16.mxu0 %v5113_v43  ;;  %5139 = vmatprep.subr.bf16.mxu1 %v5379_v38 }
  0xa7   :  { %5116 = vmatpush3.bf16.msra.mxu0 %v5115_v49  ;;  %5141 = vmatpush1.bf16.msra.mxu1 %v5140_v51 }
  0xa8   :  { %5118 = vmatprep.subr.bf16.mxu0 %v5117_v53  ;;  %5142 = vmatprep.subr.bf16.mxu1 %v5379_v38 }
  0xab   :  { %5120 = vmatpush3.bf16.msra.mxu0 %v5119_v58  ;;  %5144 = vmatpush1.bf16.msra.mxu1 %v5143_v60 }
  0xac   :  { %5145 = vmatprep.subr.bf16.mxu1 %v5379_v38 }
  0xae   :  { %4392 = vmatmul.mubr.msk.f32.vlgmr.msra.gmra.mrb[4].mxu0 %vm81_vm11, %v5380_v59 }
  0xaf   :  { %4393 = vmatprep.mubr.msk.f32.mxu0 %vm90_vm12, %v5380_v59  ;;  %5147 = vmatpush1.bf16.msra.mxu1 %v5146_v2  ;;  %v5163_v2 = vpack.c.bf16 %v604_v63, %v603_v61 }
  0xb0   :  { %5148 = vmatprep.subr.bf16.mxu1 %v5379_v38 }
  0xb1   :  { %5164 = vmatprep.subr.bf16.mxu0 %v5163_v2 }
  0xb2   :  { %4394 = vmatmul.mubr.msk.f32.gmra.mrb[6].mxu0 %vm89_vm13, %v5380_v59 }
  0xb3   :  { %5150 = vmatpush1.bf16.msra.mxu1 %v5149_v5  ;;  %5166 = vmatpush3.bf16.msra.mxu0 %v5163_v2 }
  0xb4   :  { %5151 = vmatprep.subr.bf16.mxu1 %v5379_v38  ;;  %5168 = vmatprep.subr.bf16.mxu0 %v5167_v4 }
  0xb7   :  { %5153 = vmatpush1.bf16.msra.mxu1 %v5152_v1  ;;  %5170 = vmatpush3.bf16.msra.mxu0 %v5167_v4 }
  0xb8   :  { %5154 = vmatprep.subr.bf16.mxu1 %v5379_v38  ;;  %4761 = vmatprep.subr.mxu0 %v5381_v9 }
  0xbb   :  { %5156 = vmatpush1.bf16.msra.mxu1 %v5155_v11 }
  0xbc   :  { %5157 = vmatprep.subr.bf16.mxu1 %v5379_v38 }
  0xbf   :  { %5159 = vmatpush1.bf16.msra.mxu1 %v5158_v14  ;;  %v4400_v14 = vld [vmem:[%s6534_s3] ss:$0 sm:$0xff] }
  0xc0   :  { %5160 = vmatprep.subr.bf16.mxu1 %v5379_v38 }
  0xc3   :  { %5162 = vmatpush1.bf16.msra.mxu1 %v5161_v17 }
  0xc4   :  { %538 = vmatprep.subr.mxu1 %v5381_v9 }
  0xc7   :  { %539 = vmatpush1.msra.mxu1 %v249_v19 }
  0xc8   :  { %4396 = vmatmul.mubr.msk.f32.vlgmr.msra.gmra.mrb[4].mxu1 %vm83_vm15, %v5380_v59  ;;  %4801 = vmatprep.subr.mxu1 %v5381_v9 }
  0xc9   :  { %4397 = vmatprep.mubr.msk.f32.mxu1 %vm250_vm9, %v4382_v20 }
  0xcc   :  { %4398 = vmatmul.mubr.msk.f32.gmra.mrb[6].mxu1 %vm91_vm0, %v5380_v59 }
  0xcd   :  { %4803 = vmatprep.mubr.msk.f32.mxu1 %vm5382_vm2, %v5381_v9 }
 0x161   :  { %v4543_v40 = vpop.f32.mrb[0].mxu0  ;;  %v4581_v21 = vpop.f32.mrb[0].mxu1 }
 0x162   :  { %v4544_v22 = vpop.f32.mrb[1].mxu0  ;;  %v4582_v23 = vpop.f32.mrb[1].mxu1 }
 0x163   :  { %v4545_v55 = vadd.f32 %v4544_v22, %v4543_v40  ;;  %v4583_v24 = vadd.f32 %v4582_v23, %v4581_v21  ;;  %v4401_v40 = vld [vmem:[%s6536_s5] ss:$0 sm:$0xff] }
 0x165   :  { %v399_v25 = vadd.f32 %v4583_v24, %v4545_v55  ;;  %v4546_v50 = vpop.f32.mrb[2].mxu0  ;;  %v4584_v26 = vpop.f32.mrb[2].mxu1 }
 0x166   :  { %v4547_v27 = vpop.f32.mrb[3].mxu0  ;;  %v4585_v28 = vpop.f32.mrb[3].mxu1 }
 0x167   :  { %v4548_v29 = vadd.f32 %v4547_v27, %v4546_v50  ;;  %v4586_v30 = vadd.f32 %v4585_v28, %v4584_v26 }
 0x169   :  { %v404_v31 = vadd.f32 %v4586_v30, %v4548_v29 }
 0x181   :  { %v4619_v32 = vpop.f32.mrb[4].mxu0 }
 0x182   :  { %v4620_v33 = vpop.f32.mrb[5].mxu0 }
 0x183   :  { %v4621_v34 = vadd.f32 %v4620_v33, %v4619_v32 }
 0x185   :  { %v4622_v62 = vpop.f32.mrb[6].mxu0  ;;  %v474_v35 = vadd.f32 %v4621_v34, %v399_v25 }
 0x186   :  { %v4623_v59 = vpop.f32.mrb[7].mxu0 }
 0x187   :  { %v4624_v36 = vadd.f32 %v4623_v59, %v4622_v62 }
 0x189   :  { %v479_v37 = vadd.f32 %v4624_v36, %v404_v31 }
 0x19b   :  { %v548_v39 = vpop.f32.mrb[4].mxu1 }
 0x19c   :  { %v549_v41 = vadd.f32 %v548_v39, %v474_v35  ;;  %v550_v42 = vpop.f32.mrb[5].mxu1 }
 0x19e   :  { %v560_v43 = vsel %vm559_vm1, %v549_v41, 0.0 }
 0x19f   :  { %v553_v44 = vpop.f32.mrb[6].mxu1  ;;  %561 = vadd.xlane.f32.xlu1 %v560_v43 }
 0x1a0   :  { %v554_v45 = vadd.f32 %v553_v44, %v479_v37  ;;  %v555_v46 = vpop.f32.mrb[7].mxu1 }
 0x1a2   :  { %v563_v47 = vsel %vm559_vm1, %v554_v45, 0.0 }
 0x1a3   :  { %564 = vadd.xlane.f32.xlu1 %v563_v47 }
 0x22c   :  { %v562_v48 = vpop.xlane.xlu1 %561 }
 0x22d   :  { %v567_v49 = vmul.f32 0.03125, %v562_v48 }
 0x22f   :  { %v569_v51 = vsub.f32 %v549_v41, %v567_v49 }
 0x230   :  { %v565_v52 = vpop.xlane.xlu1 %564 }
 0x231   :  { %v568_v53 = vmul.f32 0.03125, %v565_v52  ;;  %v571_v54 = vmul.f32 %v569_v51, %v569_v51 }
 0x233   :  { %v570_v56 = vsub.f32 %v554_v45, %v568_v53  ;;  %v573_v57 = vsel %vm559_vm1, %v571_v54, 0.0 }
 0x234   :  { %574 = vadd.xlane.f32.xlu0 %v573_v57 }
 0x235   :  { %v572_v58 = vmul.f32 %v570_v56, %v570_v56 }
 0x237   :  { %v576_v60 = vsel %vm559_vm1, %v572_v58, 0.0 }
 0x238   :  { %577 = vadd.xlane.f32.xlu1 %v576_v60 }
 0x2c1   :  { %v575_v5 = vpop.xlane.xlu0 %574 }
 0x2c2   :  { %v579_v6 = vmul.f32 0.03125, %v575_v5 }
 0x2c4   :  { %v581_v7 = vadd.f32 1e-05, %v579_v6 }
 0x2c5   :  { %v578_v1 = vpop.xlane.xlu1 %577 }
 0x2c6   :  { %5270 = vrsqrt.f32 %v581_v7  ;;  %v580_v8 = vmul.f32 0.03125, %v578_v1 }
 0x2c8   :  { %v582_v10 = vadd.f32 1e-05, %v580_v8 }
 0x2ca   :  { %5272 = vrsqrt.f32 %v582_v10 }
 0x2d0   :  { %v5271_v11 = vpop.eup %5270 }
 0x2d1   :  { %v585_v13 = vmul.f32 %v5271_v11, %v569_v51 }
 0x2d3   :  { %v593_v15 = vmul.f32 %v4399_v12, %v585_v13 }
 0x2d4   :  { %v5273_v16 = vpop.eup %5272 }
 0x2d5   :  { %v586_v17 = vmul.f32 %v5273_v16, %v570_v56  ;;  %v5973_v18 = vadd.f32 %v4400_v14, %v593_v15 }
 0x2d7   :  { %v594_v19 = vmul.f32 %v4399_v12, %v586_v17  ;;  %4758 = vmatprep.mubr.msk.f32.mxu0 %vm559_vm1, %v5973_v18 }
 0x2d9   :  { %v5977_v20 = vadd.f32 %v4400_v14, %v594_v19 }
 0x2db   :  { %4759 = vmatmul.mubr.msk.f32.vlgmr.msra.gmra.mrb[8].mxu0 %vm559_vm1, %v5977_v20 }
 0x2dc   :  { %4763 = vmatprep.mubr.msk.f32.mxu0 %vm5382_vm2, %v5381_v9 }
 0x3ae   :  { %v4760_v21 = vpop.f32.mrb[8].mxu0 }
 0x3af   :  { %v686_v22 = vpop.f32.mrb[9].mxu0  ;;  %v5992_v55 = vadd.f32 %v4760_v21, %v4401_v40 }
 0x3b0   :  { %v5988_v23 = vadd.f32 %v4401_v40, %v686_v22 }
 0x3b2   :  { %696 = vrot.lane.b32.xlu1 %v5988_v23, %s5383_s25 }
 0x3b6   :  { %774 = vrot.lane.b32.xlu1 %v5992_v55, %s5383_s25 }
 0x424   :  { %v697_v24 = vpop.permute.xlu1 %696 }
 0x425   :  { %4762 = vmatpush3.xpose.msk.msra.mxu0 %vm698_vm3, %v697_v24 }
 0x426   :  { %4766 = vmatprep.subr.mxu0 %v5381_v9 }
 0x428   :  { %4764 = vmatmul.mubr.msk.f32.vlgmr.msra.gmra.mrb[10].mxu0 %vm698_vm3, %v5988_v23  ;;  %v775_v25 = vpop.permute.xlu1 %774 }
 0x429   :  { %4767 = vmatpush3.xpose.msk.msra.mxu0 %vm698_vm3, %v775_v25  ;;  %4768 = vmatprep.mubr.msk.f32.mxu0 %vm5382_vm2, %v5381_v9 }
 0x42a   :  { %4771 = vmatprep.subr.mxu0 %v5381_v9 }
 0x42c   :  { %4769 = vmatmul.mubr.msk.f32.vlgmr.msra.gmra.mrb[12].mxu0 %vm698_vm3, %v5992_v55 }
 0x42d   :  { %4773 = vmatprep.mubr.msk.f32.mxu0 %vm5382_vm2, %v5381_v9 }
 0x4fb   :  { %v769_v50 = vpop.f32.mrb[10].mxu0 }
 0x4fc   :  { %v850_v26 = vmul.f32 0.35355338, %v769_v50  ;;  %v4765_v27 = vpop.f32.mrb[11].mxu0 }
 0x4fe   :  { %v852_v28 = vsel %vm698_vm3, %v850_v26, -inf }
 0x4ff   :  { %853 = vmax.xlane.f32.xlu1 %v852_v28  ;;  %v846_v29 = vpop.f32.mrb[12].mxu0 }
 0x500   :  { %v851_v30 = vmul.f32 0.35355338, %v846_v29  ;;  %v4770_v31 = vpop.f32.mrb[13].mxu0 }
 0x502   :  { %v855_v32 = vsel %vm698_vm3, %v851_v30, -inf }
 0x503   :  { %856 = vmax.xlane.f32.xlu0 %v855_v32 }
 0x510   :  { %950 = vrot.lane.b32.xlu1 %v5992_v55, %s5384_s26 }
 0x519   :  { %874 = vrot.lane.b32.xlu0 %v5988_v23, %s5384_s26 }
 0x51d   :  { %1028 = vrot.lane.b32.xlu0 %v5988_v23, %s5385_s13 }
 0x58c   :  { %v854_v33 = vpop.xlane.xlu1 %853 }
 0x58d   :  { %v858_v34 = vsub.f32 %v850_v26, %v854_v33 }
 0x58f   :  { %v860_v62 = vmul.f32 1.442695, %v858_v34 }
 0x590   :  { %v857_v35 = vpop.xlane.xlu0 %856  ;;  %v951_v49 = vpop.permute.xlu1 %950 }
 0x591   :  { %5274 = vpow2.f32 %v860_v62  ;;  %v859_v59 = vsub.f32 %v851_v30, %v857_v35 }
 0x593   :  { %v862_v36 = vmul.f32 1.442695, %v859_v59 }
 0x594   :  { %v875_v37 = vpop.permute.xlu0 %874 }
 0x595   :  { %5276 = vpow2.f32 %v862_v36  ;;  %4772 = vmatpush3.msra.mxu0 %v875_v37 }
 0x596   :  { %4776 = vmatprep.subr.mxu0 %v5381_v9 }
 0x598   :  { %v1029_v44 = vpop.permute.xlu0 %1028 }
 0x59b   :  { %v5275_v39 = vpop.eup %5274 }
 0x59c   :  { %v864_v41 = vsel %vm698_vm3, %v5275_v39, 0.0 }
 0x59d   :  { %865 = vadd.xlane.f32.xlu0 %v864_v41 }
 0x59f   :  { %v5277_v42 = vpop.eup %5276 }
 0x5a0   :  { %v867_v43 = vsel %vm698_vm3, %v5277_v42, 0.0 }
 0x5a1   :  { %868 = vadd.xlane.f32.xlu0 %v867_v43 }
 0x5b7   :  { %1026 = vrot.lane.b32.xlu0 %v5988_v23, %s5386_s27 }
 0x5bb   :  { %1106 = vrot.lane.b32.xlu0 %v5992_v55, %s5385_s13 }
 0x5bf   :  { %1104 = vrot.lane.b32.xlu0 %v5992_v55, %s5386_s27 }
 0x62a   :  { %v866_v45 = vpop.xlane.xlu0 %865 }
 0x62b   :  { %5278 = vrcp.f32 %v866_v45 }
 0x62e   :  { %v869_v46 = vpop.xlane.xlu0 %868 }
 0x62f   :  { %5280 = vrcp.f32 %v869_v46 }
 0x632   :  { %v1027_v52 = vpop.permute.xlu0 %1026 }
 0x635   :  { %v5279_v47 = vpop.eup %5278 }
 0x636   :  { %v872_v48 = vmul.f32 %v5279_v47, %v5275_v39  ;;  %v1107_v54 = vpop.permute.xlu0 %1106 }
 0x638   :  { %4774 = vmatmul.mubr.msk.f32.vlgmr.msra.gmra.mrb[14].mxu0 %vm698_vm3, %v872_v48 }
 0x639   :  { %v5281_v51 = vpop.eup %5280  ;;  %4777 = vmatpush3.msra.mxu0 %v951_v49  ;;  %4778 = vmatprep.mubr.msk.f32.mxu0 %vm5382_vm2, %v5381_v9 }
 0x63a   :  { %v873_v53 = vmul.f32 %v5281_v51, %v5277_v42  ;;  %4781 = vmatprep.subr.mxu0 %v5381_v9  ;;  %v1105_v56 = vpop.permute.xlu0 %1104 }
 0x63c   :  { %4779 = vmatmul.mubr.msk.f32.vlgmr.msra.gmra.mrb[16].mxu0 %vm698_vm3, %v873_v53 }
 0x63d   :  { %4783 = vmatprep.mubr.msk.f32.mxu0 %vm5382_vm2, %v5381_v9 }
 0x640   :  { %4782 = vmatpush3.xpose.msk.msra.mxu0 %vm698_vm3, %v1029_v44 }
 0x641   :  { %4786 = vmatprep.subr.mxu0 %v5381_v9 }
 0x643   :  { %4784 = vmatmul.mubr.msk.f32.vlgmr.msra.gmra.mrb[18].mxu0 %vm698_vm3, %v1027_v52 }
 0x644   :  { %4787 = vmatpush3.xpose.msk.msra.mxu0 %vm698_vm3, %v1107_v54  ;;  %4788 = vmatprep.mubr.msk.f32.mxu0 %vm5382_vm2, %v5381_v9 }
 0x645   :  { %4791 = vmatprep.subr.mxu0 %v5381_v9 }
 0x647   :  { %4789 = vmatmul.mubr.msk.f32.vlgmr.msra.gmra.mrb[20].mxu0 %vm698_vm3, %v1105_v56 }
 0x648   :  { %4793 = vmatprep.mubr.msk.f32.mxu0 %vm5382_vm2, %v5381_v9 }
 0x70b   :  { %v6042_v57 = vpop.f32.mrb[14].mxu0 }
 0x70c   :  { %v4775_v58 = vpop.f32.mrb[15].mxu0 }
 0x70f   :  { %v6044_v60 = vpop.f32.mrb[16].mxu0 }
 0x710   :  { %v4780_v61 = vpop.f32.mrb[17].mxu0 }
 0x716   :  { %v1100_v63 = vpop.f32.mrb[18].mxu0 }
 0x717   :  { %v1182_v0 = vmul.f32 0.35355338, %v1100_v63  ;;  %v4785_v2 = vpop.f32.mrb[19].mxu0 }
 0x719   :  { %v1184_v3 = vsel %vm698_vm3, %v1182_v0, -inf }
 0x71a   :  { %1185 = vmax.xlane.f32.xlu1 %v1184_v3  ;;  %v1178_v4 = vpop.f32.mrb[20].mxu0 }
 0x71b   :  { %v1183_v5 = vmul.f32 0.35355338, %v1178_v4  ;;  %v4790_v6 = vpop.f32.mrb[21].mxu0 }
 0x71d   :  { %v1187_v7 = vsel %vm698_vm3, %v1183_v5, -inf }
 0x71e   :  { %1188 = vmax.xlane.f32.xlu0 %v1187_v7 }
 0x72b   :  { %1282 = vrot.lane.b32.xlu1 %v5992_v55, %s5387_s28 }
 0x72f   :  { %1360 = vrot.lane.b32.xlu1 %v5988_v23, %s5388_s29 }
 0x7a7   :  { %v1186_v1 = vpop.xlane.xlu1 %1185 }
 0x7a8   :  { %v1190_v8 = vsub.f32 %v1182_v0, %v1186_v1 }
 0x7aa   :  { %v1192_v10 = vmul.f32 1.442695, %v1190_v8 }
 0x7ab   :  { %v1283_v11 = vpop.permute.xlu1 %1282  ;;  %v1189_v12 = vpop.xlane.xlu0 %1188 }
 0x7ac   :  { %5282 = vpow2.f32 %v1192_v10  ;;  %v1191_v13 = vsub.f32 %v1183_v5, %v1189_v12 }
 0x7ae   :  { %v1194_v14 = vmul.f32 1.442695, %v1191_v13 }
 0x7af   :  { %v1361_v15 = vpop.permute.xlu1 %1360 }
 0x7b0   :  { %5284 = vpow2.f32 %v1194_v14  ;;  %4802 = vmatpush3.xpose.msk.msra.mxu1 %vm698_vm3, %v1361_v15 }
 0x7b1   :  { %4811 = vmatprep.subr.mxu1 %v5381_v9 }
 0x7b6   :  { %v5283_v16 = vpop.eup %5282 }
 0x7b7   :  { %v1196_v17 = vsel %vm698_vm3, %v5283_v16, 0.0 }
 0x7b8   :  { %1197 = vadd.xlane.f32.xlu0 %v1196_v17 }
 0x7ba   :  { %v5285_v19 = vpop.eup %5284 }
 0x7bb   :  { %v1199_v40 = vsel %vm698_vm3, %v5285_v19, 0.0 }
 0x7bc   :  { %1200 = vadd.xlane.f32.xlu1 %v1199_v40 }
 0x7cd   :  { %1358 = vrot.lane.b32.xlu1 %v5988_v23, %s5389_s30 }
 0x7ce   :  { %1206 = vrot.lane.b32.xlu0 %v5988_v23, %s5387_s28 }
 0x7d2   :  { %1438 = vrot.lane.b32.xlu0 %v5992_v55, %s5388_s29 }
 0x7d6   :  { %1436 = vrot.lane.b32.xlu0 %v5992_v55, %s5389_s30 }
 0x845   :  { %v1198_v21 = vpop.xlane.xlu0 %1197 }
 0x846   :  { %5286 = vrcp.f32 %v1198_v21 }
 0x849   :  { %v1201_v22 = vpop.xlane.xlu1 %1200  ;;  %v1207_v24 = vpop.permute.xlu0 %1206 }
 0x84a   :  { %5288 = vrcp.f32 %v1201_v22  ;;  %4792 = vmatpush3.msra.mxu0 %v1207_v24 }
 0x84b   :  { %4796 = vmatprep.subr.mxu0 %v5381_v9 }
 0x84d   :  { %v1359_v25 = vpop.permute.xlu1 %1358  ;;  %v1439_v29 = vpop.permute.xlu0 %1438 }
 0x84e   :  { %4804 = vmatmul.mubr.msk.f32.vlgmr.msra.gmra.mrb[8].mxu1 %vm698_vm3, %v1359_v25 }
 0x84f   :  { %4813 = vmatprep.mubr.msk.f32.mxu1 %vm5382_vm2, %v5381_v9 }
 0x850   :  { %v5287_v50 = vpop.eup %5286 }
 0x851   :  { %v1204_v26 = vmul.f32 %v5287_v50, %v5283_v16  ;;  %v1437_v30 = vpop.permute.xlu0 %1436 }
 0x853   :  { %4794 = vmatmul.mubr.msk.f32.vlgmr.msra.gmra.mrb[22].mxu0 %vm698_vm3, %v1204_v26 }
 0x854   :  { %v5289_v27 = vpop.eup %5288  ;;  %4797 = vmatpush3.msra.mxu0 %v1283_v11  ;;  %4798 = vmatprep.mubr.msk.f32.mxu0 %vm5382_vm2, %v5381_v9 }
 0x855   :  { %v1205_v28 = vmul.f32 %v5289_v27, %v5285_v19  ;;  %4806 = vmatprep.subr.mxu0 %v5381_v9 }
 0x857   :  { %4799 = vmatmul.mubr.msk.f32.vlgmr.msra.gmra.mrb[24].mxu0 %vm698_vm3, %v1205_v28 }
 0x858   :  { %4808 = vmatprep.mubr.msk.f32.mxu0 %vm5382_vm2, %v5381_v9 }
 0x85b   :  { %4807 = vmatpush3.xpose.msk.msra.mxu0 %vm698_vm3, %v1439_v29 }
 0x85c   :  { %4816 = vmatprep.subr.mxu0 %v5381_v9 }
 0x85e   :  { %4809 = vmatmul.mubr.msk.f32.vlgmr.msra.gmra.mrb[26].mxu0 %vm698_vm3, %v1437_v30 }
 0x85f   :  { %4818 = vmatprep.mubr.msk.f32.mxu0 %vm5382_vm2, %v5381_v9 }
 0x921   :  { %v1432_v31 = vpop.f32.mrb[8].mxu1 }
 0x922   :  { %v1514_v32 = vmul.f32 0.35355338, %v1432_v31  ;;  %v4805_v33 = vpop.f32.mrb[9].mxu1 }
 0x924   :  { %v1516_v34 = vsel %vm698_vm3, %v1514_v32, -inf }
 0x925   :  { %1517 = vmax.xlane.f32.xlu1 %v1516_v34 }
 0x926   :  { %v6081_v62 = vpop.f32.mrb[22].mxu0 }
 0x927   :  { %v4795_v35 = vpop.f32.mrb[23].mxu0 }
 0x92a   :  { %v6083_v59 = vpop.f32.mrb[24].mxu0 }
 0x92b   :  { %v4800_v36 = vpop.f32.mrb[25].mxu0 }
 0x931   :  { %v1510_v37 = vpop.f32.mrb[26].mxu0 }
 0x932   :  { %v1515_v39 = vmul.f32 0.35355338, %v1510_v37  ;;  %v4810_v41 = vpop.f32.mrb[27].mxu0  ;;  %v2056_v37 = vld [vmem:[%s6537_s6 + $0x10] sm:$0xff] }
 0x933   :  { %v2057_v41 = vld [vmem:[%s6537_s6 + $0x18] sm:$0xff] }
 0x934   :  { %v1519_v42 = vsel %vm698_vm3, %v1515_v39, -inf }
 0x935   :  { %1520 = vmax.xlane.f32.xlu0 %v1519_v42  ;;  %v5175_v42 = vpack.c.bf16 %v2057_v41, %v2056_v37 }
 0x936   :  { %1614 = vrot.lane.b32.xlu1 %v5992_v55, %s6565_s0 }
 0x93a   :  { %1692 = vrot.lane.b32.xlu1 %v5988_v23, %s6563_s19 }
 0x9b2   :  { %v1518_v43 = vpop.xlane.xlu1 %1517 }
 0x9b3   :  { %v1522_v44 = vsub.f32 %v1514_v32, %v1518_v43 }
 0x9b5   :  { %v1524_v45 = vmul.f32 1.442695, %v1522_v44 }
 0x9b6   :  { %v1615_v46 = vpop.permute.xlu1 %1614 }
 0x9b7   :  { %5290 = vpow2.f32 %v1524_v45  ;;  %4817 = vmatpush3.msra.mxu0 %v1615_v46 }
 0x9b8   :  { %4826 = vmatprep.subr.mxu0 %v5381_v9 }
 0x9ba   :  { %v1693_v63 = vpop.permute.xlu1 %1692 }
 0x9c1   :  { %v5291_v47 = vpop.eup %5290 }
 0x9c2   :  { %v1521_v48 = vpop.xlane.xlu0 %1520  ;;  %v1528_v49 = vsel %vm698_vm3, %v5291_v47, 0.0 }
 0x9c3   :  { %v1523_v51 = vsub.f32 %v1515_v39, %v1521_v48  ;;  %1529 = vadd.xlane.f32.xlu0 %v1528_v49 }
 0x9c5   :  { %v1526_v52 = vmul.f32 1.442695, %v1523_v51 }
 0x9c7   :  { %5292 = vpow2.f32 %v1526_v52 }
 0x9d1   :  { %v5293_v53 = vpop.eup %5292 }
 0x9d2   :  { %v1531_v54 = vsel %vm698_vm3, %v5293_v53, 0.0 }
 0x9d3   :  { %1532 = vadd.xlane.f32.xlu1 %v1531_v54 }
 0x9d9   :  { %1538 = vrot.lane.b32.xlu0 %v5988_v23, %s6565_s0 }
 0x9dd   :  { %1770 = vrot.lane.b32.xlu0 %v5992_v55, %s6563_s19 }
 0x9e1   :  { %1768 = vrot.lane.b32.xlu0 %v5992_v55, %s6559_s1 }
 0x9e4   :  { %1690 = vrot.lane.b32.xlu1 %v5988_v23, %s6559_s1 }
 0xa50   :  { %v1530_v56 = vpop.xlane.xlu0 %1529 }
 0xa51   :  { %5294 = vrcp.f32 %v1530_v56 }
 0xa54   :  { %v1539_v58 = vpop.permute.xlu0 %1538 }
 0xa55   :  { %4812 = vmatpush3.msra.mxu1 %v1539_v58 }
 0xa56   :  { %4821 = vmatprep.subr.mxu1 %v5381_v9 }
 0xa58   :  { %v1771_v5 = vpop.permute.xlu0 %1770 }
 0xa5b   :  { %v5295_v61 = vpop.eup %5294 }
 0xa5c   :  { %v1536_v0 = vmul.f32 %v5295_v61, %v5291_v47  ;;  %v1769_v7 = vpop.permute.xlu0 %1768 }
 0xa5e   :  { %4814 = vmatmul.mubr.msk.f32.vlgmr.msra.gmra.mrb[10].mxu1 %vm698_vm3, %v1536_v0 }
 0xa5f   :  { %4822 = vmatpush3.xpose.msk.msra.mxu1 %vm698_vm3, %v1693_v63  ;;  %4823 = vmatprep.mubr.msk.f32.mxu1 %vm5382_vm2, %v5381_v9 }
 0xa60   :  { %v1533_v2 = vpop.xlane.xlu1 %1532  ;;  %4831 = vmatprep.subr.mxu1 %v5381_v9 }
 0xa61   :  { %5296 = vrcp.f32 %v1533_v2 }
 0xa64   :  { %v1691_v3 = vpop.permute.xlu1 %1690 }
 0xa65   :  { %4824 = vmatmul.mubr.msk.f32.vlgmr.msra.gmra.mrb[12].mxu1 %vm698_vm3, %v1691_v3 }
 0xa66   :  { %4833 = vmatprep.mubr.msk.f32.mxu1 %vm5382_vm2, %v5381_v9 }
 0xa6b   :  { %v5297_v4 = vpop.eup %5296 }
 0xa6c   :  { %v1537_v6 = vmul.f32 %v5297_v4, %v5293_v53 }
 0xa6e   :  { %4819 = vmatmul.mubr.msk.f32.vlgmr.msra.gmra.mrb[28].mxu0 %vm698_vm3, %v1537_v6 }
 0xa6f   :  { %4827 = vmatpush3.xpose.msk.msra.mxu0 %vm698_vm3, %v1771_v5  ;;  %4828 = vmatprep.mubr.msk.f32.mxu0 %vm5382_vm2, %v5381_v9 }
 0xa70   :  { %4836 = vmatprep.subr.mxu0 %v5381_v9 }
 0xa72   :  { %4829 = vmatmul.mubr.msk.f32.vlgmr.msra.gmra.mrb[30].mxu0 %vm698_vm3, %v1769_v7 }
 0xa73   :  { %4838 = vmatprep.mubr.msk.f32.mxu0 %vm5382_vm2, %v5381_v9 }
 0xb31   :  { %v1610_v1 = vpop.f32.mrb[10].mxu1 }
 0xb32   :  { %v4815_v8 = vpop.f32.mrb[11].mxu1 }
 0xb38   :  { %v1764_v10 = vpop.f32.mrb[12].mxu1 }
 0xb39   :  { %v1846_v11 = vmul.f32 0.35355338, %v1764_v10  ;;  %v4825_v12 = vpop.f32.mrb[13].mxu1 }
 0xb3b   :  { %v1848_v13 = vsel %vm698_vm3, %v1846_v11, -inf }
 0xb3c   :  { %1849 = vmax.xlane.f32.xlu1 %v1848_v13 }
 0xb41   :  { %v1686_v14 = vpop.f32.mrb[28].mxu0 }
 0xb42   :  { %v4820_v15 = vpop.f32.mrb[29].mxu0 }
 0xb45   :  { %v1842_v16 = vpop.f32.mrb[30].mxu0 }
 0xb46   :  { %v1847_v17 = vmul.f32 0.35355338, %v1842_v16  ;;  %v4830_v19 = vpop.f32.mrb[31].mxu0 }
 0xb47   :  { %v2193_v19 = vld [vmem:[%s6541_s10 + $0x8] sm:$0xff] }
 0xb48   :  { %v1851_v40 = vsel %vm698_vm3, %v1847_v17, -inf }
 0xb49   :  { %1852 = vmax.xlane.f32.xlu0 %v1851_v40 }
 0xbc9   :  { %v1850_v21 = vpop.xlane.xlu1 %1849 }
 0xbca   :  { %v1854_v22 = vsub.f32 %v1846_v11, %v1850_v21  ;;  %v2194_v21 = vld [vmem:[%s6541_s10 + $0x10] sm:$0xff] }
 0xbcc   :  { %v1856_v24 = vmul.f32 1.442695, %v1854_v22  ;;  %v2195_v22 = vld [vmem:[%s6541_s10 + $0x18] sm:$0xff] }
 0xbce   :  { %5298 = vpow2.f32 %v1856_v24  ;;  %v5183_v24 = vpack.c.bf16 %v2195_v22, %v2194_v21 }
 0xbd6   :  { %v1853_v25 = vpop.xlane.xlu0 %1852 }
 0xbd7   :  { %v1855_v50 = vsub.f32 %v1847_v17, %v1853_v25  ;;  %v2286_v25 = vld [vmem:[%s6543_s12] sm:$0xff] }
 0xbd8   :  { %v5299_v26 = vpop.eup %5298 }
 0xbd9   :  { %v1858_v27 = vmul.f32 1.442695, %v1855_v50  ;;  %v1860_v28 = vsel %vm698_vm3, %v5299_v26, 0.0  ;;  %v2287_v50 = vld [vmem:[%s6543_s12 + $0x8] sm:$0xff] }
 0xbda   :  { %1861 = vadd.xlane.f32.xlu0 %v1860_v28  ;;  %v2289_v28 = vld [vmem:[%s6543_s12 + $0x18] sm:$0xff] }
 0xbdb   :  { %5300 = vpow2.f32 %v1858_v27  ;;  %v5187_v27 = vpack.c.bf16 %v2287_v50, %v2286_v25 }
 0xbe5   :  { %v5301_v29 = vpop.eup %5300 }
 0xbe6   :  { %v1863_v30 = vsel %vm698_vm3, %v5301_v29, 0.0 }
 0xbe7   :  { %1864 = vadd.xlane.f32.xlu1 %v1863_v30  ;;  %v2290_v30 = vld [vmem:[%s6543_s12 + $0x20] sm:$0xff] }
 0xbf0   :  { %1870 = vrot.lane.b32.xlu0 %v5988_v23, %s6557_s20 }
 0xbf4   :  { %2026 = vrot.lane.b32.xlu0 %v6083_v59, %s6555_s21 }
 0xbf8   :  { %2034 = vrot.lane.b32.xlu0 %v1686_v14, %s6553_s22  ;;  %1946 = vrot.lane.b32.xlu1 %v5992_v55, %s6557_s20  ;;  %v2054_v55 = vld [vmem:[%s6537_s6] sm:$0xff] }
 0xbfc   :  { %2024 = vrot.lane.b32.xlu1 %v6081_v62, %s6555_s21  ;;  %v2055_v62 = vld [vmem:[%s6537_s6 + $0x8] sm:$0xff] }
 0xbfd   :  { %v5171_v39 = vpack.c.bf16 %v2055_v62, %v2054_v55  ;;  %v4431_v62 = vld [vmem:[%s6539_s8] ss:$0 sm:$0xff] }
 0xc00   :  { %2032 = vrot.lane.b32.xlu1 %v1610_v1, %s6553_s22 }
 0xc67   :  { %v1862_v31 = vpop.xlane.xlu0 %1861 }
 0xc68   :  { %5302 = vrcp.f32 %v1862_v31  ;;  %v2291_v31 = vld [vmem:[%s6543_s12 + $0x28] sm:$0xff] }
 0xc6b   :  { %v1871_v32 = vpop.permute.xlu0 %1870 }
 0xc6c   :  { %4832 = vmatpush3.msra.mxu1 %v1871_v32  ;;  %v5195_v32 = vpack.c.bf16 %v2291_v31, %v2290_v30 }
 0xc6d   :  { %5172 = vmatprep.subr.bf16.mxu1 %v5171_v39 }
 0xc6f   :  { %v2027_v54 = vpop.permute.xlu0 %2026 }
 0xc70   :  { %v2047_v58 = vsel %vm698_vm3, %v6044_v60, %v2027_v54 }
 0xc72   :  { %v5303_v23 = vpop.eup %5302 }
 0xc73   :  { %v1868_v33 = vmul.f32 %v5303_v23, %v5299_v26  ;;  %v2035_v56 = vpop.permute.xlu0 %2034  ;;  %v2288_v26 = vld [vmem:[%s6543_s12 + $0x10] sm:$0xff] }
 0xc74   :  { %v1865_v34 = vpop.xlane.xlu1 %1864  ;;  %v2050_v61 = vsel %vm2048_vm5, %v2047_v58, %v2035_v56 }
 0xc75   :  { %5304 = vrcp.f32 %v1865_v34  ;;  %4834 = vmatmul.mubr.msk.f32.vlgmr.msra.gmra.mrb[14].mxu1 %vm698_vm3, %v1868_v33 }
 0xc76   :  { %5174 = vmatpush3.bf16.msra.mxu1 %v5171_v39 }
 0xc77   :  { %5176 = vmatprep.subr.bf16.mxu1 %v5175_v42 }
 0xc78   :  { %v1947_v35 = vpop.permute.xlu1 %1946 }
 0xc79   :  { %4837 = vmatpush3.msra.mxu0 %v1947_v35 }
 0xc7a   :  { %5178 = vmatpush3.bf16.msra.mxu1 %v5175_v42  ;;  %v4432_v42 = vld [vmem:[%s6540_s9] ss:$0 sm:$0xff] }
 0xc7b   :  { %5188 = vmatprep.subr.bf16.mxu1 %v5187_v27 }
 0xc7c   :  { %v2025_v47 = vpop.permute.xlu1 %2024 }
 0xc7d   :  { %v2046_v49 = vsel %vm698_vm3, %v6042_v57, %v2025_v47  ;;  %v4428_v57 = vld [vmem:[%s6538_s7] ss:$0 sm:$0xff]  ;;  %v2292_v47 = vld [vmem:[%s6543_s12 + $0x30] sm:$0xff] }
 0xc7f   :  { %v5305_v59 = vpop.eup %5304 }
 0xc80   :  { %v1869_v36 = vmul.f32 %v5305_v59, %v5301_v29  ;;  %v2033_v48 = vpop.permute.xlu1 %2032  ;;  %v5191_v29 = vpack.c.bf16 %v2289_v28, %v2288_v26 }
 0xc81   :  { %v2049_v51 = vsel %vm2048_vm5, %v2046_v49, %v2033_v48  ;;  %v2293_v48 = vld [vmem:[%s6543_s12 + $0x38] sm:$0xff] }
 0xc82   :  { %4839 = vmatmul.mubr.msk.f32.vlgmr.msra.gmra.mrb[32].mxu0 %vm698_vm3, %v1869_v36  ;;  %v5199_v49 = vpack.c.bf16 %v2293_v48, %v2292_v47 }
 0xd48   :  { %v1942_v43 = vpop.f32.mrb[14].mxu1 }
 0xd49   :  { %2040 = vrot.lane.b32.xlu1 %v1942_v43, %s6561_s2  ;;  %v4835_v44 = vpop.f32.mrb[15].mxu1 }
 0xd55   :  { %v2018_v45 = vpop.f32.mrb[32].mxu0 }
 0xd56   :  { %2042 = vrot.lane.b32.xlu0 %v2018_v45, %s6561_s2  ;;  %v4840_v46 = vpop.f32.mrb[33].mxu0 }
 0xdbb   :  { %v2041_v52 = vpop.permute.xlu1 %2040 }
 0xdbc   :  { %v2052_v53 = vsel %vm2051_vm4, %v2049_v51, %v2041_v52  ;;  %v4433_v51 = vld [vmem:[%s6542_s11] ss:$0 sm:$0xff] }
 0xdbd   :  { %4849 = vmatprep.mubr.msk.f32.mxu1 %vm559_vm1, %v2052_v53 }
 0xdc8   :  { %v2043_v63 = vpop.permute.xlu0 %2042 }
 0xdc9   :  { %v2053_v0 = vsel %vm2051_vm4, %v2050_v61, %v2043_v63  ;;  %v4436_v63 = vld [vmem:[%s6574_s23] ss:$0 sm:$0xff] }
 0xdca   :  { %4850 = vmatmul.mubr.msk.f32.vlgmr.msra.gmra.mrb[16].mxu1 %vm559_vm1, %v2053_v0 }
 0xdcb   :  { %5190 = vmatpush3.bf16.msra.mxu1 %v5187_v27 }
 0xdcc   :  { %5192 = vmatprep.subr.bf16.mxu1 %v5191_v29 }
 0xdcf   :  { %5194 = vmatpush3.bf16.msra.mxu1 %v5191_v29  ;;  %v4439_v29 = vld [vmem:[%s6545_s14] ss:$0 sm:$0xff] }
 0xdd0   :  { %5196 = vmatprep.subr.bf16.mxu1 %v5195_v32 }
 0xdd3   :  { %5198 = vmatpush3.bf16.msra.mxu1 %v5195_v32 }
 0xdd4   :  { %5200 = vmatprep.subr.bf16.mxu1 %v5199_v49 }
 0xdd7   :  { %5202 = vmatpush3.bf16.msra.mxu1 %v5199_v49 }
 0xdd8   :  { %4903 = vmatprep.subr.mxu1 %v5381_v9 }
 0xe9d   :  { %v4851_v2 = vpop.f32.mrb[16].mxu1 }
 0xe9e   :  { %v2143_v3 = vadd.f32 %v4851_v2, %v4428_v57  ;;  %v2137_v4 = vpop.f32.mrb[17].mxu1 }
 0xe9f   :  { %v2138_v5 = vadd.f32 %v4428_v57, %v2137_v4 }
 0xea0   :  { %v2147_v6 = vadd.f32 %v2143_v3, %v5977_v20 }
 0xea1   :  { %v2146_v7 = vadd.f32 %v2138_v5, %v5973_v18  ;;  %v2192_v18 = vld [vmem:[%s6541_s10] sm:$0xff] }
 0xea2   :  { %v2153_v60 = vsel %vm559_vm1, %v2147_v6, 0.0  ;;  %v5179_v40 = vpack.c.bf16 %v2193_v19, %v2192_v18  ;;  %v4443_v19 = vld [vmem:[%s6535_s4 + $0x30] sm:$0xff] }
 0xea3   :  { %2154 = vadd.xlane.f32.xlu0 %v2153_v60  ;;  %v2150_v1 = vsel %vm559_vm1, %v2146_v7, 0.0 }
 0xea4   :  { %2151 = vadd.xlane.f32.xlu1 %v2150_v1  ;;  %5180 = vmatprep.subr.bf16.mxu0 %v5179_v40 }
 0xea5   :  { %5182 = vmatpush3.bf16.msra.mxu0 %v5179_v40  ;;  %v4444_v40 = vld [vmem:[%s6535_s4 + $0x38] sm:$0xff] }
 0xea6   :  { %5184 = vmatprep.subr.bf16.mxu0 %v5183_v24  ;;  %v5207_v21 = vpack.c.bf16 %v4444_v40, %v4443_v19 }
 0xea9   :  { %5186 = vmatpush3.bf16.msra.mxu0 %v5183_v24 }
 0xf30   :  { %v2155_v8 = vpop.xlane.xlu0 %2154 }
 0xf31   :  { %v2157_v10 = vmul.f32 0.03125, %v2155_v8  ;;  %v2152_v11 = vpop.xlane.xlu1 %2151 }
 0xf32   :  { %v2156_v12 = vmul.f32 0.03125, %v2152_v11 }
 0xf33   :  { %v2159_v13 = vsub.f32 %v2147_v6, %v2157_v10 }
 0xf34   :  { %v2158_v14 = vsub.f32 %v2146_v7, %v2156_v12 }
 0xf35   :  { %v2161_v15 = vmul.f32 %v2159_v13, %v2159_v13 }
 0xf36   :  { %v2160_v16 = vmul.f32 %v2158_v14, %v2158_v14 }
 0xf37   :  { %v2165_v17 = vsel %vm559_vm1, %v2161_v15, 0.0 }
 0xf38   :  { %2166 = vadd.xlane.f32.xlu1 %v2165_v17  ;;  %v2162_v20 = vsel %vm559_vm1, %v2160_v16, 0.0  ;;  %v4441_v17 = vld [vmem:[%s6535_s4 + $0x20] sm:$0xff] }
 0xf39   :  { %2163 = vadd.xlane.f32.xlu0 %v2162_v20  ;;  %v4442_v20 = vld [vmem:[%s6535_s4 + $0x28] sm:$0xff]  ;;  %s6581_s4 = smov 24  }
 0xf3a   :  { %v5203_v18 = vpack.c.bf16 %v4442_v20, %v4441_v17 }
 0xf3c   :  { %5204 = vmatprep.subr.bf16.mxu0 %v5203_v18 }
 0xfc5   :  { %v2167_v23 = vpop.xlane.xlu1 %2166 }
 0xfc6   :  { %v2169_v33 = vmul.f32 0.03125, %v2167_v23  ;;  %v2164_v34 = vpop.xlane.xlu0 %2163  ;;  %v4440_v23 = vld [vmem:[%s6546_s15] ss:$0 sm:$0xff] }
 0xfc7   :  { %v2168_v35 = vmul.f32 0.03125, %v2164_v34 }
 0xfc8   :  { %v2171_v59 = vadd.f32 1e-05, %v2169_v33 }
 0xfc9   :  { %v2170_v36 = vadd.f32 1e-05, %v2168_v35 }
 0xfca   :  { %5306 = vrsqrt.f32 %v2171_v59 }
 0xfcb   :  { %5308 = vrsqrt.f32 %v2170_v36  ;;  %v4446_v36 = vld [vmem:[%s6536_s5 + $0x1] ss:$0 sm:$0xff]  ;;  %s6575_s5 = smov 48  }
 0xfd4   :  { %v5307_v55 = vpop.eup %5306 }
 0xfd5   :  { %v5309_v37 = vpop.eup %5308  ;;  %v2175_v39 = vmul.f32 %v5307_v55, %v2159_v13 }
 0xfd6   :  { %v2174_v41 = vmul.f32 %v5309_v37, %v2158_v14 }
 0xfd7   :  { %v2183_v43 = vmul.f32 %v4431_v62, %v2175_v39 }
 0xfd8   :  { %v2182_v44 = vmul.f32 %v4431_v62, %v2174_v41 }
 0xfd9   :  { %v2191_v46 = vadd.f32 %v4432_v42, %v2183_v43 }
 0xfda   :  { %v2190_v45 = vadd.f32 %v4432_v42, %v2182_v44 }
 0xfdc   :  { %4860 = vmatprep.mubr.msk.f32.mxu0 %vm559_vm1, %v2190_v45 }
 0xfdd   :  { %4861 = vmatmul.mubr.msk.f32.vlgmr.msra.gmra.mrb[34].mxu0 %vm559_vm1, %v2191_v46 }
 0xfde   :  { %5206 = vmatpush3.bf16.msra.mxu0 %v5203_v18 }
 0xfdf   :  { %5208 = vmatprep.subr.bf16.mxu0 %v5207_v21 }
 0xfe2   :  { %5210 = vmatpush3.bf16.msra.mxu0 %v5207_v21 }
 0xfe3   :  { %4893 = vmatprep.subr.mxu0 %v5381_v9 }
0x10b0   :  { %v4862_v52 = vpop.f32.mrb[34].mxu0 }
0x10b1   :  { %v2281_v53 = vadd.f32 %v4862_v52, %v4433_v51  ;;  %v2275_v54 = vpop.f32.mrb[35].mxu0 }
0x10b2   :  { %v2276_v56 = vadd.f32 %v4433_v51, %v2275_v54 }
0x10b3   :  { %v2285_v61 = vmax.f32 %v2281_v53, 0.0 }
0x10b4   :  { %v2284_v58 = vmax.f32 %v2276_v56, 0.0 }
0x10b6   :  { %4879 = vmatprep.mubr.msk.f32.mxu1 %vm2301_vm6, %v2284_v58 }
0x10b7   :  { %4880 = vmatmul.mubr.msk.f32.vlgmr.msra.gmra.mrb[18].mxu1 %vm2301_vm6, %v2285_v61 }
0x10b8   :  { %4905 = vmatprep.mubr.msk.f32.mxu1 %vm5382_vm2, %v5381_v9 }
0x118a   :  { %v4881_v0 = vpop.f32.mrb[18].mxu1 }
0x118b   :  { %v2380_v57 = vadd.f32 %v4881_v0, %v4436_v63  ;;  %v2374_v2 = vpop.f32.mrb[19].mxu1 }
0x118c   :  { %v2375_v3 = vadd.f32 %v4436_v63, %v2374_v2 }
0x118d   :  { %v2384_v4 = vadd.f32 %v2380_v57, %v2191_v46 }
0x118e   :  { %v2383_v5 = vadd.f32 %v2375_v3, %v2190_v45 }
0x118f   :  { %v2390_v6 = vsel %vm559_vm1, %v2384_v4, 0.0 }
0x1190   :  { %2391 = vadd.xlane.f32.xlu1 %v2390_v6  ;;  %v2387_v7 = vsel %vm559_vm1, %v2383_v5, 0.0 }
0x1191   :  { %2388 = vadd.xlane.f32.xlu0 %v2387_v7 }
0x121d   :  { %v2392_v60 = vpop.xlane.xlu1 %2391 }
0x121e   :  { %v2394_v1 = vmul.f32 0.03125, %v2392_v60  ;;  %v2389_v8 = vpop.xlane.xlu0 %2388 }
0x121f   :  { %v2393_v10 = vmul.f32 0.03125, %v2389_v8 }
0x1220   :  { %v2396_v11 = vsub.f32 %v2384_v4, %v2394_v1 }
0x1221   :  { %v2395_v12 = vsub.f32 %v2383_v5, %v2393_v10 }
0x1222   :  { %v2398_v13 = vmul.f32 %v2396_v11, %v2396_v11 }
0x1223   :  { %v2397_v14 = vmul.f32 %v2395_v12, %v2395_v12 }
0x1224   :  { %v2402_v15 = vsel %vm559_vm1, %v2398_v13, 0.0 }
0x1225   :  { %2403 = vadd.xlane.f32.xlu1 %v2402_v15  ;;  %v2399_v16 = vsel %vm559_vm1, %v2397_v14, 0.0 }
0x1226   :  { %2400 = vadd.xlane.f32.xlu0 %v2399_v16 }
0x12b2   :  { %v2404_v22 = vpop.xlane.xlu1 %2403 }
0x12b3   :  { %v2406_v24 = vmul.f32 0.03125, %v2404_v22  ;;  %v2401_v25 = vpop.xlane.xlu0 %2400 }
0x12b4   :  { %v2405_v50 = vmul.f32 0.03125, %v2401_v25 }
0x12b5   :  { %v2408_v26 = vadd.f32 1e-05, %v2406_v24 }
0x12b6   :  { %v2407_v27 = vadd.f32 1e-05, %v2405_v50 }
0x12b7   :  { %5310 = vrsqrt.f32 %v2408_v26 }
0x12b8   :  { %5312 = vrsqrt.f32 %v2407_v27 }
0x12c1   :  { %v5311_v28 = vpop.eup %5310 }
0x12c2   :  { %v5313_v30 = vpop.eup %5312  ;;  %v2412_v31 = vmul.f32 %v5311_v28, %v2396_v11 }
0x12c3   :  { %v2411_v32 = vmul.f32 %v5313_v30, %v2395_v12 }
0x12c4   :  { %v2420_v33 = vmul.f32 %v4439_v29, %v2412_v31 }
0x12c5   :  { %v2419_v34 = vmul.f32 %v4439_v29, %v2411_v32 }
0x12c6   :  { %v6247_v59 = vadd.f32 %v4440_v23, %v2420_v33 }
0x12c7   :  { %v6245_v35 = vadd.f32 %v4440_v23, %v2419_v34 }
0x12c9   :  { %4890 = vmatprep.mubr.msk.f32.mxu0 %vm559_vm1, %v6245_v35 }
0x12ca   :  { %4891 = vmatmul.mubr.msk.f32.vlgmr.msra.gmra.mrb[36].mxu0 %vm559_vm1, %v6247_v59 }
0x12cb   :  { %4895 = vmatprep.mubr.msk.f32.mxu0 %vm5382_vm2, %v5381_v9 }
0x139d   :  { %v4892_v55 = vpop.f32.mrb[36].mxu0 }
0x139e   :  { %v6258_v62 = vadd.f32 %v4892_v55, %v4446_v36  ;;  %v2514_v37 = vpop.f32.mrb[37].mxu0 }
0x139f   :  { %v6260_v39 = vadd.f32 %v4446_v36, %v2514_v37 }
0x13a0   :  { %2601 = vrot.lane.b32.xlu1 %v6258_v62, %s5383_s25 }
0x13a1   :  { %2524 = vrot.lane.b32.xlu0 %v6260_v39, %s5383_s25  ;;  %s6576_s25 = smov 72  }
0x1412   :  { %v2602_v42 = vpop.permute.xlu1 %2601 }
0x1413   :  { %v2525_v41 = vpop.permute.xlu0 %2524 }
0x1414   :  { %4894 = vmatpush3.xpose.msk.msra.mxu0 %vm698_vm3, %v2525_v41 }
0x1415   :  { %4898 = vmatprep.subr.mxu0 %v5381_v9 }
0x1417   :  { %4896 = vmatmul.mubr.msk.f32.vlgmr.msra.gmra.mrb[38].mxu0 %vm698_vm3, %v6260_v39 }
0x1418   :  { %4899 = vmatpush3.xpose.msk.msra.mxu0 %vm698_vm3, %v2602_v42  ;;  %4900 = vmatprep.mubr.msk.f32.mxu0 %vm5382_vm2, %v5381_v9 }
0x1419   :  { %4908 = vmatprep.subr.mxu0 %v5381_v9 }
0x141b   :  { %4901 = vmatmul.mubr.msk.f32.vlgmr.msra.gmra.mrb[40].mxu0 %vm698_vm3, %v6258_v62 }
0x141c   :  { %4910 = vmatprep.mubr.msk.f32.mxu0 %vm5382_vm2, %v5381_v9 }
0x14ea   :  { %v2596_v43 = vpop.f32.mrb[38].mxu0 }
0x14eb   :  { %v2677_v44 = vmul.f32 0.35355338, %v2596_v43  ;;  %v4897_v45 = vpop.f32.mrb[39].mxu0 }
0x14ed   :  { %v2679_v46 = vsel %vm698_vm3, %v2677_v44, -inf }
0x14ee   :  { %2680 = vmax.xlane.f32.xlu1 %v2679_v46  ;;  %v2673_v47 = vpop.f32.mrb[40].mxu0 }
0x14ef   :  { %v2678_v48 = vmul.f32 0.35355338, %v2673_v47  ;;  %v4902_v49 = vpop.f32.mrb[41].mxu0 }
0x14f1   :  { %v2682_v51 = vsel %vm698_vm3, %v2678_v48, -inf }
0x14f2   :  { %2683 = vmax.xlane.f32.xlu0 %v2682_v51 }
0x14ff   :  { %2777 = vrot.lane.b32.xlu1 %v6258_v62, %s5384_s26 }
0x1503   :  { %2855 = vrot.lane.b32.xlu1 %v6260_v39, %s5385_s13 }
0x1508   :  { %2701 = vrot.lane.b32.xlu0 %v6260_v39, %s5384_s26  ;;  %s6577_s26 = smov 104  }
0x157b   :  { %v2681_v52 = vpop.xlane.xlu1 %2680 }
0x157c   :  { %v2685_v53 = vsub.f32 %v2677_v44, %v2681_v52 }
0x157e   :  { %v2687_v54 = vmul.f32 1.442695, %v2685_v53 }
0x157f   :  { %v2778_v56 = vpop.permute.xlu1 %2777  ;;  %v2684_v58 = vpop.xlane.xlu0 %2683 }
0x1580   :  { %5314 = vpow2.f32 %v2687_v54  ;;  %v2686_v61 = vsub.f32 %v2678_v48, %v2684_v58  ;;  %4909 = vmatpush3.msra.mxu0 %v2778_v56 }
0x1581   :  { %4918 = vmatprep.subr.mxu0 %v5381_v9 }
0x1582   :  { %v2689_v63 = vmul.f32 1.442695, %v2686_v61 }
0x1583   :  { %v2702_v0 = vpop.permute.xlu0 %2701  ;;  %v2856_v5 = vpop.permute.xlu1 %2855 }
0x1584   :  { %5316 = vpow2.f32 %v2689_v63  ;;  %4904 = vmatpush3.msra.mxu1 %v2702_v0 }
0x1585   :  { %4913 = vmatprep.subr.mxu1 %v5381_v9 }
0x158a   :  { %v5315_v57 = vpop.eup %5314 }
0x158b   :  { %v2691_v2 = vsel %vm698_vm3, %v5315_v57, 0.0 }
0x158c   :  { %2692 = vadd.xlane.f32.xlu0 %v2691_v2 }
0x158e   :  { %v5317_v3 = vpop.eup %5316 }
0x158f   :  { %v2694_v4 = vsel %vm698_vm3, %v5317_v3, 0.0 }
0x1590   :  { %2695 = vadd.xlane.f32.xlu1 %v2694_v4 }
0x15a1   :  { %2853 = vrot.lane.b32.xlu1 %v6260_v39, %s5386_s27 }
0x15a2   :  { %2933 = vrot.lane.b32.xlu0 %v6258_v62, %s5385_s13  ;;  %s6578_s13 = smov 40  }
0x15a6   :  { %2931 = vrot.lane.b32.xlu0 %v6258_v62, %s5386_s27  ;;  %s6579_s27 = smov 8  }
0x1619   :  { %v2693_v6 = vpop.xlane.xlu0 %2692 }
0x161a   :  { %5318 = vrcp.f32 %v2693_v6 }
0x161d   :  { %v2696_v7 = vpop.xlane.xlu1 %2695  ;;  %v2934_v10 = vpop.permute.xlu0 %2933 }
0x161e   :  { %5320 = vrcp.f32 %v2696_v7 }
0x1621   :  { %v2854_v12 = vpop.permute.xlu1 %2853  ;;  %v2932_v13 = vpop.permute.xlu0 %2931 }
0x1624   :  { %v5319_v60 = vpop.eup %5318 }
0x1625   :  { %v2699_v1 = vmul.f32 %v5319_v60, %v5315_v57 }
0x1627   :  { %4906 = vmatmul.mubr.msk.f32.vlgmr.msra.gmra.mrb[20].mxu1 %vm698_vm3, %v2699_v1 }
0x1628   :  { %v5321_v8 = vpop.eup %5320  ;;  %4914 = vmatpush3.xpose.msk.msra.mxu1 %vm698_vm3, %v2856_v5  ;;  %4915 = vmatprep.mubr.msk.f32.mxu1 %vm5382_vm2, %v5381_v9 }
0x1629   :  { %v2700_v11 = vmul.f32 %v5321_v8, %v5317_v3  ;;  %4923 = vmatprep.subr.mxu1 %v5381_v9 }
0x162b   :  { %4911 = vmatmul.mubr.msk.f32.vlgmr.msra.gmra.mrb[42].mxu0 %vm698_vm3, %v2700_v11  ;;  %4916 = vmatmul.mubr.msk.f32.vlgmr.msra.gmra.mrb[22].mxu1 %vm698_vm3, %v2854_v12 }
0x162c   :  { %4919 = vmatpush3.xpose.msk.msra.mxu0 %vm698_vm3, %v2934_v10  ;;  %4920 = vmatprep.mubr.msk.f32.mxu0 %vm5382_vm2, %v5381_v9 }
0x162d   :  { %4928 = vmatprep.subr.mxu0 %v5381_v9  ;;  %4925 = vmatprep.mubr.msk.f32.mxu1 %vm5382_vm2, %v5381_v9 }
0x162f   :  { %4921 = vmatmul.mubr.msk.f32.vlgmr.msra.gmra.mrb[44].mxu0 %vm698_vm3, %v2932_v13 }
0x1630   :  { %4930 = vmatprep.mubr.msk.f32.mxu0 %vm5382_vm2, %v5381_v9 }
0x16fa   :  { %v6312_v14 = vpop.f32.mrb[20].mxu1 }
0x16fb   :  { %v4907_v15 = vpop.f32.mrb[21].mxu1 }
0x16fe   :  { %v6314_v16 = vpop.f32.mrb[42].mxu0  ;;  %v2927_v17 = vpop.f32.mrb[22].mxu1 }
0x16ff   :  { %v3009_v20 = vmul.f32 0.35355338, %v2927_v17  ;;  %v4912_v18 = vpop.f32.mrb[43].mxu0  ;;  %v4917_v19 = vpop.f32.mrb[23].mxu1 }
0x1701   :  { %v3011_v40 = vsel %vm698_vm3, %v3009_v20, -inf }
0x1702   :  { %3012 = vmax.xlane.f32.xlu1 %v3011_v40  ;;  %v3005_v21 = vpop.f32.mrb[44].mxu0 }
0x1703   :  { %v3010_v22 = vmul.f32 0.35355338, %v3005_v21  ;;  %v4922_v24 = vpop.f32.mrb[45].mxu0 }
0x1705   :  { %v3014_v25 = vsel %vm698_vm3, %v3010_v22, -inf }
0x1706   :  { %3015 = vmax.xlane.f32.xlu0 %v3014_v25 }
0x1713   :  { %3109 = vrot.lane.b32.xlu1 %v6258_v62, %s5387_s28 }
0x1717   :  { %3187 = vrot.lane.b32.xlu1 %v6260_v39, %s5388_s29 }
0x171c   :  { %3033 = vrot.lane.b32.xlu0 %v6260_v39, %s5387_s28  ;;  %s6580_s28 = smov 16  }
0x178f   :  { %v3013_v50 = vpop.xlane.xlu1 %3012 }
0x1790   :  { %v3017_v26 = vsub.f32 %v3009_v20, %v3013_v50 }
0x1792   :  { %v3019_v27 = vmul.f32 1.442695, %v3017_v26 }
0x1793   :  { %v3110_v28 = vpop.permute.xlu1 %3109  ;;  %v3016_v29 = vpop.xlane.xlu0 %3015 }
0x1794   :  { %5322 = vpow2.f32 %v3019_v27  ;;  %v3018_v30 = vsub.f32 %v3010_v22, %v3016_v29  ;;  %4929 = vmatpush3.msra.mxu0 %v3110_v28 }
0x1795   :  { %4938 = vmatprep.subr.mxu0 %v5381_v9 }
0x1796   :  { %v3021_v31 = vmul.f32 1.442695, %v3018_v30 }
0x1797   :  { %v3034_v32 = vpop.permute.xlu0 %3033  ;;  %v3188_v55 = vpop.permute.xlu1 %3187 }
0x1798   :  { %5324 = vpow2.f32 %v3021_v31  ;;  %4924 = vmatpush3.msra.mxu1 %v3034_v32 }
0x1799   :  { %4933 = vmatprep.subr.mxu1 %v5381_v9 }
0x179e   :  { %v5323_v23 = vpop.eup %5322 }
0x179f   :  { %v3023_v33 = vsel %vm698_vm3, %v5323_v23, 0.0 }
0x17a0   :  { %3024 = vadd.xlane.f32.xlu0 %v3023_v33 }
0x17a2   :  { %v5325_v34 = vpop.eup %5324 }
0x17a3   :  { %v3026_v36 = vsel %vm698_vm3, %v5325_v34, 0.0 }
0x17a4   :  { %3027 = vadd.xlane.f32.xlu1 %v3026_v36 }
0x17b5   :  { %3185 = vrot.lane.b32.xlu1 %v6260_v39, %s5389_s30 }
0x17b6   :  { %3265 = vrot.lane.b32.xlu0 %v6258_v62, %s5388_s29 }
0x17ba   :  { %3263 = vrot.lane.b32.xlu0 %v6258_v62, %s5389_s30 }
0x182d   :  { %v3025_v37 = vpop.xlane.xlu0 %3024 }
0x182e   :  { %5326 = vrcp.f32 %v3025_v37 }
0x1831   :  { %v3028_v41 = vpop.xlane.xlu1 %3027  ;;  %v3266_v45 = vpop.permute.xlu0 %3265 }
0x1832   :  { %5328 = vrcp.f32 %v3028_v41 }
0x1835   :  { %v3186_v47 = vpop.permute.xlu1 %3185  ;;  %v3264_v48 = vpop.permute.xlu0 %3263 }
0x1838   :  { %v5327_v42 = vpop.eup %5326 }
0x1839   :  { %v3031_v43 = vmul.f32 %v5327_v42, %v5323_v23 }
0x183b   :  { %4926 = vmatmul.mubr.msk.f32.vlgmr.msra.gmra.mrb[24].mxu1 %vm698_vm3, %v3031_v43 }
0x183c   :  { %v5329_v44 = vpop.eup %5328  ;;  %4934 = vmatpush3.xpose.msk.msra.mxu1 %vm698_vm3, %v3188_v55  ;;  %4935 = vmatprep.mubr.msk.f32.mxu1 %vm5382_vm2, %v5381_v9 }
0x183d   :  { %v3032_v46 = vmul.f32 %v5329_v44, %v5325_v34  ;;  %4943 = vmatprep.subr.mxu1 %v5381_v9 }
0x183f   :  { %4931 = vmatmul.mubr.msk.f32.vlgmr.msra.gmra.mrb[46].mxu0 %vm698_vm3, %v3032_v46  ;;  %4936 = vmatmul.mubr.msk.f32.vlgmr.msra.gmra.mrb[26].mxu1 %vm698_vm3, %v3186_v47 }
0x1840   :  { %4939 = vmatpush3.xpose.msk.msra.mxu0 %vm698_vm3, %v3266_v45  ;;  %4940 = vmatprep.mubr.msk.f32.mxu0 %vm5382_vm2, %v5381_v9 }
0x1841   :  { %4948 = vmatprep.subr.mxu0 %v5381_v9  ;;  %4945 = vmatprep.mubr.msk.f32.mxu1 %vm5382_vm2, %v5381_v9 }
0x1843   :  { %4941 = vmatmul.mubr.msk.f32.vlgmr.msra.gmra.mrb[48].mxu0 %vm698_vm3, %v3264_v48 }
0x1844   :  { %4950 = vmatprep.mubr.msk.f32.mxu0 %vm5382_vm2, %v5381_v9 }
0x190e   :  { %v6350_v49 = vpop.f32.mrb[24].mxu1 }
0x190f   :  { %v4927_v51 = vpop.f32.mrb[25].mxu1 }
0x1912   :  { %v6352_v52 = vpop.f32.mrb[46].mxu0  ;;  %v3259_v53 = vpop.f32.mrb[26].mxu1 }
0x1913   :  { %v3341_v54 = vmul.f32 0.35355338, %v3259_v53  ;;  %v4932_v56 = vpop.f32.mrb[47].mxu0  ;;  %v4937_v58 = vpop.f32.mrb[27].mxu1 }
0x1915   :  { %v3343_v61 = vsel %vm698_vm3, %v3341_v54, -inf }
0x1916   :  { %3344 = vmax.xlane.f32.xlu1 %v3343_v61  ;;  %v3337_v63 = vpop.f32.mrb[48].mxu0  ;;  %v4474_v61 = vld [vmem:[%s6537_s6 + $0x28] sm:$0xff] }
0x1917   :  { %v3342_v0 = vmul.f32 0.35355338, %v3337_v63  ;;  %v4942_v57 = vpop.f32.mrb[49].mxu0 }
0x1918   :  { %v4476_v57 = vld [vmem:[%s6537_s6 + $0x38] sm:$0xff] }
0x1919   :  { %v3346_v2 = vsel %vm698_vm3, %v3342_v0, -inf }
0x191a   :  { %3347 = vmax.xlane.f32.xlu0 %v3346_v2 }
0x1927   :  { %3441 = vrot.lane.b32.xlu1 %v6258_v62, %s6575_s5 }
0x192b   :  { %3519 = vrot.lane.b32.xlu1 %v6260_v39, %s6576_s25 }
0x1930   :  { %3365 = vrot.lane.b32.xlu0 %v6260_v39, %s6575_s5 }
0x19a3   :  { %v3345_v3 = vpop.xlane.xlu1 %3344 }
0x19a4   :  { %v3349_v4 = vsub.f32 %v3341_v54, %v3345_v3 }
0x19a6   :  { %v3351_v5 = vmul.f32 1.442695, %v3349_v4 }
0x19a7   :  { %v3442_v6 = vpop.permute.xlu1 %3441  ;;  %v3348_v7 = vpop.xlane.xlu0 %3347 }
0x19a8   :  { %5330 = vpow2.f32 %v3351_v5  ;;  %v3350_v60 = vsub.f32 %v3342_v0, %v3348_v7  ;;  %4949 = vmatpush3.msra.mxu0 %v3442_v6  ;;  %v4475_v0 = vld [vmem:[%s6537_s6 + $0x30] sm:$0xff] }
0x19a9   :  { %4958 = vmatprep.subr.mxu0 %v5381_v9  ;;  %v5215_v2 = vpack.c.bf16 %v4476_v57, %v4475_v0 }
0x19aa   :  { %v3353_v1 = vmul.f32 1.442695, %v3350_v60 }
0x19ab   :  { %v3366_v8 = vpop.permute.xlu0 %3365  ;;  %v3520_v15 = vpop.permute.xlu1 %3519 }
0x19ac   :  { %5332 = vpow2.f32 %v3353_v1  ;;  %4944 = vmatpush3.msra.mxu1 %v3366_v8 }
0x19ad   :  { %4953 = vmatprep.subr.mxu1 %v5381_v9 }
0x19b2   :  { %v5331_v10 = vpop.eup %5330 }
0x19b3   :  { %v3355_v11 = vsel %vm698_vm3, %v5331_v10, 0.0 }
0x19b4   :  { %3356 = vadd.xlane.f32.xlu0 %v3355_v11 }
0x19b6   :  { %v5333_v12 = vpop.eup %5332 }
0x19b7   :  { %v3358_v13 = vsel %vm698_vm3, %v5333_v12, 0.0 }
0x19b8   :  { %3359 = vadd.xlane.f32.xlu1 %v3358_v13 }
0x19c9   :  { %3517 = vrot.lane.b32.xlu1 %v6260_v39, %s6577_s26 }
0x19ca   :  { %3597 = vrot.lane.b32.xlu0 %v6258_v62, %s6576_s25 }
0x19ce   :  { %3595 = vrot.lane.b32.xlu0 %v6258_v62, %s6577_s26 }
0x1a41   :  { %v3357_v17 = vpop.xlane.xlu0 %3356 }
0x1a42   :  { %5334 = vrcp.f32 %v3357_v17 }
0x1a45   :  { %v3360_v20 = vpop.xlane.xlu1 %3359  ;;  %v3598_v21 = vpop.permute.xlu0 %3597 }
0x1a46   :  { %5336 = vrcp.f32 %v3360_v20 }
0x1a49   :  { %v3518_v24 = vpop.permute.xlu1 %3517  ;;  %v3596_v25 = vpop.permute.xlu0 %3595 }
0x1a4c   :  { %v5335_v18 = vpop.eup %5334 }
0x1a4d   :  { %v3363_v19 = vmul.f32 %v5335_v18, %v5331_v10 }
0x1a4f   :  { %4946 = vmatmul.mubr.msk.f32.vlgmr.msra.gmra.mrb[28].mxu1 %vm698_vm3, %v3363_v19 }
0x1a50   :  { %v5337_v40 = vpop.eup %5336  ;;  %4954 = vmatpush3.xpose.msk.msra.mxu1 %vm698_vm3, %v3520_v15  ;;  %4955 = vmatprep.mubr.msk.f32.mxu1 %vm5382_vm2, %v5381_v9 }
0x1a51   :  { %v3364_v22 = vmul.f32 %v5337_v40, %v5333_v12  ;;  %4963 = vmatprep.subr.mxu1 %v5381_v9 }
0x1a53   :  { %4951 = vmatmul.mubr.msk.f32.vlgmr.msra.gmra.mrb[50].mxu0 %vm698_vm3, %v3364_v22  ;;  %4956 = vmatmul.mubr.msk.f32.vlgmr.msra.gmra.mrb[30].mxu1 %vm698_vm3, %v3518_v24 }
0x1a54   :  { %4959 = vmatpush3.xpose.msk.msra.mxu0 %vm698_vm3, %v3598_v21  ;;  %4960 = vmatprep.mubr.msk.f32.mxu0 %vm5382_vm2, %v5381_v9 }
0x1a55   :  { %4968 = vmatprep.subr.mxu0 %v5381_v9  ;;  %4965 = vmatprep.mubr.msk.f32.mxu1 %vm5382_vm2, %v5381_v9 }
0x1a57   :  { %4961 = vmatmul.mubr.msk.f32.vlgmr.msra.gmra.mrb[52].mxu0 %vm698_vm3, %v3596_v25 }
0x1a58   :  { %4970 = vmatprep.mubr.msk.f32.mxu0 %vm5382_vm2, %v5381_v9 }
0x1b22   :  { %v3437_v50 = vpop.f32.mrb[28].mxu1 }
0x1b23   :  { %v4947_v26 = vpop.f32.mrb[29].mxu1 }
0x1b26   :  { %v3513_v27 = vpop.f32.mrb[50].mxu0  ;;  %v3591_v28 = vpop.f32.mrb[30].mxu1 }
0x1b27   :  { %v3673_v29 = vmul.f32 0.35355338, %v3591_v28  ;;  %v4952_v30 = vpop.f32.mrb[51].mxu0  ;;  %v4957_v31 = vpop.f32.mrb[31].mxu1 }
0x1b29   :  { %v3675_v32 = vsel %vm698_vm3, %v3673_v29, -inf }
0x1b2a   :  { %3676 = vmax.xlane.f32.xlu1 %v3675_v32  ;;  %v3669_v23 = vpop.f32.mrb[52].mxu0 }
0x1b2b   :  { %v3674_v33 = vmul.f32 0.35355338, %v3669_v23  ;;  %v4962_v34 = vpop.f32.mrb[53].mxu0 }
0x1b2c   :  { %v4486_v34 = vld [vmem:[%s6541_s10 + $0x28] sm:$0xff] }
0x1b2d   :  { %v3678_v36 = vsel %vm698_vm3, %v3674_v33, -inf }
0x1b2e   :  { %3679 = vmax.xlane.f32.xlu0 %v3678_v36 }
0x1bb7   :  { %v3677_v55 = vpop.xlane.xlu1 %3676 }
0x1bb8   :  { %v3681_v37 = vsub.f32 %v3673_v29, %v3677_v55  ;;  %v4487_v55 = vld [vmem:[%s6541_s10 + $0x30] sm:$0xff] }
0x1bba   :  { %v3683_v41 = vmul.f32 1.442695, %v3681_v37  ;;  %v4488_v37 = vld [vmem:[%s6541_s10 + $0x38] sm:$0xff] }
0x1bbb   :  { %v3680_v42 = vpop.xlane.xlu0 %3679 }
0x1bbc   :  { %5338 = vpow2.f32 %v3683_v41  ;;  %v3682_v43 = vsub.f32 %v3674_v33, %v3680_v42  ;;  %v5223_v41 = vpack.c.bf16 %v4488_v37, %v4487_v55  ;;  %v4493_v42 = vld [vmem:[%s6543_s12 + $0x40] sm:$0xff] }
0x1bbe   :  { %v3685_v44 = vmul.f32 1.442695, %v3682_v43  ;;  %v4494_v43 = vld [vmem:[%s6543_s12 + $0x48] sm:$0xff] }
0x1bc0   :  { %5340 = vpow2.f32 %v3685_v44  ;;  %v4495_v44 = vld [vmem:[%s6543_s12 + $0x50] sm:$0xff] }
0x1bc6   :  { %v5339_v45 = vpop.eup %5338 }
0x1bc7   :  { %v3687_v46 = vsel %vm698_vm3, %v5339_v45, 0.0 }
0x1bc8   :  { %3688 = vadd.xlane.f32.xlu0 %v3687_v46  ;;  %v4496_v46 = vld [vmem:[%s6543_s12 + $0x58] sm:$0xff] }
0x1bca   :  { %v5341_v47 = vpop.eup %5340 }
0x1bcb   :  { %v3690_v48 = vsel %vm698_vm3, %v5341_v47, 0.0 }
0x1bcc   :  { %3691 = vadd.xlane.f32.xlu1 %v3690_v48  ;;  %v4497_v48 = vld [vmem:[%s6543_s12 + $0x60] sm:$0xff] }
0x1bdd   :  { %3773 = vrot.lane.b32.xlu1 %v6258_v62, %s6578_s13 }
0x1bde   :  { %3697 = vrot.lane.b32.xlu0 %v6260_v39, %s6578_s13 }
0x1be1   :  { %3851 = vrot.lane.b32.xlu1 %v6350_v49, %s6579_s27 }
0x1be2   :  { %3853 = vrot.lane.b32.xlu0 %v6352_v52, %s6579_s27  ;;  %v4473_v52 = vld [vmem:[%s6537_s6 + $0x20] sm:$0xff] }
0x1be3   :  { %v5211_v63 = vpack.c.bf16 %v4474_v61, %v4473_v52  ;;  %v4483_v61 = vld [vmem:[%s6539_s8 + $0x1] ss:$0 sm:$0xff] }
0x1be5   :  { %3859 = vrot.lane.b32.xlu1 %v3437_v50, %s6580_s28 }
0x1be6   :  { %3861 = vrot.lane.b32.xlu0 %v3513_v27, %s6580_s28 }
0x1c55   :  { %v3689_v51 = vpop.xlane.xlu0 %3688 }
0x1c56   :  { %5342 = vrcp.f32 %v3689_v51  ;;  %v4498_v51 = vld [vmem:[%s6543_s12 + $0x68] sm:$0xff] }
0x1c59   :  { %v3692_v53 = vpop.xlane.xlu1 %3691  ;;  %v3698_v54 = vpop.permute.xlu0 %3697 }
0x1c5a   :  { %5344 = vrcp.f32 %v3692_v53  ;;  %4964 = vmatpush3.msra.mxu1 %v3698_v54  ;;  %v5235_v53 = vpack.c.bf16 %v4498_v51, %v4497_v48 }
0x1c5b   :  { %5212 = vmatprep.subr.bf16.mxu1 %v5211_v63 }
0x1c5d   :  { %v3774_v62 = vpop.permute.xlu1 %3773  ;;  %v3854_v60 = vpop.permute.xlu0 %3853 }
0x1c5e   :  { %4969 = vmatpush3.msra.mxu0 %v3774_v62  ;;  %v3874_v15 = vsel %vm698_vm3, %v6314_v16, %v3854_v60  ;;  %v4500_v60 = vld [vmem:[%s6543_s12 + $0x78] sm:$0xff] }
0x1c60   :  { %v5343_v56 = vpop.eup %5342 }
0x1c61   :  { %v3695_v39 = vmul.f32 %v5343_v56, %v5339_v45  ;;  %v3852_v7 = vpop.permute.xlu1 %3851  ;;  %v3862_v10 = vpop.permute.xlu0 %3861  ;;  %v5227_v45 = vpack.c.bf16 %v4494_v43, %v4493_v42 }
0x1c62   :  { %v3873_v8 = vsel %vm698_vm3, %v6312_v14, %v3852_v7  ;;  %v3876_v17 = vsel %vm2048_vm5, %v3874_v15, %v3862_v10  ;;  %v4478_v14 = vld [vmem:[%s6538_s7 + $0x1] ss:$0 sm:$0xff]  ;;  %v4499_v7 = vld [vmem:[%s6543_s12 + $0x70] sm:$0xff] }
0x1c63   :  { %4966 = vmatmul.mubr.msk.f32.vlgmr.msra.gmra.mrb[32].mxu1 %vm698_vm3, %v3695_v39 }
0x1c64   :  { %v5345_v49 = vpop.eup %5344  ;;  %5214 = vmatpush3.bf16.msra.mxu1 %v5211_v63 }
0x1c65   :  { %v3696_v58 = vmul.f32 %v5345_v49, %v5341_v47  ;;  %5216 = vmatprep.subr.bf16.mxu1 %v5215_v2  ;;  %v3860_v1 = vpop.permute.xlu1 %3859  ;;  %v5231_v47 = vpack.c.bf16 %v4496_v46, %v4495_v44  ;;  %v4507_v46 = vld [vmem:[%s6545_s14 + $0x1] ss:$0 sm:$0xff]  ;;  %s5397_s14 = smov [#allocation2]  }
0x1c66   :  { %v3875_v11 = vsel %vm2048_vm5, %v3873_v8, %v3860_v1  ;;  %v5239_v1 = vpack.c.bf16 %v4500_v60, %v4499_v7  ;;  %v4490_v8 = vld [vmem:[%s6542_s11 + $0x1] ss:$0 sm:$0xff]  ;;  %s4359_s6 = sshll.u32 %s5397_s14, 4  ;;  %s4360_s6 = int_to_ptr.vmem [resolvable:$true] %s4359_s6 }
0x1c67   :  { %4971 = vmatmul.mubr.msk.f32.vlgmr.msra.gmra.mrb[54].mxu0 %vm698_vm3, %v3696_v58  ;;  %p5359_p1 = scmp.lt.s32.totalorder %s4360_s6, %s4360_s6 }
0x1c68   :  { %5218 = vmatpush3.bf16.msra.mxu1 %v5215_v2  ;;  %v4484_v2 = vld [vmem:[%s6540_s9 + $0x1] ss:$0 sm:$0xff] }
0x1c69   :  { %5228 = vmatprep.subr.bf16.mxu1 %v5227_v45 }
0x1d36   :  { %v3769_v3 = vpop.f32.mrb[32].mxu1 }
0x1d37   :  { %3867 = vrot.lane.b32.xlu1 %v3769_v3, %s6581_s4  ;;  %v4967_v4 = vpop.f32.mrb[33].mxu1 }
0x1d3a   :  { %v3845_v5 = vpop.f32.mrb[54].mxu0 }
0x1d3b   :  { %3869 = vrot.lane.b32.xlu0 %v3845_v5, %s6581_s4  ;;  %v4972_v6 = vpop.f32.mrb[55].mxu0 }
0x1da9   :  { %v3868_v12 = vpop.permute.xlu1 %3867 }
0x1daa   :  { %v3877_v13 = vsel %vm2051_vm4, %v3875_v11, %v3868_v12 }
0x1dab   :  { %4981 = vmatprep.mubr.msk.f32.mxu1 %vm559_vm1, %v3877_v13 }
0x1dad   :  { %v3870_v20 = vpop.permute.xlu0 %3869 }
0x1dae   :  { %v3878_v18 = vsel %vm2051_vm4, %v3876_v17, %v3870_v20  ;;  %v4502_v17 = vld [vmem:[%s6574_s23 + $0x1] ss:$0 sm:$0xff] }
0x1daf   :  { %4982 = vmatmul.mubr.msk.f32.vlgmr.msra.gmra.mrb[34].mxu1 %vm559_vm1, %v3878_v18 }
0x1db0   :  { %5230 = vmatpush3.bf16.msra.mxu1 %v5227_v45 }
0x1db1   :  { %5232 = vmatprep.subr.bf16.mxu1 %v5231_v47 }
0x1db4   :  { %5234 = vmatpush3.bf16.msra.mxu1 %v5231_v47 }
0x1db5   :  { %5236 = vmatprep.subr.bf16.mxu1 %v5235_v53 }
0x1db8   :  { %5238 = vmatpush3.bf16.msra.mxu1 %v5235_v53 }
0x1db9   :  { %5240 = vmatprep.subr.bf16.mxu1 %v5239_v1 }
0x1dbc   :  { %5242 = vmatpush3.bf16.msra.mxu1 %v5239_v1 }
0x1e82   :  { %v4983_v19 = vpop.f32.mrb[34].mxu1 }
0x1e83   :  { %v3970_v40 = vadd.f32 %v4983_v19, %v4478_v14  ;;  %v3964_v21 = vpop.f32.mrb[35].mxu1 }
0x1e84   :  { %v3965_v22 = vadd.f32 %v4478_v14, %v3964_v21 }
0x1e85   :  { %v3974_v24 = vadd.f32 %v3970_v40, %v6247_v59 }
0x1e86   :  { %v3973_v25 = vadd.f32 %v3965_v22, %v6245_v35  ;;  %v4485_v35 = vld [vmem:[%s6541_s10 + $0x20] sm:$0xff] }
0x1e87   :  { %v3982_v16 = vsel %vm559_vm1, %v3974_v24, 0.0  ;;  %v5219_v36 = vpack.c.bf16 %v4486_v34, %v4485_v35  ;;  %v4270_v35 = vld [vmem:[%s6547_s16 + $0x10] sm:$0xff]  ;;  %v4271_v34 = vld [vmem:[%s6547_s16 + $0x18] sm:$0xff] }
0x1e88   :  { %3983 = vadd.xlane.f32.xlu0 %v3982_v16  ;;  %v3979_v50 = vsel %vm559_vm1, %v3973_v25, 0.0 }
0x1e89   :  { %3980 = vadd.xlane.f32.xlu1 %v3979_v50  ;;  %5220 = vmatprep.subr.bf16.mxu0 %v5219_v36 }
0x1e8a   :  { %5222 = vmatpush3.bf16.msra.mxu0 %v5219_v36  ;;  %v5247_v36 = vpack.c.bf16 %v4271_v34, %v4270_v35 }
0x1e8b   :  { %5224 = vmatprep.subr.bf16.mxu0 %v5223_v41 }
0x1e8e   :  { %5226 = vmatpush3.bf16.msra.mxu0 %v5223_v41 }
0x1e8f   :  { %5243 = vmatprep.subr.bf16.mxu0 %v5379_v38 }
0x1f15   :  { %v3984_v26 = vpop.xlane.xlu0 %3983 }
0x1f16   :  { %v3986_v27 = vmul.f32 0.03125, %v3984_v26  ;;  %v3981_v28 = vpop.xlane.xlu1 %3980 }
0x1f17   :  { %v3985_v29 = vmul.f32 0.03125, %v3981_v28 }
0x1f18   :  { %v3988_v30 = vsub.f32 %v3974_v24, %v3986_v27 }
0x1f19   :  { %v3987_v31 = vsub.f32 %v3973_v25, %v3985_v29 }
0x1f1a   :  { %v3990_v32 = vmul.f32 %v3988_v30, %v3988_v30 }
0x1f1b   :  { %v3989_v23 = vmul.f32 %v3987_v31, %v3987_v31 }
0x1f1c   :  { %v3994_v33 = vsel %vm559_vm1, %v3990_v32, 0.0 }
0x1f1d   :  { %3995 = vadd.xlane.f32.xlu1 %v3994_v33  ;;  %v3991_v59 = vsel %vm559_vm1, %v3989_v23, 0.0  ;;  %v4268_v23 = vld [vmem:[%s6547_s16] sm:$0xff]  ;;  %v4269_v33 = vld [vmem:[%s6547_s16 + $0x8] sm:$0xff] }
0x1f1e   :  { %3992 = vadd.xlane.f32.xlu0 %v3991_v59  ;;  %v5244_v59 = vpack.c.bf16 %v4269_v33, %v4268_v23 }
0x1faa   :  { %v3996_v54 = vpop.xlane.xlu1 %3995 }
0x1fab   :  { %v3998_v62 = vmul.f32 0.03125, %v3996_v54  ;;  %v3993_v56 = vpop.xlane.xlu0 %3992 }
0x1fac   :  { %v3997_v39 = vmul.f32 0.03125, %v3993_v56 }
0x1fad   :  { %v4000_v49 = vadd.f32 1e-05, %v3998_v62 }
0x1fae   :  { %v3999_v58 = vadd.f32 1e-05, %v3997_v39 }
0x1faf   :  { %5346 = vrsqrt.f32 %v4000_v49 }
0x1fb0   :  { %5348 = vrsqrt.f32 %v3999_v58  ;;  %v4509_v58 = vld [vmem:[%s6548_s17] ss:$0 sm:$0xff] }
0x1fb9   :  { %v5347_v52 = vpop.eup %5346 }
0x1fba   :  { %v5349_v63 = vpop.eup %5348  ;;  %v4004_v0 = vmul.f32 %v5347_v52, %v3988_v30 }
0x1fbb   :  { %v4003_v57 = vmul.f32 %v5349_v63, %v3987_v31 }
0x1fbc   :  { %v4012_v3 = vmul.f32 %v4483_v61, %v4004_v0 }
0x1fbd   :  { %v4011_v4 = vmul.f32 %v4483_v61, %v4003_v57 }
0x1fbe   :  { %v4020_v6 = vadd.f32 %v4484_v2, %v4012_v3 }
0x1fbf   :  { %v4019_v5 = vadd.f32 %v4484_v2, %v4011_v4 }
0x1fc1   :  { %4992 = vmatprep.mubr.msk.f32.mxu0 %vm559_vm1, %v4019_v5 }
0x1fc2   :  { %4993 = vmatmul.mubr.msk.f32.vlgmr.msra.gmra.mrb[56].mxu0 %vm559_vm1, %v4020_v6 }
0x1fc3   :  { %5022 = vmatprep.mubr.msk.f32.mxu0 %vm5382_vm2, %v5381_v9  ;;  %5245 = vmatpush3.bf16.msra.mxu0 %v5244_v59 }
0x1fc4   :  { %5246 = vmatprep.subr.bf16.mxu0 %v5379_v38  ;;  %v4508_v38 = vld [vmem:[%s6546_s15 + $0x1] ss:$0 sm:$0xff]  ;;  %s5354_s15 = scalar_lea.vmem %s4360_s6, 32 }
0x1fc5   :  { %p5355_p0 = scmp.ne.s32.totalorder %s4360_s6, %s5354_s15  ;;  %p5360_p2 = scmp.lt.s32.totalorder %s5354_s15, %s5354_s15 }
0x1fc7   :  { %5248 = vmatpush3.bf16.msra.mxu0 %v5247_v36  ;;  %p5361_p3 = por %p5360_p2, %p5359_p1 }
0x1fc9   :  { %p5362_p4 = pnand %p5361_p3, %p5355_p0 }
0x2095   :  { %v4994_v10 = vpop.f32.mrb[56].mxu0 }
0x2096   :  { %v4112_v11 = vadd.f32 %v4994_v10, %v4490_v8  ;;  %v4106_v12 = vpop.f32.mrb[57].mxu0 }
0x2097   :  { %v4107_v13 = vadd.f32 %v4490_v8, %v4106_v12 }
0x2098   :  { %v4116_v15 = vmax.f32 %v4112_v11, 0.0 }
0x2099   :  { %v4115_v9 = vmax.f32 %v4107_v13, 0.0 }
0x209b   :  { %5011 = vmatprep.mubr.msk.f32.mxu1 %vm2301_vm6, %v4115_v9 }
0x209c   :  { %5012 = vmatmul.mubr.msk.f32.vlgmr.msra.gmra.mrb[36].mxu1 %vm2301_vm6, %v4116_v15 }
0x216f   :  { %v5013_v20 = vpop.f32.mrb[36].mxu1 }
0x2170   :  { %v4212_v18 = vadd.f32 %v5013_v20, %v4502_v17  ;;  %v4206_v14 = vpop.f32.mrb[37].mxu1 }
0x2171   :  { %v4207_v19 = vadd.f32 %v4502_v17, %v4206_v14 }
0x2172   :  { %v4216_v40 = vadd.f32 %v4212_v18, %v4020_v6 }
0x2173   :  { %v4215_v21 = vadd.f32 %v4207_v19, %v4019_v5 }
0x2174   :  { %v4224_v22 = vsel %vm559_vm1, %v4216_v40, 0.0 }
0x2175   :  { %4225 = vadd.xlane.f32.xlu0 %v4224_v22  ;;  %v4221_v24 = vsel %vm559_vm1, %v4215_v21, 0.0 }
0x2176   :  { %4222 = vadd.xlane.f32.xlu1 %v4221_v24 }
0x2202   :  { %v4226_v25 = vpop.xlane.xlu0 %4225 }
0x2203   :  { %v4228_v16 = vmul.f32 0.03125, %v4226_v25  ;;  %v4223_v50 = vpop.xlane.xlu1 %4222 }
0x2204   :  { %v4227_v26 = vmul.f32 0.03125, %v4223_v50 }
0x2205   :  { %v4230_v27 = vsub.f32 %v4216_v40, %v4228_v16 }
0x2206   :  { %v4229_v28 = vsub.f32 %v4215_v21, %v4227_v26 }
0x2207   :  { %v4232_v29 = vmul.f32 %v4230_v27, %v4230_v27 }
0x2208   :  { %v4231_v30 = vmul.f32 %v4229_v28, %v4229_v28 }
0x2209   :  { %v4236_v31 = vsel %vm559_vm1, %v4232_v29, 0.0 }
0x220a   :  { %4237 = vadd.xlane.f32.xlu0 %v4236_v31  ;;  %v4233_v32 = vsel %vm559_vm1, %v4231_v30, 0.0 }
0x220b   :  { %4234 = vadd.xlane.f32.xlu1 %v4233_v32 }
0x2297   :  { %v4238_v55 = vpop.xlane.xlu0 %4237 }
0x2298   :  { %v4240_v37 = vmul.f32 0.03125, %v4238_v55  ;;  %v4235_v41 = vpop.xlane.xlu1 %4234 }
0x2299   :  { %v4239_v42 = vmul.f32 0.03125, %v4235_v41 }
0x229a   :  { %v4242_v43 = vadd.f32 1e-05, %v4240_v37 }
0x229b   :  { %v4241_v44 = vadd.f32 1e-05, %v4239_v42 }
0x229c   :  { %5350 = vrsqrt.f32 %v4242_v43 }
0x229d   :  { %5352 = vrsqrt.f32 %v4241_v44 }
0x22a6   :  { %v5351_v45 = vpop.eup %5350 }
0x22a7   :  { %v5353_v47 = vpop.eup %5352  ;;  %v4246_v48 = vmul.f32 %v5351_v45, %v4230_v27 }
0x22a8   :  { %v4245_v51 = vmul.f32 %v5353_v47, %v4229_v28 }
0x22a9   :  { %v4254_v53 = vmul.f32 %v4507_v46, %v4246_v48 }
0x22aa   :  { %v4253_v54 = vmul.f32 %v4507_v46, %v4245_v51 }
0x22ab   :  { %v4262_v62 = vadd.f32 %v4508_v38, %v4254_v53 }
0x22ac   :  { %v4261_v56 = vadd.f32 %v4508_v38, %v4253_v54 }
0x22ad   :  { %v4264_v39 = vrot.slane %v4262_v62, 7 }
0x22af   :  { %v4267_v49 = vsel %vm4266_vm7, %v4261_v56, %v4264_v39 }
0x22b0   :  { %5023 = vmatmul.mubr.msk.f32.vlgmr.msra.gmra.mrb[58].mxu0 %vm559_vm1, %v4267_v49 }
0x2383   :  { %v4348_v52 = vpop.f32.mrb[58].mxu0 }
0x2384   :  { %v4349_v61 = vadd.f32 %v4509_v58, %v4348_v52  ;;  %v5024_v63 = vpop.f32.mrb[59].mxu0 }
0x2386   :  { %4352 = vst [vmem:[#allocation2] sm:$0x3] %v4349_v61 }
0x2387   :  { %5365 = shalt.err (!%p5362_p4)
}
0x2388   :  { %s5366_s2 = scalar_lea.hbm %s6549_s18, 32 }
0x2389   :  { %p5367_p5 = scmp.ne.s32.totalorder %s6549_s18, %s5366_s2  ;;  %p5370_p6 = scmp.lt.u32.totalorder %s5366_s2, %s6549_s18 }
0x238b   :  { %p5372_p7 = pnand %p5370_p6, %p5367_p5 }
0x238d   :  { %5375 = shalt.err (!%p5372_p7)
}
0x238e   :  { %4362 = dma.vmem_to_hbm [thread:$0]  %s4360_s6, 32, %s6549_s18, [#allocation3]  }
0x238f   :  { %5376 = dma.done.wait [#allocation3], 32  }
0x2390   :  { %5377 = vsyncadd [#allocation3], 4294967264 }
0x2391   :  { %4366 = vsyncpa [#allocation3], 1 }

</bundles_post_ra>
